<compile_context>
chip_gen: v7x
topology: tpu7x:2x2x1
jax: 0.10.0
libtpu: 0.0.40
codegen_flags: <defaults>
</compile_context>

<pallas_src>
import functools

import jax
import jax.numpy as jnp
from jax.experimental import pallas as pl
from jax.experimental.pallas import tpu as pltpu


_SLOPES = (0.2, 0.2, 0.2, 0.0)   # LeakyReLU(0.2) x3, ReLU (slope 0) last
_PAD = 128                       # lane-aligned zero front pad of the buffers


def _decom_strip_kernel(x_ref, mask_ref,
                        w1_ref, b1_ref, w2_ref, b2_ref,
                        w3_ref, b3_ref, w4_ref, b4_ref,
                        o_ref,
                        abuf_ref, bbuf_ref,
                        *, Hs, W):
    """One (image, H-strip) step of the fused 4-layer 3x3 conv stack.

    x_ref   : (1, 1, 3, (Hs+8)*(W+2)+2)  pre-padded input slab (flat rows)
    mask_ref: (1, (Hs+6)*(W+2))          1.0 where a wide column is a real px
    w*_ref  : (Cout, 9*Cin)              tap-major flattened weights
    b*_ref  : (Cout, 1)                  biases (f32)
    o_ref   : (1, 1, 4, Hs*(W+2))        wide per-strip output
    abuf/bbuf: ping-pong activation buffers, layout:
        buf[PAD-1] = 0 (the "col -1" of row 0), activation (row j, col x) at
        buf[PAD + j*Wp + x]; cols x in {W, W+1} hold zeros and act as the
        left/right conv padding of the next layer.
    """
    Wp = W + 2
    R1, R2, R3 = Hs + 6, Hs + 4, Hs + 2
    L1, L2, L3, L4 = R1 * Wp, R2 * Wp, R3 * Wp, Hs * Wp

    s = pl.program_id(1)
    last = pl.num_programs(1) - 1

    maskb = mask_ref[...] != 0.0                      # (1, L1) bool, hoisted

    # The front-pad element must read as zero; it is never overwritten by the
    # aligned stores below, so a tiny per-step zero keeps every core correct.
    abuf_ref[:, _PAD - 1:_PAD] = jnp.zeros((abuf_ref.shape[0], 1), abuf_ref.dtype)
    bbuf_ref[:, _PAD - 1:_PAD] = jnp.zeros((bbuf_ref.shape[0], 1), bbuf_ref.dtype)

    def conv3x3(read_tap, w_ref, b_ref, cin, lout, slope):
        # 9 accumulating per-tap dots (no im2col temp): K = cin each.
        acc = None
        for t in range(9):
            dy, dx = divmod(t, 3)
            wt = w_ref[:, t * cin:(t + 1) * cin]              # (Cout, cin)
            xt = read_tap(dy * Wp + dx, lout)                 # (cin, lout)
            part = jnp.dot(wt, xt, preferred_element_type=jnp.float32)
            acc = part if acc is None else acc + part
        y = acc + b_ref[...]                                  # bias (Cout, 1)
        if slope != 0.0:
            y = jnp.maximum(y, 0.0) + slope * jnp.minimum(y, 0.0)
        else:
            y = jnp.maximum(y, 0.0)
        # Zero the 2 "wide" garbage columns per row: they land exactly on the
        # halo columns of the destination buffer (must stay zero).  A select
        # (not a multiply) so stale/uninitialized slack can never propagate.
        return jnp.where(maskb[:, :lout], y, 0.0)

    def store_act(dst_ref, val, rows, halo):
        lout = val.shape[1]
        dst_ref[:, _PAD:_PAD + lout] = val.astype(dst_ref.dtype)   # aligned
        zblk = jnp.zeros((dst_ref.shape[0], halo * Wp), dst_ref.dtype)

        # Recompute-halo rows that fall outside the image must be exactly
        # zero (they are the conv zero padding of the next layer).  Only the
        # first / last strips of an image clip.
        @pl.when(s == 0)
        def _():
            dst_ref[:, _PAD:_PAD + halo * Wp] = zblk

        @pl.when(s == last)
        def _():
            lo = _PAD + (rows - halo) * Wp
            dst_ref[:, lo:lo + halo * Wp] = zblk

    # ---- layer 1: from the pre-padded input slab ----------------------------
    def x_tap(off, lout):
        return x_ref[0, 0, :, off:off + lout]

    a1 = conv3x3(x_tap, w1_ref, b1_ref, 3, L1, _SLOPES[0])
    store_act(abuf_ref, a1, R1, 3)

    def buf_tap(buf):
        return lambda off, lout: buf[:, _PAD - 1 + off:_PAD - 1 + off + lout]

    a2 = conv3x3(buf_tap(abuf_ref), w2_ref, b2_ref, 32, L2, _SLOPES[1])
    store_act(bbuf_ref, a2, R2, 2)

    a3 = conv3x3(buf_tap(bbuf_ref), w3_ref, b3_ref, 32, L3, _SLOPES[2])
    store_act(abuf_ref, a3, R3, 1)

    a4 = conv3x3(buf_tap(abuf_ref), w4_ref, b4_ref, 32, L4, _SLOPES[3])  # ReLU
    o_ref[0, 0, :, :] = a4.astype(o_ref.dtype)                # lane-dense


def _flatten_conv_weight(w_oihw, dtype):
    """(Cout, Cin, 3, 3) PyTorch weight -> (Cout, 9*Cin), tap-major/channel-minor."""
    cout, cin, kh, kw = w_oihw.shape
    w = jnp.transpose(w_oihw, (0, 2, 3, 1)).reshape(cout, kh * kw * cin)
    return w.astype(dtype)


def _pick_strip_rows(H, requested):
    if requested is not None:
        if H % requested != 0:
            raise ValueError("strip_rows must divide H")
        return requested
    best = 1
    for d in range(1, min(H, 64) + 1):        # largest divisor of H that is <= 64
        if H % d == 0:
            best = d
    if best < 8:                              # degenerate (e.g. prime H): whole image
        best = H
    return best


def init_decom_params(key):
    """Deterministic synthetic parameters with the module's shapes (OIHW weights)."""
    chans = [(3, 32), (32, 32), (32, 32), (32, 4)]
    params = []
    for i, (cin, cout) in enumerate(chans):
        kw_key, kb_key = jax.random.split(jax.random.fold_in(key, i))
        fan_in = cin * 9
        scale = (2.0 / fan_in) ** 0.5
        w = scale * jax.random.normal(kw_key, (cout, cin, 3, 3), dtype=jnp.float32)
        b = 0.01 * jax.random.normal(kb_key, (cout,), dtype=jnp.float32)
        params.append((w, b))
    return params


def decom_forward(x_nchw, params, *, compute_dtype=jnp.float32, strip_rows=None):
    """Reproduces Decom.forward: (N,3,H,W) -> (R:(N,3,H,W), L:(N,1,H,W)).

    compute_dtype: jnp.float32 (reference / v5e) or jnp.bfloat16 (v6e/v7x:
    halves activation-store / weight traffic and VMEM; accumulation stays f32).
    """
    N, C, H, W = x_nchw.shape
    assert C == 3
    Wp = W + 2
    Hs = _pick_strip_rows(H, strip_rows)
    S = H // Hs
    R1 = Hs + 6
    L1, L4 = R1 * Wp, Hs * Wp
    slab_rows = Hs + 8
    slab_len = slab_rows * Wp + 2            # +2 slack for the (dy=2,dx=2) tap

    x = x_nchw.astype(jnp.float32)
    # Pre-pad: 4 zero rows top/bottom (conv pad + 3-row recompute halo), 1 zero
    # column left/right; then cut the overlapping per-strip windows (one cheap
    # XLA pass over the 3-channel input).
    P = jnp.pad(x, ((0, 0), (0, 0), (4, 4), (1, 1)))           # (N,3,H+8,Wp)
    slabs = jnp.stack(
        [jax.lax.slice_in_dim(P, s * Hs, s * Hs + slab_rows, axis=2)
         for s in range(S)], axis=1)                           # (N,S,3,Hs+8,Wp)
    slabs = slabs.reshape(N, S, 3, slab_rows * Wp)
    slabs = jnp.pad(slabs, ((0, 0), (0, 0), (0, 0), (0, 2))).astype(compute_dtype)

    col = jnp.arange(L1, dtype=jnp.int32) % Wp
    mask = (col < W).astype(jnp.float32).reshape(1, L1)

    flat = []
    for (w, b) in params:
        flat.append(_flatten_conv_weight(w, compute_dtype))
        flat.append(b.reshape(-1, 1).astype(jnp.float32))

    kernel = functools.partial(_decom_strip_kernel, Hs=Hs, W=W)

    def cspec(shape):
        return pl.BlockSpec(shape, lambda n, s: (0, 0))

    in_specs = [
        pl.BlockSpec((1, 1, 3, slab_len), lambda n, s: (n, s, 0, 0)),
        cspec((1, L1)),
        cspec(flat[0].shape), cspec(flat[1].shape),
        cspec(flat[2].shape), cspec(flat[3].shape),
        cspec(flat[4].shape), cspec(flat[5].shape),
        cspec(flat[6].shape), cspec(flat[7].shape),
    ]
    out_spec = pl.BlockSpec((1, 1, 4, L4), lambda n, s: (n, s, 0, 0))

    bpe = jnp.dtype(compute_dtype).itemsize
    abuf_len = _PAD + L1 + 2
    bbuf_len = _PAD + (Hs + 4) * Wp + 2
    scratch_bytes = 32 * (abuf_len + bbuf_len) * bpe
    io_bytes = 2 * (3 * slab_len * bpe + 4 * L4 * 4) + 2 * L1 * 4
    w_bytes = 2 * sum(int(a.size) * a.dtype.itemsize for a in flat)
    vmem_limit = int(min(max(1.3 * (scratch_bytes + io_bytes + w_bytes) + (4 << 20),
                             32 << 20), 96 << 20))

    flops = 2 * N * H * W * 9 * (3 * 32 + 32 * 32 + 32 * 32 + 32 * 4)
    bytes_accessed = (int(slabs.size) * bpe + N * S * 4 * L4 * 4
                      + int(mask.size) * 4
                      + sum(int(a.size) * a.dtype.itemsize for a in flat))

    out = pl.pallas_call(
        kernel,
        out_shape=jax.ShapeDtypeStruct((N, S, 4, L4), jnp.float32),
        grid=(N, S),
        in_specs=in_specs,
        out_specs=out_spec,
        scratch_shapes=[
            pltpu.VMEM((32, abuf_len), compute_dtype),   # ping (a1 / a3)
            pltpu.VMEM((32, bbuf_len), compute_dtype),   # pong (a2)
        ],
        compiler_params=pltpu.CompilerParams(
            dimension_semantics=("parallel", "parallel"),
            vmem_limit_bytes=vmem_limit),
        cost_estimate=pl.CostEstimate(
            flops=flops, transcendentals=0, bytes_accessed=bytes_accessed),
    )(slabs, mask, *flat)

    # Reassemble (N,4,H,W) from the per-strip wide slabs: a single cheap fused
    # transpose/slice pass over a 4-channel array (downstream consumers could
    # take the wide per-strip layout directly to skip even this).
    out = out.reshape(N, S, 4, Hs, Wp)
    out = jnp.moveaxis(out, 1, 2).reshape(N, 4, H, Wp)[:, :, :, :W]
    return out[:, 0:3], out[:, 3:4]


def ref_forward(x_nchw, params):
    y = x_nchw
    for (w, b), slope in zip(params, _SLOPES):
        y = jax.lax.conv_general_dilated(
            y, w, window_strides=(1, 1), padding=((1, 1), (1, 1)),
            dimension_numbers=("NCHW", "OIHW", "NCHW"),
            precision=jax.lax.Precision.HIGHEST,
        ) + b.reshape(1, -1, 1, 1)
        y = jnp.where(y > 0, y, y * slope)
    return y[:, 0:3], y[:, 3:4]


if __name__ == "__main__":
    key = jax.random.PRNGKey(0)
    x = jax.random.uniform(key, (2, 3, 16, 16), dtype=jnp.float32)
    params = init_decom_params(jax.random.PRNGKey(42))

    R_ref, L_ref = ref_forward(x, params)

    run_f32_auto = jax.jit(lambda a, p: decom_forward(a, p))
    run_f32_strip = jax.jit(lambda a, p: decom_forward(a, p, strip_rows=8))
    run_bf16_strip = jax.jit(
        lambda a, p: decom_forward(a, p, compute_dtype=jnp.bfloat16, strip_rows=8))

    checks = [
        ("f32/auto", run_f32_auto, 1e-3),
        ("f32/strip8", run_f32_strip, 1e-3),
        ("bf16/strip8", run_bf16_strip, 6e-2),
    ]
    for name, fn, tol in checks:
        R, L_out = fn(x, params)
        jax.block_until_ready((R, L_out))
        assert R.shape == (2, 3, 16, 16) and L_out.shape == (2, 1, 16, 16), name
        err_r = float(jnp.max(jnp.abs(R - R_ref)))
        err_l = float(jnp.max(jnp.abs(L_out - L_ref)))
        assert jnp.allclose(R, R_ref, atol=tol, rtol=tol), (name, err_r)
        assert jnp.allclose(L_out, L_ref, atol=tol, rtol=tol), (name, err_l)

    print("KERNEL_OK")
</pallas_src>

<mosaic_0001>
module attributes {stable_mosaic.version = 11 : i64} {
  func.func @_decom_strip_kernel(%arg0: i32, %arg1: i32, %arg2: memref<1x1x3x434xf32, #tpu.memory_space<vmem>>, %arg3: memref<1x396xf32, #tpu.memory_space<vmem>>, %arg4: memref<32x27xf32, #tpu.memory_space<vmem>>, %arg5: memref<32x1xf32, #tpu.memory_space<vmem>>, %arg6: memref<32x288xf32, #tpu.memory_space<vmem>>, %arg7: memref<32x1xf32, #tpu.memory_space<vmem>>, %arg8: memref<32x288xf32, #tpu.memory_space<vmem>>, %arg9: memref<32x1xf32, #tpu.memory_space<vmem>>, %arg10: memref<4x288xf32, #tpu.memory_space<vmem>>, %arg11: memref<4x1xf32, #tpu.memory_space<vmem>>, %arg12: memref<1x1x4x288xf32, #tpu.memory_space<vmem>>, %arg13: memref<32x526xf32, #tpu.memory_space<vmem>>, %arg14: memref<32x490xf32, #tpu.memory_space<vmem>>) attributes {dimension_semantics = [#tpu.dimension_semantics<parallel>, #tpu.dimension_semantics<parallel>], iteration_bounds = array<i64: 2, 1>, scalar_prefetch = 0 : i64, scratch_operands = 2 : i64, tpu.core_type = #tpu.core_type<tc>, window_params = [{transform_indices = @transform_0, window_bounds = array<i64: 1, 1, 3, 434>}, {pipeline_mode = #tpu.pipeline_mode<synchronous>, transform_indices = @transform_1, window_bounds = array<i64: 1, 396>}, {pipeline_mode = #tpu.pipeline_mode<synchronous>, transform_indices = @transform_2, window_bounds = array<i64: 32, 27>}, {pipeline_mode = #tpu.pipeline_mode<synchronous>, transform_indices = @transform_3, window_bounds = array<i64: 32, 1>}, {pipeline_mode = #tpu.pipeline_mode<synchronous>, transform_indices = @transform_4, window_bounds = array<i64: 32, 288>}, {pipeline_mode = #tpu.pipeline_mode<synchronous>, transform_indices = @transform_5, window_bounds = array<i64: 32, 1>}, {pipeline_mode = #tpu.pipeline_mode<synchronous>, transform_indices = @transform_6, window_bounds = array<i64: 32, 288>}, {pipeline_mode = #tpu.pipeline_mode<synchronous>, transform_indices = @transform_7, window_bounds = array<i64: 32, 1>}, {pipeline_mode = #tpu.pipeline_mode<synchronous>, transform_indices = @transform_8, window_bounds = array<i64: 4, 288>}, {pipeline_mode = #tpu.pipeline_mode<synchronous>, transform_indices = @transform_9, window_bounds = array<i64: 4, 1>}, {transform_indices = @transform_10, window_bounds = array<i64: 1, 1, 4, 288>}]} {
    %c0 = arith.constant 0 : index
    %c0_0 = arith.constant 0 : index
    %0 = vector.load %arg3[%c0, %c0_0] : memref<1x396xf32, #tpu.memory_space<vmem>>, vector<1x396xf32>
    %cst = arith.constant 0.000000e+00 : f32
    %1 = vector.broadcast %cst : f32 to vector<1x396xf32>
    %2 = arith.cmpf one, %0, %1 : vector<1x396xf32>
    %cst_1 = arith.constant 0.000000e+00 : f32
    %3 = vector.broadcast %cst_1 : f32 to vector<32x1xf32>
    %c0_2 = arith.constant 0 : index
    %c127 = arith.constant 127 : index
    %4 = vector.load %arg13[%c0_2, %c127] : memref<32x526xf32, #tpu.memory_space<vmem>>, vector<32x1xf32>
    tpu.vector_store %arg13[%c0_2, %c127], %3 {strides = array<i32>} : memref<32x526xf32, #tpu.memory_space<vmem>>, vector<32x1xf32>,
    %cst_3 = arith.constant 0.000000e+00 : f32
    %5 = vector.broadcast %cst_3 : f32 to vector<32x1xf32>
    %c0_4 = arith.constant 0 : index
    %c127_5 = arith.constant 127 : index
    %6 = vector.load %arg14[%c0_4, %c127_5] : memref<32x490xf32, #tpu.memory_space<vmem>>, vector<32x1xf32>
    tpu.vector_store %arg14[%c0_4, %c127_5], %5 {strides = array<i32>} : memref<32x490xf32, #tpu.memory_space<vmem>>, vector<32x1xf32>,
    %c0_6 = arith.constant 0 : index
    %c0_7 = arith.constant 0 : index
    %7 = vector.load %arg4[%c0_6, %c0_7] : memref<32x27xf32, #tpu.memory_space<vmem>>, vector<32x3xf32>
    %c0_8 = arith.constant 0 : index
    %c0_9 = arith.constant 0 : index
    %c0_10 = arith.constant 0 : index
    %c0_11 = arith.constant 0 : index
    %8 = vector.load %arg2[%c0_8, %c0_9, %c0_10, %c0_11] : memref<1x1x3x434xf32, #tpu.memory_space<vmem>>, vector<1x1x3x396xf32>
    %9 = vector.shape_cast %8 : vector<1x1x3x396xf32> to vector<3x396xf32>
    %cst_12 = arith.constant dense<0.000000e+00> : vector<32x396xf32>
    %10 = tpu.matmul %7, %9, %cst_12 {dimension_numbers = #tpu.dot_dimension_numbers<[1], [0], [0], [1], [0, 0, 1, 1], [], []>} : vector<32x3xf32>, vector<3x396xf32>, vector<32x396xf32> -> vector<32x396xf32>
    %c0_13 = arith.constant 0 : index
    %c3 = arith.constant 3 : index
    %11 = vector.load %arg4[%c0_13, %c3] : memref<32x27xf32, #tpu.memory_space<vmem>>, vector<32x3xf32>
    %c0_14 = arith.constant 0 : index
    %c0_15 = arith.constant 0 : index
    %c0_16 = arith.constant 0 : index
    %c1 = arith.constant 1 : index
    %12 = vector.load %arg2[%c0_14, %c0_15, %c0_16, %c1] : memref<1x1x3x434xf32, #tpu.memory_space<vmem>>, vector<1x1x3x396xf32>
    %13 = vector.shape_cast %12 : vector<1x1x3x396xf32> to vector<3x396xf32>
    %cst_17 = arith.constant dense<0.000000e+00> : vector<32x396xf32>
    %14 = tpu.matmul %11, %13, %cst_17 {dimension_numbers = #tpu.dot_dimension_numbers<[1], [0], [0], [1], [0, 0, 1, 1], [], []>} : vector<32x3xf32>, vector<3x396xf32>, vector<32x396xf32> -> vector<32x396xf32>
    %15 = arith.addf %10, %14 : vector<32x396xf32>
    %c0_18 = arith.constant 0 : index
    %c6 = arith.constant 6 : index
    %16 = vector.load %arg4[%c0_18, %c6] : memref<32x27xf32, #tpu.memory_space<vmem>>, vector<32x3xf32>
    %c0_19 = arith.constant 0 : index
    %c0_20 = arith.constant 0 : index
    %c0_21 = arith.constant 0 : index
    %c2 = arith.constant 2 : index
    %17 = vector.load %arg2[%c0_19, %c0_20, %c0_21, %c2] : memref<1x1x3x434xf32, #tpu.memory_space<vmem>>, vector<1x1x3x396xf32>
    %18 = vector.shape_cast %17 : vector<1x1x3x396xf32> to vector<3x396xf32>
    %cst_22 = arith.constant dense<0.000000e+00> : vector<32x396xf32>
    %19 = tpu.matmul %16, %18, %cst_22 {dimension_numbers = #tpu.dot_dimension_numbers<[1], [0], [0], [1], [0, 0, 1, 1], [], []>} : vector<32x3xf32>, vector<3x396xf32>, vector<32x396xf32> -> vector<32x396xf32>
    %20 = arith.addf %15, %19 : vector<32x396xf32>
    %c0_23 = arith.constant 0 : index
    %c9 = arith.constant 9 : index
    %21 = vector.load %arg4[%c0_23, %c9] : memref<32x27xf32, #tpu.memory_space<vmem>>, vector<32x3xf32>
    %c0_24 = arith.constant 0 : index
    %c0_25 = arith.constant 0 : index
    %c0_26 = arith.constant 0 : index
    %c18 = arith.constant 18 : index
    %22 = vector.load %arg2[%c0_24, %c0_25, %c0_26, %c18] : memref<1x1x3x434xf32, #tpu.memory_space<vmem>>, vector<1x1x3x396xf32>
    %23 = vector.shape_cast %22 : vector<1x1x3x396xf32> to vector<3x396xf32>
    %cst_27 = arith.constant dense<0.000000e+00> : vector<32x396xf32>
    %24 = tpu.matmul %21, %23, %cst_27 {dimension_numbers = #tpu.dot_dimension_numbers<[1], [0], [0], [1], [0, 0, 1, 1], [], []>} : vector<32x3xf32>, vector<3x396xf32>, vector<32x396xf32> -> vector<32x396xf32>
    %25 = arith.addf %20, %24 : vector<32x396xf32>
    %c0_28 = arith.constant 0 : index
    %c12 = arith.constant 12 : index
    %26 = vector.load %arg4[%c0_28, %c12] : memref<32x27xf32, #tpu.memory_space<vmem>>, vector<32x3xf32>
    %c0_29 = arith.constant 0 : index
    %c0_30 = arith.constant 0 : index
    %c0_31 = arith.constant 0 : index
    %c19 = arith.constant 19 : index
    %27 = vector.load %arg2[%c0_29, %c0_30, %c0_31, %c19] : memref<1x1x3x434xf32, #tpu.memory_space<vmem>>, vector<1x1x3x396xf32>
    %28 = vector.shape_cast %27 : vector<1x1x3x396xf32> to vector<3x396xf32>
    %cst_32 = arith.constant dense<0.000000e+00> : vector<32x396xf32>
    %29 = tpu.matmul %26, %28, %cst_32 {dimension_numbers = #tpu.dot_dimension_numbers<[1], [0], [0], [1], [0, 0, 1, 1], [], []>} : vector<32x3xf32>, vector<3x396xf32>, vector<32x396xf32> -> vector<32x396xf32>
    %30 = arith.addf %25, %29 : vector<32x396xf32>
    %c0_33 = arith.constant 0 : index
    %c15 = arith.constant 15 : index
    %31 = vector.load %arg4[%c0_33, %c15] : memref<32x27xf32, #tpu.memory_space<vmem>>, vector<32x3xf32>
    %c0_34 = arith.constant 0 : index
    %c0_35 = arith.constant 0 : index
    %c0_36 = arith.constant 0 : index
    %c20 = arith.constant 20 : index
    %32 = vector.load %arg2[%c0_34, %c0_35, %c0_36, %c20] : memref<1x1x3x434xf32, #tpu.memory_space<vmem>>, vector<1x1x3x396xf32>
    %33 = vector.shape_cast %32 : vector<1x1x3x396xf32> to vector<3x396xf32>
    %cst_37 = arith.constant dense<0.000000e+00> : vector<32x396xf32>
    %34 = tpu.matmul %31, %33, %cst_37 {dimension_numbers = #tpu.dot_dimension_numbers<[1], [0], [0], [1], [0, 0, 1, 1], [], []>} : vector<32x3xf32>, vector<3x396xf32>, vector<32x396xf32> -> vector<32x396xf32>
    %35 = arith.addf %30, %34 : vector<32x396xf32>
    %c0_38 = arith.constant 0 : index
    %c18_39 = arith.constant 18 : index
    %36 = vector.load %arg4[%c0_38, %c18_39] : memref<32x27xf32, #tpu.memory_space<vmem>>, vector<32x3xf32>
    %c0_40 = arith.constant 0 : index
    %c0_41 = arith.constant 0 : index
    %c0_42 = arith.constant 0 : index
    %c36 = arith.constant 36 : index
    %37 = vector.load %arg2[%c0_40, %c0_41, %c0_42, %c36] : memref<1x1x3x434xf32, #tpu.memory_space<vmem>>, vector<1x1x3x396xf32>
    %38 = vector.shape_cast %37 : vector<1x1x3x396xf32> to vector<3x396xf32>
    %cst_43 = arith.constant dense<0.000000e+00> : vector<32x396xf32>
    %39 = tpu.matmul %36, %38, %cst_43 {dimension_numbers = #tpu.dot_dimension_numbers<[1], [0], [0], [1], [0, 0, 1, 1], [], []>} : vector<32x3xf32>, vector<3x396xf32>, vector<32x396xf32> -> vector<32x396xf32>
    %40 = arith.addf %35, %39 : vector<32x396xf32>
    %c0_44 = arith.constant 0 : index
    %c21 = arith.constant 21 : index
    %41 = vector.load %arg4[%c0_44, %c21] : memref<32x27xf32, #tpu.memory_space<vmem>>, vector<32x3xf32>
    %c0_45 = arith.constant 0 : index
    %c0_46 = arith.constant 0 : index
    %c0_47 = arith.constant 0 : index
    %c37 = arith.constant 37 : index
    %42 = vector.load %arg2[%c0_45, %c0_46, %c0_47, %c37] : memref<1x1x3x434xf32, #tpu.memory_space<vmem>>, vector<1x1x3x396xf32>
    %43 = vector.shape_cast %42 : vector<1x1x3x396xf32> to vector<3x396xf32>
    %cst_48 = arith.constant dense<0.000000e+00> : vector<32x396xf32>
    %44 = tpu.matmul %41, %43, %cst_48 {dimension_numbers = #tpu.dot_dimension_numbers<[1], [0], [0], [1], [0, 0, 1, 1], [], []>} : vector<32x3xf32>, vector<3x396xf32>, vector<32x396xf32> -> vector<32x396xf32>
    %45 = arith.addf %40, %44 : vector<32x396xf32>
    %c0_49 = arith.constant 0 : index
    %c24 = arith.constant 24 : index
    %46 = vector.load %arg4[%c0_49, %c24] : memref<32x27xf32, #tpu.memory_space<vmem>>, vector<32x3xf32>
    %c0_50 = arith.constant 0 : index
    %c0_51 = arith.constant 0 : index
    %c0_52 = arith.constant 0 : index
    %c38 = arith.constant 38 : index
    %47 = vector.load %arg2[%c0_50, %c0_51, %c0_52, %c38] : memref<1x1x3x434xf32, #tpu.memory_space<vmem>>, vector<1x1x3x396xf32>
    %48 = vector.shape_cast %47 : vector<1x1x3x396xf32> to vector<3x396xf32>
    %cst_53 = arith.constant dense<0.000000e+00> : vector<32x396xf32>
    %49 = tpu.matmul %46, %48, %cst_53 {dimension_numbers = #tpu.dot_dimension_numbers<[1], [0], [0], [1], [0, 0, 1, 1], [], []>} : vector<32x3xf32>, vector<3x396xf32>, vector<32x396xf32> -> vector<32x396xf32>
    %50 = arith.addf %45, %49 : vector<32x396xf32>
    %c0_54 = arith.constant 0 : index
    %c0_55 = arith.constant 0 : index
    %51 = vector.load %arg5[%c0_54, %c0_55] : memref<32x1xf32, #tpu.memory_space<vmem>>, vector<32x1xf32>
    %52 = vector.broadcast %51 : vector<32x1xf32> to vector<32x396xf32>
    %53 = arith.addf %50, %52 : vector<32x396xf32>
    %cst_56 = arith.constant 0.000000e+00 : f32
    %54 = vector.broadcast %cst_56 : f32 to vector<32x396xf32>
    %55 = arith.maximumf %53, %54 : vector<32x396xf32>
    %cst_57 = arith.constant 0.000000e+00 : f32
    %56 = vector.broadcast %cst_57 : f32 to vector<32x396xf32>
    %57 = arith.minimumf %53, %56 : vector<32x396xf32>
    %cst_58 = arith.constant 2.000000e-01 : f32
    %58 = vector.broadcast %cst_58 : f32 to vector<32x396xf32>
    %59 = arith.mulf %58, %57 : vector<32x396xf32>
    %60 = arith.addf %55, %59 : vector<32x396xf32>
    %cst_59 = arith.constant 0.000000e+00 : f32
    %61 = vector.shape_cast %2 : vector<1x396xi1> to vector<1x396xi1>
    %62 = vector.broadcast %61 : vector<1x396xi1> to vector<32x396xi1>
    %63 = vector.broadcast %cst_59 : f32 to vector<32x396xf32>
    %64 = arith.select %62, %60, %63 : vector<32x396xi1>, vector<32x396xf32>
    %c0_60 = arith.constant 0 : index
    %c128 = arith.constant 128 : index
    %65 = vector.load %arg13[%c0_60, %c128] : memref<32x526xf32, #tpu.memory_space<vmem>>, vector<32x396xf32>
    tpu.vector_store %arg13[%c0_60, %c128], %64 {strides = array<i32>} : memref<32x526xf32, #tpu.memory_space<vmem>>, vector<32x396xf32>,
    %cst_61 = arith.constant 0.000000e+00 : f32
    %66 = vector.broadcast %cst_61 : f32 to vector<32x54xf32>
    %c0_i32 = arith.constant 0 : i32
    %67 = arith.cmpi eq, %arg1, %c0_i32 : i32
    %68 = arith.extui %67 : i1 to i32
    %c0_i32_62 = arith.constant 0 : i32
    %69 = arith.cmpi ne, %68, %c0_i32_62 : i32
    scf.if %69 {
      %c0_220 = arith.constant 0 : index
      %c128_221 = arith.constant 128 : index
      %237 = vector.load %arg13[%c0_220, %c128_221] : memref<32x526xf32, #tpu.memory_space<vmem>>, vector<32x54xf32>
      tpu.vector_store %arg13[%c0_220, %c128_221], %66 {strides = array<i32>} : memref<32x526xf32, #tpu.memory_space<vmem>>, vector<32x54xf32>,
    } else {
    }
    %c0_i32_63 = arith.constant 0 : i32
    %70 = arith.cmpi eq, %arg1, %c0_i32_63 : i32
    %71 = arith.extui %70 : i1 to i32
    %c0_i32_64 = arith.constant 0 : i32
    %72 = arith.cmpi ne, %71, %c0_i32_64 : i32
    scf.if %72 {
      %c0_220 = arith.constant 0 : index
      %c470 = arith.constant 470 : index
      %237 = vector.load %arg13[%c0_220, %c470] : memref<32x526xf32, #tpu.memory_space<vmem>>, vector<32x54xf32>
      tpu.vector_store %arg13[%c0_220, %c470], %66 {strides = array<i32>} : memref<32x526xf32, #tpu.memory_space<vmem>>, vector<32x54xf32>,
    } else {
    }
    %c0_65 = arith.constant 0 : index
    %c0_66 = arith.constant 0 : index
    %73 = vector.load %arg6[%c0_65, %c0_66] : memref<32x288xf32, #tpu.memory_space<vmem>>, vector<32x32xf32>
    %c0_67 = arith.constant 0 : index
    %c127_68 = arith.constant 127 : index
    %74 = vector.load %arg13[%c0_67, %c127_68] : memref<32x526xf32, #tpu.memory_space<vmem>>, vector<32x360xf32>
    %cst_69 = arith.constant dense<0.000000e+00> : vector<32x360xf32>
    %75 = tpu.matmul %73, %74, %cst_69 {dimension_numbers = #tpu.dot_dimension_numbers<[1], [0], [0], [1], [0, 0, 1, 1], [], []>} : vector<32x32xf32>, vector<32x360xf32>, vector<32x360xf32> -> vector<32x360xf32>
    %c0_70 = arith.constant 0 : index
    %c32 = arith.constant 32 : index
    %76 = vector.load %arg6[%c0_70, %c32] : memref<32x288xf32, #tpu.memory_space<vmem>>, vector<32x32xf32>
    %c0_71 = arith.constant 0 : index
    %c128_72 = arith.constant 128 : index
    %77 = vector.load %arg13[%c0_71, %c128_72] : memref<32x526xf32, #tpu.memory_space<vmem>>, vector<32x360xf32>
    %cst_73 = arith.constant dense<0.000000e+00> : vector<32x360xf32>
    %78 = tpu.matmul %76, %77, %cst_73 {dimension_numbers = #tpu.dot_dimension_numbers<[1], [0], [0], [1], [0, 0, 1, 1], [], []>} : vector<32x32xf32>, vector<32x360xf32>, vector<32x360xf32> -> vector<32x360xf32>
    %79 = arith.addf %75, %78 : vector<32x360xf32>
    %c0_74 = arith.constant 0 : index
    %c64 = arith.constant 64 : index
    %80 = vector.load %arg6[%c0_74, %c64] : memref<32x288xf32, #tpu.memory_space<vmem>>, vector<32x32xf32>
    %c0_75 = arith.constant 0 : index
    %c129 = arith.constant 129 : index
    %81 = vector.load %arg13[%c0_75, %c129] : memref<32x526xf32, #tpu.memory_space<vmem>>, vector<32x360xf32>
    %cst_76 = arith.constant dense<0.000000e+00> : vector<32x360xf32>
    %82 = tpu.matmul %80, %81, %cst_76 {dimension_numbers = #tpu.dot_dimension_numbers<[1], [0], [0], [1], [0, 0, 1, 1], [], []>} : vector<32x32xf32>, vector<32x360xf32>, vector<32x360xf32> -> vector<32x360xf32>
    %83 = arith.addf %79, %82 : vector<32x360xf32>
    %c0_77 = arith.constant 0 : index
    %c96 = arith.constant 96 : index
    %84 = vector.load %arg6[%c0_77, %c96] : memref<32x288xf32, #tpu.memory_space<vmem>>, vector<32x32xf32>
    %c0_78 = arith.constant 0 : index
    %c145 = arith.constant 145 : index
    %85 = vector.load %arg13[%c0_78, %c145] : memref<32x526xf32, #tpu.memory_space<vmem>>, vector<32x360xf32>
    %cst_79 = arith.constant dense<0.000000e+00> : vector<32x360xf32>
    %86 = tpu.matmul %84, %85, %cst_79 {dimension_numbers = #tpu.dot_dimension_numbers<[1], [0], [0], [1], [0, 0, 1, 1], [], []>} : vector<32x32xf32>, vector<32x360xf32>, vector<32x360xf32> -> vector<32x360xf32>
    %87 = arith.addf %83, %86 : vector<32x360xf32>
    %c0_80 = arith.constant 0 : index
    %c128_81 = arith.constant 128 : index
    %88 = vector.load %arg6[%c0_80, %c128_81] : memref<32x288xf32, #tpu.memory_space<vmem>>, vector<32x32xf32>
    %c0_82 = arith.constant 0 : index
    %c146 = arith.constant 146 : index
    %89 = vector.load %arg13[%c0_82, %c146] : memref<32x526xf32, #tpu.memory_space<vmem>>, vector<32x360xf32>
    %cst_83 = arith.constant dense<0.000000e+00> : vector<32x360xf32>
    %90 = tpu.matmul %88, %89, %cst_83 {dimension_numbers = #tpu.dot_dimension_numbers<[1], [0], [0], [1], [0, 0, 1, 1], [], []>} : vector<32x32xf32>, vector<32x360xf32>, vector<32x360xf32> -> vector<32x360xf32>
    %91 = arith.addf %87, %90 : vector<32x360xf32>
    %c0_84 = arith.constant 0 : index
    %c160 = arith.constant 160 : index
    %92 = vector.load %arg6[%c0_84, %c160] : memref<32x288xf32, #tpu.memory_space<vmem>>, vector<32x32xf32>
    %c0_85 = arith.constant 0 : index
    %c147 = arith.constant 147 : index
    %93 = vector.load %arg13[%c0_85, %c147] : memref<32x526xf32, #tpu.memory_space<vmem>>, vector<32x360xf32>
    %cst_86 = arith.constant dense<0.000000e+00> : vector<32x360xf32>
    %94 = tpu.matmul %92, %93, %cst_86 {dimension_numbers = #tpu.dot_dimension_numbers<[1], [0], [0], [1], [0, 0, 1, 1], [], []>} : vector<32x32xf32>, vector<32x360xf32>, vector<32x360xf32> -> vector<32x360xf32>
    %95 = arith.addf %91, %94 : vector<32x360xf32>
    %c0_87 = arith.constant 0 : index
    %c192 = arith.constant 192 : index
    %96 = vector.load %arg6[%c0_87, %c192] : memref<32x288xf32, #tpu.memory_space<vmem>>, vector<32x32xf32>
    %c0_88 = arith.constant 0 : index
    %c163 = arith.constant 163 : index
    %97 = vector.load %arg13[%c0_88, %c163] : memref<32x526xf32, #tpu.memory_space<vmem>>, vector<32x360xf32>
    %cst_89 = arith.constant dense<0.000000e+00> : vector<32x360xf32>
    %98 = tpu.matmul %96, %97, %cst_89 {dimension_numbers = #tpu.dot_dimension_numbers<[1], [0], [0], [1], [0, 0, 1, 1], [], []>} : vector<32x32xf32>, vector<32x360xf32>, vector<32x360xf32> -> vector<32x360xf32>
    %99 = arith.addf %95, %98 : vector<32x360xf32>
    %c0_90 = arith.constant 0 : index
    %c224 = arith.constant 224 : index
    %100 = vector.load %arg6[%c0_90, %c224] : memref<32x288xf32, #tpu.memory_space<vmem>>, vector<32x32xf32>
    %c0_91 = arith.constant 0 : index
    %c164 = arith.constant 164 : index
    %101 = vector.load %arg13[%c0_91, %c164] : memref<32x526xf32, #tpu.memory_space<vmem>>, vector<32x360xf32>
    %cst_92 = arith.constant dense<0.000000e+00> : vector<32x360xf32>
    %102 = tpu.matmul %100, %101, %cst_92 {dimension_numbers = #tpu.dot_dimension_numbers<[1], [0], [0], [1], [0, 0, 1, 1], [], []>} : vector<32x32xf32>, vector<32x360xf32>, vector<32x360xf32> -> vector<32x360xf32>
    %103 = arith.addf %99, %102 : vector<32x360xf32>
    %c0_93 = arith.constant 0 : index
    %c256 = arith.constant 256 : index
    %104 = vector.load %arg6[%c0_93, %c256] : memref<32x288xf32, #tpu.memory_space<vmem>>, vector<32x32xf32>
    %c0_94 = arith.constant 0 : index
    %c165 = arith.constant 165 : index
    %105 = vector.load %arg13[%c0_94, %c165] : memref<32x526xf32, #tpu.memory_space<vmem>>, vector<32x360xf32>
    %cst_95 = arith.constant dense<0.000000e+00> : vector<32x360xf32>
    %106 = tpu.matmul %104, %105, %cst_95 {dimension_numbers = #tpu.dot_dimension_numbers<[1], [0], [0], [1], [0, 0, 1, 1], [], []>} : vector<32x32xf32>, vector<32x360xf32>, vector<32x360xf32> -> vector<32x360xf32>
    %107 = arith.addf %103, %106 : vector<32x360xf32>
    %c0_96 = arith.constant 0 : index
    %c0_97 = arith.constant 0 : index
    %108 = vector.load %arg7[%c0_96, %c0_97] : memref<32x1xf32, #tpu.memory_space<vmem>>, vector<32x1xf32>
    %109 = vector.broadcast %108 : vector<32x1xf32> to vector<32x360xf32>
    %110 = arith.addf %107, %109 : vector<32x360xf32>
    %cst_98 = arith.constant 0.000000e+00 : f32
    %111 = vector.broadcast %cst_98 : f32 to vector<32x360xf32>
    %112 = arith.maximumf %110, %111 : vector<32x360xf32>
    %cst_99 = arith.constant 0.000000e+00 : f32
    %113 = vector.broadcast %cst_99 : f32 to vector<32x360xf32>
    %114 = arith.minimumf %110, %113 : vector<32x360xf32>
    %cst_100 = arith.constant 2.000000e-01 : f32
    %115 = vector.broadcast %cst_100 : f32 to vector<32x360xf32>
    %116 = arith.mulf %115, %114 : vector<32x360xf32>
    %117 = arith.addf %112, %116 : vector<32x360xf32>
    %118 = vector.extract_strided_slice %2 {offsets = [0, 0], sizes = [1, 360], strides = [1, 1]} : vector<1x396xi1> to vector<1x360xi1>
    %cst_101 = arith.constant 0.000000e+00 : f32
    %119 = vector.shape_cast %118 : vector<1x360xi1> to vector<1x360xi1>
    %120 = vector.broadcast %119 : vector<1x360xi1> to vector<32x360xi1>
    %121 = vector.broadcast %cst_101 : f32 to vector<32x360xf32>
    %122 = arith.select %120, %117, %121 : vector<32x360xi1>, vector<32x360xf32>
    %c0_102 = arith.constant 0 : index
    %c128_103 = arith.constant 128 : index
    %123 = vector.load %arg14[%c0_102, %c128_103] : memref<32x490xf32, #tpu.memory_space<vmem>>, vector<32x360xf32>
    tpu.vector_store %arg14[%c0_102, %c128_103], %122 {strides = array<i32>} : memref<32x490xf32, #tpu.memory_space<vmem>>, vector<32x360xf32>,
    %cst_104 = arith.constant 0.000000e+00 : f32
    %124 = vector.broadcast %cst_104 : f32 to vector<32x36xf32>
    %c0_i32_105 = arith.constant 0 : i32
    %125 = arith.cmpi eq, %arg1, %c0_i32_105 : i32
    %126 = arith.extui %125 : i1 to i32
    %c0_i32_106 = arith.constant 0 : i32
    %127 = arith.cmpi ne, %126, %c0_i32_106 : i32
    scf.if %127 {
      %c0_220 = arith.constant 0 : index
      %c128_221 = arith.constant 128 : index
      %237 = vector.load %arg14[%c0_220, %c128_221] : memref<32x490xf32, #tpu.memory_space<vmem>>, vector<32x36xf32>
      tpu.vector_store %arg14[%c0_220, %c128_221], %124 {strides = array<i32>} : memref<32x490xf32, #tpu.memory_space<vmem>>, vector<32x36xf32>,
    } else {
    }
    %c0_i32_107 = arith.constant 0 : i32
    %128 = arith.cmpi eq, %arg1, %c0_i32_107 : i32
    %129 = arith.extui %128 : i1 to i32
    %c0_i32_108 = arith.constant 0 : i32
    %130 = arith.cmpi ne, %129, %c0_i32_108 : i32
    scf.if %130 {
      %c0_220 = arith.constant 0 : index
      %c452 = arith.constant 452 : index
      %237 = vector.load %arg14[%c0_220, %c452] : memref<32x490xf32, #tpu.memory_space<vmem>>, vector<32x36xf32>
      tpu.vector_store %arg14[%c0_220, %c452], %124 {strides = array<i32>} : memref<32x490xf32, #tpu.memory_space<vmem>>, vector<32x36xf32>,
    } else {
    }
    %c0_109 = arith.constant 0 : index
    %c0_110 = arith.constant 0 : index
    %131 = vector.load %arg8[%c0_109, %c0_110] : memref<32x288xf32, #tpu.memory_space<vmem>>, vector<32x32xf32>
    %c0_111 = arith.constant 0 : index
    %c127_112 = arith.constant 127 : index
    %132 = vector.load %arg14[%c0_111, %c127_112] : memref<32x490xf32, #tpu.memory_space<vmem>>, vector<32x324xf32>
    %cst_113 = arith.constant dense<0.000000e+00> : vector<32x324xf32>
    %133 = tpu.matmul %131, %132, %cst_113 {dimension_numbers = #tpu.dot_dimension_numbers<[1], [0], [0], [1], [0, 0, 1, 1], [], []>} : vector<32x32xf32>, vector<32x324xf32>, vector<32x324xf32> -> vector<32x324xf32>
    %c0_114 = arith.constant 0 : index
    %c32_115 = arith.constant 32 : index
    %134 = vector.load %arg8[%c0_114, %c32_115] : memref<32x288xf32, #tpu.memory_space<vmem>>, vector<32x32xf32>
    %c0_116 = arith.constant 0 : index
    %c128_117 = arith.constant 128 : index
    %135 = vector.load %arg14[%c0_116, %c128_117] : memref<32x490xf32, #tpu.memory_space<vmem>>, vector<32x324xf32>
    %cst_118 = arith.constant dense<0.000000e+00> : vector<32x324xf32>
    %136 = tpu.matmul %134, %135, %cst_118 {dimension_numbers = #tpu.dot_dimension_numbers<[1], [0], [0], [1], [0, 0, 1, 1], [], []>} : vector<32x32xf32>, vector<32x324xf32>, vector<32x324xf32> -> vector<32x324xf32>
    %137 = arith.addf %133, %136 : vector<32x324xf32>
    %c0_119 = arith.constant 0 : index
    %c64_120 = arith.constant 64 : index
    %138 = vector.load %arg8[%c0_119, %c64_120] : memref<32x288xf32, #tpu.memory_space<vmem>>, vector<32x32xf32>
    %c0_121 = arith.constant 0 : index
    %c129_122 = arith.constant 129 : index
    %139 = vector.load %arg14[%c0_121, %c129_122] : memref<32x490xf32, #tpu.memory_space<vmem>>, vector<32x324xf32>
    %cst_123 = arith.constant dense<0.000000e+00> : vector<32x324xf32>
    %140 = tpu.matmul %138, %139, %cst_123 {dimension_numbers = #tpu.dot_dimension_numbers<[1], [0], [0], [1], [0, 0, 1, 1], [], []>} : vector<32x32xf32>, vector<32x324xf32>, vector<32x324xf32> -> vector<32x324xf32>
    %141 = arith.addf %137, %140 : vector<32x324xf32>
    %c0_124 = arith.constant 0 : index
    %c96_125 = arith.constant 96 : index
    %142 = vector.load %arg8[%c0_124, %c96_125] : memref<32x288xf32, #tpu.memory_space<vmem>>, vector<32x32xf32>
    %c0_126 = arith.constant 0 : index
    %c145_127 = arith.constant 145 : index
    %143 = vector.load %arg14[%c0_126, %c145_127] : memref<32x490xf32, #tpu.memory_space<vmem>>, vector<32x324xf32>
    %cst_128 = arith.constant dense<0.000000e+00> : vector<32x324xf32>
    %144 = tpu.matmul %142, %143, %cst_128 {dimension_numbers = #tpu.dot_dimension_numbers<[1], [0], [0], [1], [0, 0, 1, 1], [], []>} : vector<32x32xf32>, vector<32x324xf32>, vector<32x324xf32> -> vector<32x324xf32>
    %145 = arith.addf %141, %144 : vector<32x324xf32>
    %c0_129 = arith.constant 0 : index
    %c128_130 = arith.constant 128 : index
    %146 = vector.load %arg8[%c0_129, %c128_130] : memref<32x288xf32, #tpu.memory_space<vmem>>, vector<32x32xf32>
    %c0_131 = arith.constant 0 : index
    %c146_132 = arith.constant 146 : index
    %147 = vector.load %arg14[%c0_131, %c146_132] : memref<32x490xf32, #tpu.memory_space<vmem>>, vector<32x324xf32>
    %cst_133 = arith.constant dense<0.000000e+00> : vector<32x324xf32>
    %148 = tpu.matmul %146, %147, %cst_133 {dimension_numbers = #tpu.dot_dimension_numbers<[1], [0], [0], [1], [0, 0, 1, 1], [], []>} : vector<32x32xf32>, vector<32x324xf32>, vector<32x324xf32> -> vector<32x324xf32>
    %149 = arith.addf %145, %148 : vector<32x324xf32>
    %c0_134 = arith.constant 0 : index
    %c160_135 = arith.constant 160 : index
    %150 = vector.load %arg8[%c0_134, %c160_135] : memref<32x288xf32, #tpu.memory_space<vmem>>, vector<32x32xf32>
    %c0_136 = arith.constant 0 : index
    %c147_137 = arith.constant 147 : index
    %151 = vector.load %arg14[%c0_136, %c147_137] : memref<32x490xf32, #tpu.memory_space<vmem>>, vector<32x324xf32>
    %cst_138 = arith.constant dense<0.000000e+00> : vector<32x324xf32>
    %152 = tpu.matmul %150, %151, %cst_138 {dimension_numbers = #tpu.dot_dimension_numbers<[1], [0], [0], [1], [0, 0, 1, 1], [], []>} : vector<32x32xf32>, vector<32x324xf32>, vector<32x324xf32> -> vector<32x324xf32>
    %153 = arith.addf %149, %152 : vector<32x324xf32>
    %c0_139 = arith.constant 0 : index
    %c192_140 = arith.constant 192 : index
    %154 = vector.load %arg8[%c0_139, %c192_140] : memref<32x288xf32, #tpu.memory_space<vmem>>, vector<32x32xf32>
    %c0_141 = arith.constant 0 : index
    %c163_142 = arith.constant 163 : index
    %155 = vector.load %arg14[%c0_141, %c163_142] : memref<32x490xf32, #tpu.memory_space<vmem>>, vector<32x324xf32>
    %cst_143 = arith.constant dense<0.000000e+00> : vector<32x324xf32>
    %156 = tpu.matmul %154, %155, %cst_143 {dimension_numbers = #tpu.dot_dimension_numbers<[1], [0], [0], [1], [0, 0, 1, 1], [], []>} : vector<32x32xf32>, vector<32x324xf32>, vector<32x324xf32> -> vector<32x324xf32>
    %157 = arith.addf %153, %156 : vector<32x324xf32>
    %c0_144 = arith.constant 0 : index
    %c224_145 = arith.constant 224 : index
    %158 = vector.load %arg8[%c0_144, %c224_145] : memref<32x288xf32, #tpu.memory_space<vmem>>, vector<32x32xf32>
    %c0_146 = arith.constant 0 : index
    %c164_147 = arith.constant 164 : index
    %159 = vector.load %arg14[%c0_146, %c164_147] : memref<32x490xf32, #tpu.memory_space<vmem>>, vector<32x324xf32>
    %cst_148 = arith.constant dense<0.000000e+00> : vector<32x324xf32>
    %160 = tpu.matmul %158, %159, %cst_148 {dimension_numbers = #tpu.dot_dimension_numbers<[1], [0], [0], [1], [0, 0, 1, 1], [], []>} : vector<32x32xf32>, vector<32x324xf32>, vector<32x324xf32> -> vector<32x324xf32>
    %161 = arith.addf %157, %160 : vector<32x324xf32>
    %c0_149 = arith.constant 0 : index
    %c256_150 = arith.constant 256 : index
    %162 = vector.load %arg8[%c0_149, %c256_150] : memref<32x288xf32, #tpu.memory_space<vmem>>, vector<32x32xf32>
    %c0_151 = arith.constant 0 : index
    %c165_152 = arith.constant 165 : index
    %163 = vector.load %arg14[%c0_151, %c165_152] : memref<32x490xf32, #tpu.memory_space<vmem>>, vector<32x324xf32>
    %cst_153 = arith.constant dense<0.000000e+00> : vector<32x324xf32>
    %164 = tpu.matmul %162, %163, %cst_153 {dimension_numbers = #tpu.dot_dimension_numbers<[1], [0], [0], [1], [0, 0, 1, 1], [], []>} : vector<32x32xf32>, vector<32x324xf32>, vector<32x324xf32> -> vector<32x324xf32>
    %165 = arith.addf %161, %164 : vector<32x324xf32>
    %c0_154 = arith.constant 0 : index
    %c0_155 = arith.constant 0 : index
    %166 = vector.load %arg9[%c0_154, %c0_155] : memref<32x1xf32, #tpu.memory_space<vmem>>, vector<32x1xf32>
    %167 = vector.broadcast %166 : vector<32x1xf32> to vector<32x324xf32>
    %168 = arith.addf %165, %167 : vector<32x324xf32>
    %cst_156 = arith.constant 0.000000e+00 : f32
    %169 = vector.broadcast %cst_156 : f32 to vector<32x324xf32>
    %170 = arith.maximumf %168, %169 : vector<32x324xf32>
    %cst_157 = arith.constant 0.000000e+00 : f32
    %171 = vector.broadcast %cst_157 : f32 to vector<32x324xf32>
    %172 = arith.minimumf %168, %171 : vector<32x324xf32>
    %cst_158 = arith.constant 2.000000e-01 : f32
    %173 = vector.broadcast %cst_158 : f32 to vector<32x324xf32>
    %174 = arith.mulf %173, %172 : vector<32x324xf32>
    %175 = arith.addf %170, %174 : vector<32x324xf32>
    %176 = vector.extract_strided_slice %2 {offsets = [0, 0], sizes = [1, 324], strides = [1, 1]} : vector<1x396xi1> to vector<1x324xi1>
    %cst_159 = arith.constant 0.000000e+00 : f32
    %177 = vector.shape_cast %176 : vector<1x324xi1> to vector<1x324xi1>
    %178 = vector.broadcast %177 : vector<1x324xi1> to vector<32x324xi1>
    %179 = vector.broadcast %cst_159 : f32 to vector<32x324xf32>
    %180 = arith.select %178, %175, %179 : vector<32x324xi1>, vector<32x324xf32>
    %c0_160 = arith.constant 0 : index
    %c128_161 = arith.constant 128 : index
    %181 = vector.load %arg13[%c0_160, %c128_161] : memref<32x526xf32, #tpu.memory_space<vmem>>, vector<32x324xf32>
    tpu.vector_store %arg13[%c0_160, %c128_161], %180 {strides = array<i32>} : memref<32x526xf32, #tpu.memory_space<vmem>>, vector<32x324xf32>,
    %cst_162 = arith.constant 0.000000e+00 : f32
    %182 = vector.broadcast %cst_162 : f32 to vector<32x18xf32>
    %c0_i32_163 = arith.constant 0 : i32
    %183 = arith.cmpi eq, %arg1, %c0_i32_163 : i32
    %184 = arith.extui %183 : i1 to i32
    %c0_i32_164 = arith.constant 0 : i32
    %185 = arith.cmpi ne, %184, %c0_i32_164 : i32
    scf.if %185 {
      %c0_220 = arith.constant 0 : index
      %c128_221 = arith.constant 128 : index
      %237 = vector.load %arg13[%c0_220, %c128_221] : memref<32x526xf32, #tpu.memory_space<vmem>>, vector<32x18xf32>
      tpu.vector_store %arg13[%c0_220, %c128_221], %182 {strides = array<i32>} : memref<32x526xf32, #tpu.memory_space<vmem>>, vector<32x18xf32>,
    } else {
    }
    %c0_i32_165 = arith.constant 0 : i32
    %186 = arith.cmpi eq, %arg1, %c0_i32_165 : i32
    %187 = arith.extui %186 : i1 to i32
    %c0_i32_166 = arith.constant 0 : i32
    %188 = arith.cmpi ne, %187, %c0_i32_166 : i32
    scf.if %188 {
      %c0_220 = arith.constant 0 : index
      %c434 = arith.constant 434 : index
      %237 = vector.load %arg13[%c0_220, %c434] : memref<32x526xf32, #tpu.memory_space<vmem>>, vector<32x18xf32>
      tpu.vector_store %arg13[%c0_220, %c434], %182 {strides = array<i32>} : memref<32x526xf32, #tpu.memory_space<vmem>>, vector<32x18xf32>,
    } else {
    }
    %c0_167 = arith.constant 0 : index
    %c0_168 = arith.constant 0 : index
    %189 = vector.load %arg10[%c0_167, %c0_168] : memref<4x288xf32, #tpu.memory_space<vmem>>, vector<4x32xf32>
    %c0_169 = arith.constant 0 : index
    %c127_170 = arith.constant 127 : index
    %190 = vector.load %arg13[%c0_169, %c127_170] : memref<32x526xf32, #tpu.memory_space<vmem>>, vector<32x288xf32>
    %cst_171 = arith.constant dense<0.000000e+00> : vector<4x288xf32>
    %191 = tpu.matmul %189, %190, %cst_171 {dimension_numbers = #tpu.dot_dimension_numbers<[1], [0], [0], [1], [0, 0, 1, 1], [], []>} : vector<4x32xf32>, vector<32x288xf32>, vector<4x288xf32> -> vector<4x288xf32>
    %c0_172 = arith.constant 0 : index
    %c32_173 = arith.constant 32 : index
    %192 = vector.load %arg10[%c0_172, %c32_173] : memref<4x288xf32, #tpu.memory_space<vmem>>, vector<4x32xf32>
    %c0_174 = arith.constant 0 : index
    %c128_175 = arith.constant 128 : index
    %193 = vector.load %arg13[%c0_174, %c128_175] : memref<32x526xf32, #tpu.memory_space<vmem>>, vector<32x288xf32>
    %cst_176 = arith.constant dense<0.000000e+00> : vector<4x288xf32>
    %194 = tpu.matmul %192, %193, %cst_176 {dimension_numbers = #tpu.dot_dimension_numbers<[1], [0], [0], [1], [0, 0, 1, 1], [], []>} : vector<4x32xf32>, vector<32x288xf32>, vector<4x288xf32> -> vector<4x288xf32>
    %195 = arith.addf %191, %194 : vector<4x288xf32>
    %c0_177 = arith.constant 0 : index
    %c64_178 = arith.constant 64 : index
    %196 = vector.load %arg10[%c0_177, %c64_178] : memref<4x288xf32, #tpu.memory_space<vmem>>, vector<4x32xf32>
    %c0_179 = arith.constant 0 : index
    %c129_180 = arith.constant 129 : index
    %197 = vector.load %arg13[%c0_179, %c129_180] : memref<32x526xf32, #tpu.memory_space<vmem>>, vector<32x288xf32>
    %cst_181 = arith.constant dense<0.000000e+00> : vector<4x288xf32>
    %198 = tpu.matmul %196, %197, %cst_181 {dimension_numbers = #tpu.dot_dimension_numbers<[1], [0], [0], [1], [0, 0, 1, 1], [], []>} : vector<4x32xf32>, vector<32x288xf32>, vector<4x288xf32> -> vector<4x288xf32>
    %199 = arith.addf %195, %198 : vector<4x288xf32>
    %c0_182 = arith.constant 0 : index
    %c96_183 = arith.constant 96 : index
    %200 = vector.load %arg10[%c0_182, %c96_183] : memref<4x288xf32, #tpu.memory_space<vmem>>, vector<4x32xf32>
    %c0_184 = arith.constant 0 : index
    %c145_185 = arith.constant 145 : index
    %201 = vector.load %arg13[%c0_184, %c145_185] : memref<32x526xf32, #tpu.memory_space<vmem>>, vector<32x288xf32>
    %cst_186 = arith.constant dense<0.000000e+00> : vector<4x288xf32>
    %202 = tpu.matmul %200, %201, %cst_186 {dimension_numbers = #tpu.dot_dimension_numbers<[1], [0], [0], [1], [0, 0, 1, 1], [], []>} : vector<4x32xf32>, vector<32x288xf32>, vector<4x288xf32> -> vector<4x288xf32>
    %203 = arith.addf %199, %202 : vector<4x288xf32>
    %c0_187 = arith.constant 0 : index
    %c128_188 = arith.constant 128 : index
    %204 = vector.load %arg10[%c0_187, %c128_188] : memref<4x288xf32, #tpu.memory_space<vmem>>, vector<4x32xf32>
    %c0_189 = arith.constant 0 : index
    %c146_190 = arith.constant 146 : index
    %205 = vector.load %arg13[%c0_189, %c146_190] : memref<32x526xf32, #tpu.memory_space<vmem>>, vector<32x288xf32>
    %cst_191 = arith.constant dense<0.000000e+00> : vector<4x288xf32>
    %206 = tpu.matmul %204, %205, %cst_191 {dimension_numbers = #tpu.dot_dimension_numbers<[1], [0], [0], [1], [0, 0, 1, 1], [], []>} : vector<4x32xf32>, vector<32x288xf32>, vector<4x288xf32> -> vector<4x288xf32>
    %207 = arith.addf %203, %206 : vector<4x288xf32>
    %c0_192 = arith.constant 0 : index
    %c160_193 = arith.constant 160 : index
    %208 = vector.load %arg10[%c0_192, %c160_193] : memref<4x288xf32, #tpu.memory_space<vmem>>, vector<4x32xf32>
    %c0_194 = arith.constant 0 : index
    %c147_195 = arith.constant 147 : index
    %209 = vector.load %arg13[%c0_194, %c147_195] : memref<32x526xf32, #tpu.memory_space<vmem>>, vector<32x288xf32>
    %cst_196 = arith.constant dense<0.000000e+00> : vector<4x288xf32>
    %210 = tpu.matmul %208, %209, %cst_196 {dimension_numbers = #tpu.dot_dimension_numbers<[1], [0], [0], [1], [0, 0, 1, 1], [], []>} : vector<4x32xf32>, vector<32x288xf32>, vector<4x288xf32> -> vector<4x288xf32>
    %211 = arith.addf %207, %210 : vector<4x288xf32>
    %c0_197 = arith.constant 0 : index
    %c192_198 = arith.constant 192 : index
    %212 = vector.load %arg10[%c0_197, %c192_198] : memref<4x288xf32, #tpu.memory_space<vmem>>, vector<4x32xf32>
    %c0_199 = arith.constant 0 : index
    %c163_200 = arith.constant 163 : index
    %213 = vector.load %arg13[%c0_199, %c163_200] : memref<32x526xf32, #tpu.memory_space<vmem>>, vector<32x288xf32>
    %cst_201 = arith.constant dense<0.000000e+00> : vector<4x288xf32>
    %214 = tpu.matmul %212, %213, %cst_201 {dimension_numbers = #tpu.dot_dimension_numbers<[1], [0], [0], [1], [0, 0, 1, 1], [], []>} : vector<4x32xf32>, vector<32x288xf32>, vector<4x288xf32> -> vector<4x288xf32>
    %215 = arith.addf %211, %214 : vector<4x288xf32>
    %c0_202 = arith.constant 0 : index
    %c224_203 = arith.constant 224 : index
    %216 = vector.load %arg10[%c0_202, %c224_203] : memref<4x288xf32, #tpu.memory_space<vmem>>, vector<4x32xf32>
    %c0_204 = arith.constant 0 : index
    %c164_205 = arith.constant 164 : index
    %217 = vector.load %arg13[%c0_204, %c164_205] : memref<32x526xf32, #tpu.memory_space<vmem>>, vector<32x288xf32>
    %cst_206 = arith.constant dense<0.000000e+00> : vector<4x288xf32>
    %218 = tpu.matmul %216, %217, %cst_206 {dimension_numbers = #tpu.dot_dimension_numbers<[1], [0], [0], [1], [0, 0, 1, 1], [], []>} : vector<4x32xf32>, vector<32x288xf32>, vector<4x288xf32> -> vector<4x288xf32>
    %219 = arith.addf %215, %218 : vector<4x288xf32>
    %c0_207 = arith.constant 0 : index
    %c256_208 = arith.constant 256 : index
    %220 = vector.load %arg10[%c0_207, %c256_208] : memref<4x288xf32, #tpu.memory_space<vmem>>, vector<4x32xf32>
    %c0_209 = arith.constant 0 : index
    %c165_210 = arith.constant 165 : index
    %221 = vector.load %arg13[%c0_209, %c165_210] : memref<32x526xf32, #tpu.memory_space<vmem>>, vector<32x288xf32>
    %cst_211 = arith.constant dense<0.000000e+00> : vector<4x288xf32>
    %222 = tpu.matmul %220, %221, %cst_211 {dimension_numbers = #tpu.dot_dimension_numbers<[1], [0], [0], [1], [0, 0, 1, 1], [], []>} : vector<4x32xf32>, vector<32x288xf32>, vector<4x288xf32> -> vector<4x288xf32>
    %223 = arith.addf %219, %222 : vector<4x288xf32>
    %c0_212 = arith.constant 0 : index
    %c0_213 = arith.constant 0 : index
    %224 = vector.load %arg11[%c0_212, %c0_213] : memref<4x1xf32, #tpu.memory_space<vmem>>, vector<4x1xf32>
    %225 = vector.broadcast %224 : vector<4x1xf32> to vector<4x288xf32>
    %226 = arith.addf %223, %225 : vector<4x288xf32>
    %cst_214 = arith.constant 0.000000e+00 : f32
    %227 = vector.broadcast %cst_214 : f32 to vector<4x288xf32>
    %228 = arith.maximumf %226, %227 : vector<4x288xf32>
    %229 = vector.extract_strided_slice %2 {offsets = [0, 0], sizes = [1, 288], strides = [1, 1]} : vector<1x396xi1> to vector<1x288xi1>
    %cst_215 = arith.constant 0.000000e+00 : f32
    %230 = vector.shape_cast %229 : vector<1x288xi1> to vector<1x288xi1>
    %231 = vector.broadcast %230 : vector<1x288xi1> to vector<4x288xi1>
    %232 = vector.broadcast %cst_215 : f32 to vector<4x288xf32>
    %233 = arith.select %231, %228, %232 : vector<4x288xi1>, vector<4x288xf32>
    %c0_216 = arith.constant 0 : index
    %c0_217 = arith.constant 0 : index
    %c0_218 = arith.constant 0 : index
    %c0_219 = arith.constant 0 : index
    %234 = vector.load %arg12[%c0_216, %c0_217, %c0_218, %c0_219] : memref<1x1x4x288xf32, #tpu.memory_space<vmem>>, vector<1x1x4x288xf32>
    %235 = vector.shape_cast %234 : vector<1x1x4x288xf32> to vector<4x288xf32>
    %236 = vector.shape_cast %233 : vector<4x288xf32> to vector<1x1x4x288xf32>
    tpu.vector_store %arg12[%c0_216, %c0_217, %c0_218, %c0_219], %236 {strides = array<i32>} : memref<1x1x4x288xf32, #tpu.memory_space<vmem>>, vector<1x1x4x288xf32>,
    return
  }
  func.func @transform_0(%arg0: i32, %arg1: i32) -> (i32, i32, i32, i32) {
    %c0_i32 = arith.constant 0 : i32
    %c0_i32_0 = arith.constant 0 : i32
    %c0_i32_1 = arith.constant 0 : i32
    return %arg0, %arg1, %c0_i32, %c0_i32_0 : i32, i32, i32, i32
  }
  func.func @transform_1(%arg0: i32, %arg1: i32) -> (i32, i32) {
    %c0_i32 = arith.constant 0 : i32
    %c0_i32_0 = arith.constant 0 : i32
    %c0_i32_1 = arith.constant 0 : i32
    return %c0_i32, %c0_i32_0 : i32, i32
  }
  func.func @transform_2(%arg0: i32, %arg1: i32) -> (i32, i32) {
    %c0_i32 = arith.constant 0 : i32
    %c0_i32_0 = arith.constant 0 : i32
    %c0_i32_1 = arith.constant 0 : i32
    return %c0_i32, %c0_i32_0 : i32, i32
  }
  func.func @transform_3(%arg0: i32, %arg1: i32) -> (i32, i32) {
    %c0_i32 = arith.constant 0 : i32
    %c0_i32_0 = arith.constant 0 : i32
    %c0_i32_1 = arith.constant 0 : i32
    return %c0_i32, %c0_i32_0 : i32, i32
  }
  func.func @transform_4(%arg0: i32, %arg1: i32) -> (i32, i32) {
    %c0_i32 = arith.constant 0 : i32
    %c0_i32_0 = arith.constant 0 : i32
    %c0_i32_1 = arith.constant 0 : i32
    return %c0_i32, %c0_i32_0 : i32, i32
  }
  func.func @transform_5(%arg0: i32, %arg1: i32) -> (i32, i32) {
    %c0_i32 = arith.constant 0 : i32
    %c0_i32_0 = arith.constant 0 : i32
    %c0_i32_1 = arith.constant 0 : i32
    return %c0_i32, %c0_i32_0 : i32, i32
  }
  func.func @transform_6(%arg0: i32, %arg1: i32) -> (i32, i32) {
    %c0_i32 = arith.constant 0 : i32
    %c0_i32_0 = arith.constant 0 : i32
    %c0_i32_1 = arith.constant 0 : i32
    return %c0_i32, %c0_i32_0 : i32, i32
  }
  func.func @transform_7(%arg0: i32, %arg1: i32) -> (i32, i32) {
    %c0_i32 = arith.constant 0 : i32
    %c0_i32_0 = arith.constant 0 : i32
    %c0_i32_1 = arith.constant 0 : i32
    return %c0_i32, %c0_i32_0 : i32, i32
  }
  func.func @transform_8(%arg0: i32, %arg1: i32) -> (i32, i32) {
    %c0_i32 = arith.constant 0 : i32
    %c0_i32_0 = arith.constant 0 : i32
    %c0_i32_1 = arith.constant 0 : i32
    return %c0_i32, %c0_i32_0 : i32, i32
  }
  func.func @transform_9(%arg0: i32, %arg1: i32) -> (i32, i32) {
    %c0_i32 = arith.constant 0 : i32
    %c0_i32_0 = arith.constant 0 : i32
    %c0_i32_1 = arith.constant 0 : i32
    return %c0_i32, %c0_i32_0 : i32, i32
  }
  func.func @transform_10(%arg0: i32, %arg1: i32) -> (i32, i32, i32, i32) {
    %c0_i32 = arith.constant 0 : i32
    %c0_i32_0 = arith.constant 0 : i32
    %c0_i32_1 = arith.constant 0 : i32
    return %arg0, %arg1, %c0_i32, %c0_i32_0 : i32, i32, i32, i32
  }
}

</mosaic_0001>

<bundles_post_ra>
// kernel: _lambda_.1
= control target key start
LH: loop header
LB: loop body
LE: loop exit
PB: predicated region body
PF: predicated region fallthrough
CT: control target
= control target key end

     0   :  { %s11943_s13 = smov 0   ;;  %s11945_s14 = smov 0   ;;  %s14240_s0 = inlined_call_operand.vmem [shape: f32[2,1,3,434], index: 0, kind: input, shape index: {}]   ;;  %s14241_s1 = inlined_call_operand.vmem [shape: f32[1,396], index: 1, kind: input, shape index: {}]   ;;  %s14242_s2 = inlined_call_operand.vmem [shape: f32[32,27], index: 2, kind: input, shape index: {}]   ;;  %s14243_s3 = inlined_call_operand.vmem [shape: f32[32,1], index: 3, kind: input, shape index: {}]   ;;  %s14244_s4 = inlined_call_operand.vmem [shape: f32[32,288], index: 4, kind: input, shape index: {}]   ;;  %s14245_s5 = inlined_call_operand.vmem [shape: f32[32,1], index: 5, kind: input, shape index: {}]   ;;  %s14246_s6 = inlined_call_operand.vmem [shape: f32[32,288], index: 6, kind: input, shape index: {}]   ;;  %s14247_s7 = inlined_call_operand.vmem [shape: f32[32,1], index: 7, kind: input, shape index: {}]   ;;  %s14248_s8 = inlined_call_operand.vmem [shape: f32[4,288], index: 8, kind: input, shape index: {}]   ;;  %s14249_s9 = inlined_call_operand.vmem [shape: f32[4,1], index: 9, kind: input, shape index: {}]   ;;  %s14250_s10 = inlined_call_operand.vmem [shape: f32[2,1,4,288], index: 10, kind: output, shape index: {}]  }
   0x1   :  { %s11947_s15 = smov 0  }
   0x2 LB: > { %s32_s16 = sadd.s32 1, %s11857_s14  ;;  %p9403_p0 = scmp.ge.s32.totalorder %s11861_s15, 1  ;;  %s11861_s15 = sphi %s11947_s15, %s20_s15   ;;  %s11857_s14 = sphi %s11945_s14, %s14282_s14   ;;  %s11853_s13 = sphi %s11943_s13, %s14281_s13  }
   0x3   : > { %p34_p1 = scmp.ge.s32.totalorder %s32_s16, 2  ;;  %p332_p2 = scmp.lt.s32.totalorder %s11861_s15, 3 }
   0x5   : > { %s14284_s16 = smov (%p34_p1, %s32_s16), 0  ;;  %p333_p3 = pnand %p9403_p0, %p332_p2 }
   0x6   : > { %p378_p4 = scmp.lt.s32.totalorder (!%p333_p3), %s11853_s13, 1  ;;  %v11863_v0 = vmov (!%p333_p3), 0.0   ;;  %s11864_s21 = smov (!%p333_p3), 127   ;;  %v11983_v3 = vld [vmem:[%s14242_s2] sm:$0xff] (!%p333_p3)  ;;  %v11994_v5 = vld [vmem:[%s14242_s2 + $0x10] sm:$0xff] (!%p333_p3)  ;;  %v12001_v6 = vld [vmem:[%s14242_s2 + $0x8] sm:$0xff] (!%p333_p3) }
   0x7   : > { %336 = sbr.rel (%p333_p3) target bundleno = 2013 (0x7dd), region = 60  ;;  %523 = vmatprep.mubr.f32.mxu0 (!%p333_p3), %v11863_v0  ;;  %612 = vmatprep.mubr.f32.mxu1 (!%p333_p3), %v11863_v0  ;;  %s11865_s24 = smov (!%p333_p3), 125   ;;  %v12012_v8 = vld [vmem:[%s14242_s2 + $0x18] sm:$0xff] (!%p333_p3)  ;;  %vm437_vm0 = vcmask (!%p333_p3), 1039360   ;;  %vm450_vm1 = vcmask (!%p333_p3), 1042432   ;;  %vm441_vm2 = vcmask (!%p333_p3), 23552  }
   0x8   : > { %s11866_s11 = smov (!%p333_p3), 126   ;;  %s11867_s12 = smov (!%p333_p3), 122   ;;  %vm861_vm3 = vcmask (!%p333_p3), 1031168   ;;  %v2539_v56 = vld [vmem:[%s14243_s3] sm:$0xff] (!%p333_p3)  ;;  %v11879_v58 = vmov (!%p333_p3), 0   ;;  %v2540_v59 = vld [vmem:[%s14243_s3 + $0x8] sm:$0xff] (!%p333_p3) }
   0x9   : > { %s11869_s18 = smov (!%p333_p3), 119   ;;  %s11870_s19 = smov (!%p333_p3), 109   ;;  %11020 = vset.pattern.permute.xlu0 (!%p333_p3), %v11879_v58  ;;  %11021 = vset.pattern.permute.xlu1 (!%p333_p3), %v11879_v58  ;;  %vm1105_vm4 = vcmask (!%p333_p3), 900096   ;;  %vm1349_vm5 = vcmask (!%p333_p3), 891904   ;;  %vm1593_vm6 = vcmask (!%p333_p3), 883712   ;;  %vm1837_vm7 = vcmask (!%p333_p3), 752640  }
   0xa   : > { %s11871_s22 = smov (!%p333_p3), 116   ;;  %s11872_s23 = smov (!%p333_p3), 108   ;;  %vm2081_vm8 = vcmask (!%p333_p3), 744448   ;;  %vm2325_vm9 = vcmask (!%p333_p3), 736256   ;;  %vm398_vm10 = vcmask (!%p333_p3), 1048568   ;;  %vm2747_vm12 = vcmask (!%p333_p3), 261120  }
   0xb   : > { %s14264_s25 = smov (!%p333_p3), 92   ;;  %s14262_s26 = smov (!%p333_p3), 91   ;;  %399 = vst.msk [vmem:[#allocation2] sm:$0xff] (!%p333_p3), %vm398_vm10, %v11863_v0  ;;  %400 = vst.msk [vmem:[#allocation2 + $0x28] sm:$0xff] (!%p333_p3), %vm398_vm10, %v11863_v0 }
   0xc   : > { %s11876_s27 = smov (!%p333_p3), 107   ;;  %s11877_s28 = smov (!%p333_p3), 90   ;;  %401 = vst.msk [vmem:[#allocation2 + $0x50] sm:$0xff] (!%p333_p3), %vm398_vm10, %v11863_v0  ;;  %402 = vst.msk [vmem:[#allocation2 + $0x78] sm:$0xff] (!%p333_p3), %vm398_vm10, %v11863_v0 }
   0xd   : > { %s11878_s29 = smov (!%p333_p3), 104   ;;  %403 = vst.msk [vmem:[#allocation3] sm:$0xff] (!%p333_p3), %vm398_vm10, %v11863_v0  ;;  %404 = vst.msk [vmem:[#allocation3 + $0x20] sm:$0xff] (!%p333_p3), %vm398_vm10, %v11863_v0  ;;  %s11884_s30 = smov (!%p333_p3), 32  }
   0xe   : > { %s14286_s13 = smov (!%p378_p4, %s11853_s13), 1  ;;  %405 = vst.msk [vmem:[#allocation3 + $0x40] sm:$0xff] %vm398_vm10, %v11863_v0  ;;  %406 = vst.msk [vmem:[#allocation3 + $0x60] sm:$0xff] %vm398_vm10, %v11863_v0  ;;  %vm2978_vm10 = vcmask 7168  }
   0xf   : > { %s9679_s17 = sshll.u32 %s14286_s13, 4 }
  0x10   : > { %s11969_s20 = scalar_lea.vmem %s14240_s0, %s9679_s17  ;;  %s11868_s17 = smov 110  }
  0x11   : > { %v11972_v1 = vld [vmem:[%s11969_s20] sm:$0x77]  ;;  %v11988_v4 = vld [vmem:[%s11969_s20 + $0x8] sm:$0x77] }
  0x12   : > { %429 = vrot.lane.b32.xlu1 %v11972_v1, %s11864_s21  ;;  %v11978_v2 = vcombine.high %v11972_v1, %v11972_v1  ;;  %v12006_v7 = vcombine.high %v11988_v4, %v11988_v4  ;;  %v835_v9 = vld [vmem:[%s11969_s20] sm:$0x77]  ;;  %v836_v10 = vld [vmem:[%s11969_s20 + $0x8] sm:$0x77] }
  0x13   : > { %v851_v11 = vcombine.high %v835_v9, %v835_v9  ;;  %v1079_v12 = vld [vmem:[%s11969_s20] sm:$0x77]  ;;  %v852_v14 = vcombine.high %v836_v10, %v836_v10  ;;  %v1080_v15 = vld [vmem:[%s11969_s20 + $0x8] sm:$0x77] }
  0x14   : > { %431 = vrot.lane.b32.xlu0 %v11978_v2, %s11864_s21  ;;  %v1095_v13 = vcombine.high %v1079_v12, %v1079_v12  ;;  %v1323_v16 = vld [vmem:[%s11969_s20] sm:$0x77]  ;;  %v1096_v18 = vcombine.high %v1080_v15, %v1080_v15  ;;  %v1324_v19 = vld [vmem:[%s11969_s20 + $0x8] sm:$0x77] }
  0x15   : > { %v1339_v17 = vcombine.high %v1323_v16, %v1323_v16  ;;  %v1567_v20 = vld [vmem:[%s11969_s20] sm:$0x77]  ;;  %v1340_v22 = vcombine.high %v1324_v19, %v1324_v19  ;;  %v1568_v23 = vld [vmem:[%s11969_s20 + $0x8] sm:$0x77] }
  0x16   : > { %417 = vrot.lane.b32.xlu1 %v11983_v3, %s11865_s24  ;;  %v1583_v21 = vcombine.high %v1567_v20, %v1567_v20  ;;  %v1811_v24 = vld [vmem:[%s11969_s20] sm:$0x77]  ;;  %v1584_v26 = vcombine.high %v1568_v23, %v1568_v23  ;;  %v1812_v27 = vld [vmem:[%s11969_s20 + $0x8] sm:$0x77] }
  0x17   : > { %v1827_v25 = vcombine.high %v1811_v24, %v1811_v24  ;;  %v2055_v28 = vld [vmem:[%s11969_s20] sm:$0x77]  ;;  %v1828_v30 = vcombine.high %v1812_v27, %v1812_v27  ;;  %v2056_v31 = vld [vmem:[%s11969_s20 + $0x8] sm:$0x77] }
  0x18   : > { %433 = vrot.lane.b32.xlu0 %v11988_v4, %s11864_s21  ;;  %v2071_v29 = vcombine.high %v2055_v28, %v2055_v28  ;;  %v2299_v32 = vld [vmem:[%s11969_s20] sm:$0x77]  ;;  %v2072_v34 = vcombine.high %v2056_v31, %v2056_v31  ;;  %v2300_v35 = vld [vmem:[%s11969_s20 + $0x8] sm:$0x77]  ;;  %s11883_s20 = smov 111  }
  0x19   : > { %v2315_v33 = vcombine.high %v2299_v32, %v2299_v32  ;;  %v2316_v39 = vcombine.high %v2300_v35, %v2300_v35 }
  0x1a   : > { %421 = vrot.lane.b32.xlu1 %v11994_v5, %s11865_s24 }
  0x1c   : > { %419 = vrot.lane.b32.xlu0 %v12001_v6, %s11865_s24 }
  0x1e   : > { %435 = vrot.lane.b32.xlu1 %v12006_v7, %s11864_s21 }
  0x20   : > { %423 = vrot.lane.b32.xlu0 %v12012_v8, %s11865_s24  ;;  %s11873_s24 = smov 113  }
  0x22   : > { %857 = vrot.lane.b32.xlu1 %v836_v10, %s11866_s11 }
  0x24   : > { %855 = vrot.lane.b32.xlu0 %v851_v11, %s11866_s11 }
  0x26   : > { %841 = vrot.lane.b32.xlu1 %v11983_v3, %s11867_s12 }
  0x28   : > { %853 = vrot.lane.b32.xlu0 %v835_v9, %s11866_s11 }
  0x2a   : > { %845 = vrot.lane.b32.xlu1 %v11994_v5, %s11867_s12 }
  0x2c   : > { %843 = vrot.lane.b32.xlu0 %v12001_v6, %s11867_s12 }
  0x2e   : > { %1099 = vrot.lane.b32.xlu1 %v1095_v13, %s11868_s17 }
  0x30   : > { %847 = vrot.lane.b32.xlu0 %v12012_v8, %s11867_s12  ;;  %s10970_s12 = smul.u32 12, %s14286_s13 }
  0x32   : > { %859 = vrot.lane.b32.xlu1 %v852_v14, %s11866_s11  ;;  %s11881_s11 = smov 1  }
  0x34   : > { %1101 = vrot.lane.b32.xlu0 %v1080_v15, %s11868_s17 }
  0x36   : > { %1085 = vrot.lane.b32.xlu1 %v11983_v3, %s11869_s18 }
  0x38   : > { %1097 = vrot.lane.b32.xlu0 %v1079_v12, %s11868_s17 }
  0x3a   : > { %1089 = vrot.lane.b32.xlu1 %v11994_v5, %s11869_s18 }
  0x3c   : > { %1087 = vrot.lane.b32.xlu0 %v12001_v6, %s11869_s18 }
  0x3e   : > { %1343 = vrot.lane.b32.xlu1 %v1339_v17, %s11870_s19 }
  0x40   : > { %1091 = vrot.lane.b32.xlu0 %v12012_v8, %s11869_s18  ;;  %s395_s18 = scalar_lea.vmem %s14250_s10, %s10970_s12 }
  0x42   : > { %1103 = vrot.lane.b32.xlu1 %v1096_v18, %s11868_s17 }
  0x44   : > { %1345 = vrot.lane.b32.xlu0 %v1324_v19, %s11870_s19 }
  0x46   : > { %1329 = vrot.lane.b32.xlu1 %v11983_v3, %s11871_s22 }
  0x48   : > { %1341 = vrot.lane.b32.xlu0 %v1323_v16, %s11870_s19 }
  0x4a   : > { %1333 = vrot.lane.b32.xlu1 %v11994_v5, %s11871_s22 }
  0x4c   : > { %1331 = vrot.lane.b32.xlu0 %v12001_v6, %s11871_s22 }
  0x4e   : > { %1587 = vrot.lane.b32.xlu1 %v1583_v21, %s11872_s23 }
  0x50   : > { %1335 = vrot.lane.b32.xlu0 %v12012_v8, %s11871_s22 }
  0x52   : > { %1347 = vrot.lane.b32.xlu1 %v1340_v22, %s11870_s19 }
  0x54   : > { %1589 = vrot.lane.b32.xlu0 %v1568_v23, %s11872_s23 }
  0x56   : > { %1573 = vrot.lane.b32.xlu1 %v11983_v3, %s11873_s24 }
  0x58   : > { %1585 = vrot.lane.b32.xlu0 %v1567_v20, %s11872_s23 }
  0x5a   : > { %1577 = vrot.lane.b32.xlu1 %v11994_v5, %s11873_s24 }
  0x5c   : > { %1575 = vrot.lane.b32.xlu0 %v12001_v6, %s11873_s24 }
  0x5e   : > { %1831 = vrot.lane.b32.xlu1 %v1827_v25, %s14264_s25 }
  0x60   : > { %1579 = vrot.lane.b32.xlu0 %v12012_v8, %s11873_s24  ;;  %s11882_s24 = smov 64  }
  0x62   : > { %1591 = vrot.lane.b32.xlu1 %v1584_v26, %s11872_s23  ;;  %s14279_s23 = smov 91  }
  0x64   : > { %1833 = vrot.lane.b32.xlu0 %v1812_v27, %s14264_s25 }
  0x66   : > { %1817 = vrot.lane.b32.xlu1 %v11983_v3, %s11868_s17 }
  0x68   : > { %1829 = vrot.lane.b32.xlu0 %v1811_v24, %s14264_s25 }
  0x6a   : > { %1821 = vrot.lane.b32.xlu1 %v11994_v5, %s11868_s17 }
  0x6c   : > { %1819 = vrot.lane.b32.xlu0 %v12001_v6, %s11868_s17 }
  0x6e   : > { %2075 = vrot.lane.b32.xlu1 %v2071_v29, %s14262_s26 }
  0x70   : > { %1823 = vrot.lane.b32.xlu0 %v12012_v8, %s11868_s17 }
  0x72   : > { %1835 = vrot.lane.b32.xlu1 %v1828_v30, %s14264_s25 }
  0x74   : > { %2077 = vrot.lane.b32.xlu0 %v2056_v31, %s14262_s26 }
  0x76   : > { %2061 = vrot.lane.b32.xlu1 %v11983_v3, %s11876_s27 }
  0x78   : > { %2073 = vrot.lane.b32.xlu0 %v2055_v28, %s14262_s26 }
  0x7a   : > { %2065 = vrot.lane.b32.xlu1 %v11994_v5, %s11876_s27 }
  0x7c   : > { %2063 = vrot.lane.b32.xlu0 %v12001_v6, %s11876_s27 }
  0x7e   : > { %2319 = vrot.lane.b32.xlu1 %v2315_v33, %s11877_s28 }
  0x80   : > { %2067 = vrot.lane.b32.xlu0 %v12012_v8, %s11876_s27  ;;  %s11885_s27 = smov 93  }
  0x82   : > { %2079 = vrot.lane.b32.xlu1 %v2072_v34, %s14262_s26 }
  0x84   : > { %v430_v36 = vpop.permute.xlu1 %429  ;;  %2321 = vrot.lane.b32.xlu0 %v2300_v35, %s11877_s28 }
  0x86   : > { %2305 = vrot.lane.b32.xlu1 %v11983_v3, %s11878_s29  ;;  %v432_v37 = vpop.permute.xlu0 %431 }
  0x87   : > { %v438_v43 = vsel %vm437_vm0, %v430_v36, %v432_v37 }
  0x88   : > { %v418_v38 = vpop.permute.xlu1 %417  ;;  %2317 = vrot.lane.b32.xlu0 %v2299_v32, %s11877_s28 }
  0x8a   : > { %2309 = vrot.lane.b32.xlu1 %v11994_v5, %s11878_s29  ;;  %v434_v40 = vpop.permute.xlu0 %433 }
  0x8b   : > { %v439_v41 = vsel %vm437_vm0, %v432_v37, %v434_v40 }
  0x8c   : > { %v422_v42 = vpop.permute.xlu1 %421  ;;  %9407 = vmatprep.subr.msk.mxu0 %vm450_vm1, %v439_v41  ;;  %2307 = vrot.lane.b32.xlu0 %v12001_v6, %s11878_s29 }
  0x8d   : > { %9408 = vmatpush1.msk.msra.mxu0 %vm450_vm1, %v438_v43 }
  0x8e   : > { %2323 = vrot.lane.b32.xlu1 %v2316_v39, %s11877_s28  ;;  %9409 = vmatmul.mubr.msk.f32.vlgmr.msra.gmra.mrb[0].mxu0 %vm441_vm2, %v418_v38  ;;  %v420_v44 = vpop.permute.xlu0 %419 }
  0x8f   : > { %529 = vmatprep.mubr.f32.mxu0 %v11863_v0  ;;  %9419 = vmatprep.subr.msk.mxu0 %vm450_vm1, %v11978_v2  ;;  %v2542_v2 = vld [vmem:[%s14243_s3 + $0x18] sm:$0xff] }
  0x90   : > { %v436_v45 = vpop.permute.xlu1 %435  ;;  %9420 = vmatpush1.msk.msra.mxu0 %vm450_vm1, %v11972_v1  ;;  %2311 = vrot.lane.b32.xlu0 %v12012_v8, %s11878_s29  ;;  %v2541_v1 = vld [vmem:[%s14243_s3 + $0x10] sm:$0xff]  ;;  %s11880_s29 = smov 96  }
  0x91   : > { %9413 = vmatprep.subr.msk.mxu1 %vm450_vm1, %v436_v45  ;;  %v440_v46 = vsel %vm437_vm0, %v434_v40, %v436_v45 }
  0x92   : > { %9410 = vmatmul.mubr.msk.f32.gmra.mrb[2].mxu0 %vm441_vm2, %v420_v44  ;;  %9414 = vmatpush1.msk.msra.mxu1 %vm450_vm1, %v440_v46  ;;  %v424_v47 = vpop.permute.xlu0 %423 }
  0x93   : > { %9415 = vmatmul.mubr.msk.f32.vlgmr.msra.gmra.mrb[0].mxu1 %vm441_vm2, %v418_v38  ;;  %535 = vmatprep.mubr.f32.mxu0 %v11863_v0 }
  0x94   : > { %v858_v48 = vpop.permute.xlu1 %857  ;;  %618 = vmatprep.mubr.f32.mxu1 %v11863_v0  ;;  %9425 = vmatprep.subr.msk.mxu1 %vm450_vm1, %v12006_v7 }
  0x95   : > { %9426 = vmatpush1.msk.msra.mxu1 %vm450_vm1, %v11988_v4  ;;  %2545 = vperm.xlu0 %11020, %v2539_v56  }
  0x96   : > { %9411 = vmatmul.mubr.msk.f32.gmra.mrb[4].mxu0 %vm441_vm2, %v422_v42  ;;  %v856_v49 = vpop.permute.xlu0 %855  ;;  %2550 = vperm.xlu1 %11021, %v2540_v59  }
  0x97   : > { %9416 = vmatmul.mubr.msk.f32.gmra.mrb[2].mxu1 %vm441_vm2, %v420_v44  ;;  %541 = vmatprep.mubr.f32.mxu0 %v11863_v0  ;;  %v863_v50 = vsel %vm861_vm3, %v856_v49, %v858_v48 }
  0x98   : > { %v842_v51 = vpop.permute.xlu1 %841  ;;  %9431 = vmatprep.subr.msk.mxu0 %vm450_vm1, %v863_v50  ;;  %624 = vmatprep.mubr.f32.mxu1 %v11863_v0 }
  0x99   : > { %2560 = vperm.xlu0 %11020, %v2542_v2  }
  0x9a   : > { %9412 = vmatmul.mubr.msk.f32.gmra.mrb[6].mxu0 %vm441_vm2, %v424_v47  ;;  %v854_v52 = vpop.permute.xlu0 %853  ;;  %2555 = vperm.xlu1 %11021, %v2541_v1  }
  0x9b   : > { %9417 = vmatmul.mubr.msk.f32.gmra.mrb[4].mxu1 %vm441_vm2, %v422_v42  ;;  %717 = vmatprep.mubr.f32.mxu0 %v11863_v0  ;;  %v862_v54 = vsel %vm861_vm3, %v854_v52, %v856_v49 }
  0x9c   : > { %v12109_v53 = vpop.permute.xlu1 %845  ;;  %630 = vmatprep.mubr.f32.mxu1 %v11863_v0 }
  0x9e   : > { %9421 = vmatmul.mubr.msk.f32.vlgmr.msra.gmra.mrb[0].mxu0 %vm441_vm2, %v11983_v3  ;;  %v844_v55 = vpop.permute.xlu0 %843 }
  0x9f   : > { %9418 = vmatmul.mubr.msk.f32.gmra.mrb[6].mxu1 %vm441_vm2, %v424_v47  ;;  %723 = vmatprep.mubr.f32.mxu0 %v11863_v0 }
  0xa0   : > { %v1100_v57 = vpop.permute.xlu1 %1099  ;;  %9432 = vmatpush1.msk.msra.mxu0 %vm450_vm1, %v862_v54  ;;  %806 = vmatprep.mubr.f32.mxu1 %v11863_v0 }
  0xa2   : > { %9422 = vmatmul.mubr.msk.f32.gmra.mrb[2].mxu0 %vm441_vm2, %v12001_v6  ;;  %v12129_v60 = vpop.permute.xlu0 %847 }
  0xa3   : > { %9427 = vmatmul.mubr.msk.f32.vlgmr.msra.gmra.mrb[0].mxu1 %vm441_vm2, %v11983_v3  ;;  %729 = vmatprep.mubr.f32.mxu0 %v11863_v0 }
  0xa4   : > { %v860_v61 = vpop.permute.xlu1 %859  ;;  %812 = vmatprep.mubr.f32.mxu1 %v11863_v0 }
  0xa5   : > { %v864_v62 = vsel %vm861_vm3, %v858_v48, %v860_v61  ;;  %9437 = vmatprep.subr.msk.mxu1 %vm450_vm1, %v860_v61  ;;  %vm2706_vm3 = vcmask 1048240  }
  0xa6   : > { %9423 = vmatmul.mubr.msk.f32.gmra.mrb[4].mxu0 %vm441_vm2, %v11994_v5  ;;  %9438 = vmatpush1.msk.msra.mxu1 %vm450_vm1, %v864_v62  ;;  %v1102_v63 = vpop.permute.xlu0 %1101 }
  0xa7   : > { %9428 = vmatmul.mubr.msk.f32.gmra.mrb[2].mxu1 %vm441_vm2, %v12001_v6  ;;  %v1107_v3 = vsel %vm1105_vm4, %v1100_v57, %v1102_v63  ;;  %735 = vmatprep.mubr.f32.mxu0 %v11863_v0 }
  0xa8   : > { %v1086_v4 = vpop.permute.xlu1 %1085  ;;  %9443 = vmatprep.subr.msk.mxu0 %vm450_vm1, %v1107_v3  ;;  %818 = vmatprep.mubr.f32.mxu1 %v11863_v0 }
  0xaa   : > { %9424 = vmatmul.mubr.msk.f32.gmra.mrb[6].mxu0 %vm441_vm2, %v12012_v8  ;;  %v1098_v7 = vpop.permute.xlu0 %1097 }
  0xab   : > { %9429 = vmatmul.mubr.msk.f32.gmra.mrb[4].mxu1 %vm441_vm2, %v11994_v5  ;;  %945 = vmatprep.mubr.f32.mxu0 %v11863_v0  ;;  %v1106_v6 = vsel %vm1105_vm4, %v1098_v7, %v1100_v57  ;;  %v12327_v7 = vld [vmem:[%s14244_s4] sm:$0xff] }
  0xac   : > { %v1090_v9 = vpop.permute.xlu1 %1089  ;;  %824 = vmatprep.mubr.f32.mxu1 %v11863_v0  ;;  %2739 = vrot.lane.b32.xlu1 %v12327_v7, %s11880_s29 }
  0xae   : > { %9433 = vmatmul.mubr.msk.f32.vlgmr.msra.gmra.mrb[0].mxu0 %vm441_vm2, %v842_v51  ;;  %v1088_v10 = vpop.permute.xlu0 %1087 }
  0xaf   : > { %9444 = vmatpush1.msk.msra.mxu0 %vm450_vm1, %v1106_v6  ;;  %9430 = vmatmul.mubr.msk.f32.gmra.mrb[6].mxu1 %vm441_vm2, %v12012_v8  ;;  %v2719_v6 = vld [vmem:[#allocation2] sm:$0xff] }
  0xb0   : > { %v1344_v11 = vpop.permute.xlu1 %1343  ;;  %951 = vmatprep.mubr.f32.mxu0 %v11863_v0  ;;  %1034 = vmatprep.mubr.f32.mxu1 %v11863_v0 }
  0xb2   : > { %9434 = vmatmul.mubr.msk.f32.gmra.mrb[2].mxu0 %vm441_vm2, %v844_v55  ;;  %v1092_v5 = vpop.permute.xlu0 %1091 }
  0xb3   : > { %9439 = vmatmul.mubr.msk.f32.vlgmr.msra.gmra.mrb[0].mxu1 %vm441_vm2, %v842_v51  ;;  %957 = vmatprep.mubr.f32.mxu0 %v11863_v0 }
  0xb4   : > { %v1104_v12 = vpop.permute.xlu1 %1103  ;;  %1040 = vmatprep.mubr.f32.mxu1 %v11863_v0 }
  0xb5   : > { %v1108_v13 = vsel %vm1105_vm4, %v1102_v63, %v1104_v12  ;;  %9449 = vmatprep.subr.msk.mxu1 %vm450_vm1, %v1104_v12  ;;  %v2731_v12 = vld [vmem:[#allocation2 + $0x78] sm:$0xff] }
  0xb6   : > { %9435 = vmatmul.mubr.msk.f32.gmra.mrb[4].mxu0 %vm441_vm2, %v12109_v53  ;;  %9450 = vmatpush1.msk.msra.mxu1 %vm450_vm1, %v1108_v13  ;;  %v1346_v8 = vpop.permute.xlu0 %1345 }
  0xb7   : > { %9440 = vmatmul.mubr.msk.f32.gmra.mrb[2].mxu1 %vm441_vm2, %v844_v55  ;;  %v1351_v14 = vsel %vm1349_vm5, %v1344_v11, %v1346_v8  ;;  %963 = vmatprep.mubr.f32.mxu0 %v11863_v0 }
  0xb8   : > { %v1330_v15 = vpop.permute.xlu1 %1329  ;;  %9455 = vmatprep.subr.msk.mxu0 %vm450_vm1, %v1351_v14  ;;  %1046 = vmatprep.mubr.f32.mxu1 %v11863_v0  ;;  %v12350_v14 = vld [vmem:[%s14244_s4 + $0x48] sm:$0xff] }
  0xba   : > { %9436 = vmatmul.mubr.msk.f32.gmra.mrb[6].mxu0 %vm441_vm2, %v12129_v60  ;;  %v1342_v16 = vpop.permute.xlu0 %1341 }
  0xbb   : > { %9441 = vmatmul.mubr.msk.f32.gmra.mrb[4].mxu1 %vm441_vm2, %v12109_v53  ;;  %1189 = vmatprep.mubr.f32.mxu0 %v11863_v0  ;;  %v1350_v17 = vsel %vm1349_vm5, %v1342_v16, %v1344_v11  ;;  %v12334_v11 = vld [vmem:[%s14244_s4 + $0x18] sm:$0xff]  ;;  %v2644_v16 = vlaneseq }
  0xbc   : > { %v1334_v18 = vpop.permute.xlu1 %1333  ;;  %1052 = vmatprep.mubr.f32.mxu1 %v11863_v0  ;;  %2741 = vrot.lane.b32.xlu0 %v12334_v11, %s11880_s29 }
  0xbe   : > { %9445 = vmatmul.mubr.msk.f32.vlgmr.msra.gmra.mrb[0].mxu0 %vm441_vm2, %v1086_v4  ;;  %v1332_v19 = vpop.permute.xlu0 %1331 }
  0xbf   : > { %9456 = vmatpush1.msk.msra.mxu0 %vm450_vm1, %v1350_v17  ;;  %9442 = vmatmul.mubr.msk.f32.gmra.mrb[6].mxu1 %vm441_vm2, %v12129_v60  ;;  %v396_v17 = vld [vmem:[%s14241_s1] sm:$0xf] }
  0xc0   : > { %v1588_v20 = vpop.permute.xlu1 %1587  ;;  %1195 = vmatprep.mubr.f32.mxu0 %v11863_v0  ;;  %1278 = vmatprep.mubr.f32.mxu1 %v11863_v0  ;;  %vm397_vm11 = vcmp.ne.f32.partialorder %v396_v17, 0.0 }
  0xc2   : > { %9446 = vmatmul.mubr.msk.f32.gmra.mrb[2].mxu0 %vm441_vm2, %v1088_v10  ;;  %v1336_v21 = vpop.permute.xlu0 %1335 }
  0xc3   : > { %9451 = vmatmul.mubr.msk.f32.vlgmr.msra.gmra.mrb[0].mxu1 %vm441_vm2, %v1086_v4  ;;  %1201 = vmatprep.mubr.f32.mxu0 %v11863_v0 }
  0xc4   : > { %v1348_v22 = vpop.permute.xlu1 %1347  ;;  %1284 = vmatprep.mubr.f32.mxu1 %v11863_v0 }
  0xc5   : > { %v1352_v23 = vsel %vm1349_vm5, %v1346_v8, %v1348_v22  ;;  %9461 = vmatprep.subr.msk.mxu1 %vm450_vm1, %v1348_v22  ;;  %v12342_v8 = vld [vmem:[%s14244_s4 + $0x30] sm:$0xff] }
  0xc6   : > { %9447 = vmatmul.mubr.msk.f32.gmra.mrb[4].mxu0 %vm441_vm2, %v1090_v9  ;;  %9462 = vmatpush1.msk.msra.mxu1 %vm450_vm1, %v1352_v23  ;;  %v1590_v24 = vpop.permute.xlu0 %1589 }
  0xc7   : > { %9452 = vmatmul.mubr.msk.f32.gmra.mrb[2].mxu1 %vm441_vm2, %v1088_v10  ;;  %v1595_v25 = vsel %vm1593_vm6, %v1588_v20, %v1590_v24  ;;  %1207 = vmatprep.mubr.f32.mxu0 %v11863_v0 }
  0xc8   : > { %v1574_v26 = vpop.permute.xlu1 %1573  ;;  %9467 = vmatprep.subr.msk.mxu0 %vm450_vm1, %v1595_v25  ;;  %1290 = vmatprep.mubr.f32.mxu1 %v11863_v0  ;;  %v2643_v25 = vsel %vm397_vm11, 1, %v11879_v58  ;;  %vm3463_vm11 = vcmask 908288  }
  0xc9   : > { %2743 = vrot.lane.b32.xlu0 %v12342_v8, %s11880_s29 }
  0xca   : > { %9448 = vmatmul.mubr.msk.f32.gmra.mrb[6].mxu0 %vm441_vm2, %v1092_v5  ;;  %v1586_v27 = vpop.permute.xlu0 %1585 }
  0xcb   : > { %9453 = vmatmul.mubr.msk.f32.gmra.mrb[4].mxu1 %vm441_vm2, %v1090_v9  ;;  %1433 = vmatprep.mubr.f32.mxu0 %v11863_v0  ;;  %v1594_v28 = vsel %vm1593_vm6, %v1586_v27, %v1588_v20  ;;  %v2723_v9 = vld [vmem:[#allocation2 + $0x28] sm:$0xff] }
  0xcc   : > { %v1578_v29 = vpop.permute.xlu1 %1577  ;;  %1296 = vmatprep.mubr.f32.mxu1 %v11863_v0  ;;  %v11022_v10 = vpack.i.bf16 %v2723_v9, %v2719_v6 }
  0xcd   : > { %2745 = vrot.lane.b32.xlu0 %v12350_v14, %s11880_s29 }
  0xce   : > { %9457 = vmatmul.mubr.msk.f32.vlgmr.msra.gmra.mrb[0].mxu0 %vm441_vm2, %v1330_v15  ;;  %v1576_v30 = vpop.permute.xlu0 %1575  ;;  %11023 = vrot.lane.b32.xlu1 %v11022_v10, %s11881_s11 }
  0xcf   : > { %9468 = vmatpush1.msk.msra.mxu0 %vm450_vm1, %v1594_v28  ;;  %9454 = vmatmul.mubr.msk.f32.gmra.mrb[6].mxu1 %vm441_vm2, %v1092_v5  ;;  %v2727_v5 = vld [vmem:[#allocation2 + $0x50] sm:$0xff] }
  0xd0   : > { %v1832_v31 = vpop.permute.xlu1 %1831  ;;  %1439 = vmatprep.mubr.f32.mxu0 %v11863_v0  ;;  %1522 = vmatprep.mubr.f32.mxu1 %v11863_v0  ;;  %v11027_v13 = vpack.i.bf16 %v2731_v12, %v2727_v5 }
  0xd1   : > { %3187 = vrot.lane.b32.xlu0 %v12334_v11, %s11882_s24 }
  0xd2   : > { %9458 = vmatmul.mubr.msk.f32.gmra.mrb[2].mxu0 %vm441_vm2, %v1332_v19  ;;  %v1580_v32 = vpop.permute.xlu0 %1579  ;;  %11028 = vrot.lane.b32.xlu1 %v11027_v13, %s11881_s11 }
  0xd3   : > { %9463 = vmatmul.mubr.msk.f32.vlgmr.msra.gmra.mrb[0].mxu1 %vm441_vm2, %v1330_v15  ;;  %1445 = vmatprep.mubr.f32.mxu0 %v11863_v0 }
  0xd4   : > { %v1592_v33 = vpop.permute.xlu1 %1591  ;;  %1528 = vmatprep.mubr.f32.mxu1 %v11863_v0 }
  0xd5   : > { %v1596_v34 = vsel %vm1593_vm6, %v1590_v24, %v1592_v33  ;;  %9473 = vmatprep.subr.msk.mxu1 %vm450_vm1, %v1592_v33  ;;  %vm2683_vm6 = vcmask 97280  }
  0xd6   : > { %9459 = vmatmul.mubr.msk.f32.gmra.mrb[4].mxu0 %vm441_vm2, %v1334_v18  ;;  %9474 = vmatpush1.msk.msra.mxu1 %vm450_vm1, %v1596_v34  ;;  %v1834_v35 = vpop.permute.xlu0 %1833 }
  0xd7   : > { %9464 = vmatmul.mubr.msk.f32.gmra.mrb[2].mxu1 %vm441_vm2, %v1332_v19  ;;  %v1839_v36 = vsel %vm1837_vm7, %v1832_v31, %v1834_v35  ;;  %1451 = vmatprep.mubr.f32.mxu0 %v11863_v0 }
  0xd8   : > { %v1818_v37 = vpop.permute.xlu1 %1817  ;;  %9479 = vmatprep.subr.msk.mxu0 %vm450_vm1, %v1839_v36  ;;  %1534 = vmatprep.mubr.f32.mxu1 %v11863_v0 }
  0xd9   : > { %3185 = vrot.lane.b32.xlu1 %v12327_v7, %s11882_s24 }
  0xda   : > { %9460 = vmatmul.mubr.msk.f32.gmra.mrb[6].mxu0 %vm441_vm2, %v1336_v21  ;;  %v1830_v38 = vpop.permute.xlu0 %1829 }
  0xdb   : > { %9465 = vmatmul.mubr.msk.f32.gmra.mrb[4].mxu1 %vm441_vm2, %v1334_v18  ;;  %1677 = vmatprep.mubr.f32.mxu0 %v11863_v0  ;;  %v1838_v39 = vsel %vm1837_vm7, %v1830_v38, %v1832_v31  ;;  %v2645_v18 = vshrl.u32 %v2644_v16, 7 }
  0xdc   : > { %v1822_v40 = vpop.permute.xlu1 %1821  ;;  %1540 = vmatprep.mubr.f32.mxu1 %v11863_v0 }
  0xdd   : > { %v2646_v20 = vsub.s32 0, %v2645_v18  ;;  %v2654_v22 = vsub.s32 2, %v2645_v18  ;;  %v2658_v24 = vsub.s32 3, %v2645_v18 }
  0xde   : > { %9469 = vmatmul.mubr.msk.f32.vlgmr.msra.gmra.mrb[0].mxu0 %vm441_vm2, %v1574_v26  ;;  %v1820_v41 = vpop.permute.xlu0 %1819 }
  0xdf   : > { %9480 = vmatpush1.msk.msra.mxu0 %vm450_vm1, %v1838_v39  ;;  %9466 = vmatmul.mubr.msk.f32.gmra.mrb[6].mxu1 %vm441_vm2, %v1336_v21  ;;  %v2650_v21 = vsub.s32 1, %v2645_v18  ;;  %v12370_v27 = vrot.slane %v2643_v25, %v2646_v20  ;;  %v12376_v31 = vrot.slane %v2643_v25, %v2658_v24 }
  0xe0   : > { %v2076_v42 = vpop.permute.xlu1 %2075  ;;  %1683 = vmatprep.mubr.f32.mxu0 %v11863_v0  ;;  %1766 = vmatprep.mubr.f32.mxu1 %v11863_v0 }
  0xe1   : > { %v12372_v28 = vrot.slane %v2643_v25, %v2650_v21  ;;  %vm2660_vm13 = vcmp.eq.s32.totalorder %v12370_v27, 1 }
  0xe2   : > { %9470 = vmatmul.mubr.msk.f32.gmra.mrb[2].mxu0 %vm441_vm2, %v1576_v30  ;;  %v1824_v43 = vpop.permute.xlu0 %1823 }
  0xe3   : > { %9475 = vmatmul.mubr.msk.f32.vlgmr.msra.gmra.mrb[0].mxu1 %vm441_vm2, %v1574_v26  ;;  %1689 = vmatprep.mubr.f32.mxu0 %v11863_v0  ;;  %vm2661_vm14 = vcmp.eq.s32.totalorder %v12372_v28, 1 }
  0xe4   : > { %v1836_v44 = vpop.permute.xlu1 %1835  ;;  %1772 = vmatprep.mubr.f32.mxu1 %v11863_v0 }
  0xe5   : > { %v1840_v45 = vsel %vm1837_vm7, %v1834_v35, %v1836_v44  ;;  %9485 = vmatprep.subr.msk.mxu1 %vm450_vm1, %v1836_v44 }
  0xe6   : > { %9471 = vmatmul.mubr.msk.f32.gmra.mrb[4].mxu0 %vm441_vm2, %v1578_v29  ;;  %9486 = vmatpush1.msk.msra.mxu1 %vm450_vm1, %v1840_v45  ;;  %v2078_v46 = vpop.permute.xlu0 %2077 }
  0xe7   : > { %9476 = vmatmul.mubr.msk.f32.gmra.mrb[2].mxu1 %vm441_vm2, %v1576_v30  ;;  %v2083_v47 = vsel %vm2081_vm8, %v2076_v42, %v2078_v46  ;;  %1695 = vmatprep.mubr.f32.mxu0 %v11863_v0 }
  0xe8   : > { %v2062_v48 = vpop.permute.xlu1 %2061  ;;  %9491 = vmatprep.subr.msk.mxu0 %vm450_vm1, %v2083_v47  ;;  %1778 = vmatprep.mubr.f32.mxu1 %v11863_v0 }
  0xea   : > { %9472 = vmatmul.mubr.msk.f32.gmra.mrb[6].mxu0 %vm441_vm2, %v1580_v32  ;;  %v2074_v49 = vpop.permute.xlu0 %2073 }
  0xeb   : > { %9477 = vmatmul.mubr.msk.f32.gmra.mrb[4].mxu1 %vm441_vm2, %v1578_v29  ;;  %1921 = vmatprep.mubr.f32.mxu0 %v11863_v0  ;;  %v2082_v50 = vsel %vm2081_vm8, %v2074_v49, %v2076_v42  ;;  %v12374_v29 = vrot.slane %v2643_v25, %v2654_v22 }
  0xec   : > { %v2066_v51 = vpop.permute.xlu1 %2065  ;;  %1784 = vmatprep.mubr.f32.mxu1 %v11863_v0 }
  0xed   : > { %vm2662_vm15 = vcmp.eq.s32.totalorder %v12374_v29, 1 }
  0xee   : > { %9481 = vmatmul.mubr.msk.f32.vlgmr.msra.gmra.mrb[0].mxu0 %vm441_vm2, %v1818_v37  ;;  %v2064_v52 = vpop.permute.xlu0 %2063 }
  0xef   : > { %9492 = vmatpush1.msk.msra.mxu0 %vm450_vm1, %v2082_v50  ;;  %9478 = vmatmul.mubr.msk.f32.gmra.mrb[6].mxu1 %vm441_vm2, %v1580_v32 }
  0xf0   : > { %v2320_v53 = vpop.permute.xlu1 %2319  ;;  %1927 = vmatprep.mubr.f32.mxu0 %v11863_v0  ;;  %2010 = vmatprep.mubr.f32.mxu1 %v11863_v0 }
  0xf2   : > { %9482 = vmatmul.mubr.msk.f32.gmra.mrb[2].mxu0 %vm441_vm2, %v1820_v41  ;;  %v2068_v54 = vpop.permute.xlu0 %2067 }
  0xf3   : > { %9487 = vmatmul.mubr.msk.f32.vlgmr.msra.gmra.mrb[0].mxu1 %vm441_vm2, %v1818_v37  ;;  %1933 = vmatprep.mubr.f32.mxu0 %v11863_v0 }
  0xf4   : > { %v2080_v55 = vpop.permute.xlu1 %2079  ;;  %2016 = vmatprep.mubr.f32.mxu1 %v11863_v0 }
  0xf5   : > { %v2084_v56 = vsel %vm2081_vm8, %v2078_v46, %v2080_v55  ;;  %9497 = vmatprep.subr.msk.mxu1 %vm450_vm1, %v2080_v55 }
  0xf6   : > { %9483 = vmatmul.mubr.msk.f32.gmra.mrb[4].mxu0 %vm441_vm2, %v1822_v40  ;;  %9498 = vmatpush1.msk.msra.mxu1 %vm450_vm1, %v2084_v56  ;;  %v2322_v57 = vpop.permute.xlu0 %2321 }
  0xf7   : > { %9488 = vmatmul.mubr.msk.f32.gmra.mrb[2].mxu1 %vm441_vm2, %v1820_v41  ;;  %v2327_v59 = vsel %vm2325_vm9, %v2320_v53, %v2322_v57  ;;  %1939 = vmatprep.mubr.f32.mxu0 %v11863_v0 }
  0xf8   : > { %v2306_v60 = vpop.permute.xlu1 %2305  ;;  %9503 = vmatprep.subr.msk.mxu0 %vm450_vm1, %v2327_v59  ;;  %2022 = vmatprep.mubr.f32.mxu1 %v11863_v0 }
  0xfa   : > { %9484 = vmatmul.mubr.msk.f32.gmra.mrb[6].mxu0 %vm441_vm2, %v1824_v43  ;;  %v2318_v61 = vpop.permute.xlu0 %2317 }
  0xfb   : > { %9489 = vmatmul.mubr.msk.f32.gmra.mrb[4].mxu1 %vm441_vm2, %v1822_v40  ;;  %2165 = vmatprep.mubr.f32.mxu0 %v11863_v0  ;;  %v2326_v62 = vsel %vm2325_vm9, %v2318_v61, %v2320_v53 }
  0xfc   : > { %v2310_v63 = vpop.permute.xlu1 %2309  ;;  %2028 = vmatprep.mubr.f32.mxu1 %v11863_v0 }
  0xfe   : > { %9493 = vmatmul.mubr.msk.f32.vlgmr.msra.gmra.mrb[0].mxu0 %vm441_vm2, %v2062_v48  ;;  %v2308_v3 = vpop.permute.xlu0 %2307 }
  0xff   : > { %9504 = vmatpush1.msk.msra.mxu0 %vm450_vm1, %v2326_v62  ;;  %9490 = vmatmul.mubr.msk.f32.gmra.mrb[6].mxu1 %vm441_vm2, %v1824_v43 }
 0x100   : > { %v2324_v1 = vpop.permute.xlu1 %2323  ;;  %2171 = vmatprep.mubr.f32.mxu0 %v11863_v0  ;;  %2254 = vmatprep.mubr.f32.mxu1 %v11863_v0 }
 0x101   : > { %v2328_v2 = vsel %vm2325_vm9, %v2322_v57, %v2324_v1  ;;  %9509 = vmatprep.subr.msk.mxu1 %vm450_vm1, %v2324_v1  ;;  %vm12464_vm9 = vmpackc.low %vm2661_vm14, %vm2661_vm14 }
 0x102   : > { %9494 = vmatmul.mubr.msk.f32.gmra.mrb[2].mxu0 %vm441_vm2, %v2064_v52  ;;  %v2312_v4 = vpop.permute.xlu0 %2311 }
 0x103   : > { %9499 = vmatmul.mubr.msk.f32.vlgmr.msra.gmra.mrb[0].mxu1 %vm441_vm2, %v2062_v48  ;;  %2177 = vmatprep.mubr.f32.mxu0 %v11863_v0 }
 0x104   : > { %9510 = vmatpush1.msk.msra.mxu1 %vm450_vm1, %v2328_v2  ;;  %2260 = vmatprep.mubr.f32.mxu1 %v11863_v0  ;;  %vm2663_vm1 = vcmp.eq.s32.totalorder %v12376_v31, 1 }
 0x106   : > { %9495 = vmatmul.mubr.msk.f32.gmra.mrb[4].mxu0 %vm441_vm2, %v2066_v51 }
 0x107   : > { %9500 = vmatmul.mubr.msk.f32.gmra.mrb[2].mxu1 %vm441_vm2, %v2064_v52  ;;  %2183 = vmatprep.mubr.f32.mxu0 %v11863_v0 }
 0x108   : > { %2266 = vmatprep.mubr.f32.mxu1 %v11863_v0 }
 0x10a   : > { %9496 = vmatmul.mubr.msk.f32.gmra.mrb[6].mxu0 %vm441_vm2, %v2068_v54 }
 0x10b   : > { %9501 = vmatmul.mubr.msk.f32.gmra.mrb[4].mxu1 %vm441_vm2, %v2066_v51  ;;  %2409 = vmatprep.mubr.f32.mxu0 %v11863_v0 }
 0x10c   : > { %2272 = vmatprep.mubr.f32.mxu1 %v11863_v0 }
 0x10e   : > { %9505 = vmatmul.mubr.msk.f32.vlgmr.msra.gmra.mrb[0].mxu0 %vm441_vm2, %v2306_v60 }
 0x10f   : > { %9502 = vmatmul.mubr.msk.f32.gmra.mrb[6].mxu1 %vm441_vm2, %v2068_v54  ;;  %2415 = vmatprep.mubr.f32.mxu0 %v11863_v0 }
 0x110   : > { %2498 = vmatprep.mubr.f32.mxu1 %v11863_v0 }
 0x112   : > { %9506 = vmatmul.mubr.msk.f32.gmra.mrb[2].mxu0 %vm441_vm2, %v2308_v3 }
 0x113   : > { %9511 = vmatmul.mubr.msk.f32.vlgmr.msra.gmra.mrb[0].mxu1 %vm441_vm2, %v2306_v60  ;;  %2421 = vmatprep.mubr.f32.mxu0 %v11863_v0 }
 0x114   : > { %2504 = vmatprep.mubr.f32.mxu1 %v11863_v0  ;;  %v2546_v26 = vpop.permute.xlu0 %2545 }
 0x115   : > { %v12358_v15 = vpop.permute.xlu1 %2550 }
 0x116   : > { %9507 = vmatmul.mubr.msk.f32.gmra.mrb[4].mxu0 %vm441_vm2, %v2310_v63 }
 0x117   : > { %9512 = vmatmul.mubr.msk.f32.gmra.mrb[2].mxu1 %vm441_vm2, %v2308_v3  ;;  %2427 = vmatprep.mubr.f32.mxu0 %v11863_v0 }
 0x118   : > { %2510 = vmatprep.mubr.f32.mxu1 %v11863_v0 }
 0x119   : > { %v12363_v19 = vpop.permute.xlu1 %2555 }
 0x11a   : > { %9508 = vmatmul.mubr.msk.f32.gmra.mrb[6].mxu0 %vm441_vm2, %v2312_v4 }
 0x11b   : > { %9513 = vmatmul.mubr.msk.f32.gmra.mrb[4].mxu1 %vm441_vm2, %v2310_v63  ;;  %2820 = vmatprep.mubr.f32.mxu0 %v11863_v0 }
 0x11c   : > { %2516 = vmatprep.mubr.f32.mxu1 %v11863_v0 }
 0x11e   : > { %v12365_v23 = vpop.permute.xlu1 %2739 }
 0x11f   : > { %9514 = vmatmul.mubr.msk.f32.gmra.mrb[6].mxu1 %vm441_vm2, %v2312_v4  ;;  %vm2701_vm2 = vcmask 441344  }
 0x120   : > { %9877 = vmatprep.mubr.msk.f32.mxu1 %vm2747_vm12, %v12365_v23 }
 0x1e1   : > { %v2411_v30 = vpop.f32.mrb[0].mxu0 }
 0x1e2   : > { %v2563_v32 = vadd.f32 %v2546_v26, %v2411_v30  ;;  %v2413_v33 = vpop.f32.mrb[1].mxu0 }
 0x1e3   : > { %v2564_v34 = vadd.f32 %v2546_v26, %v2413_v33 }
 0x1e4   : > { %v2595_v35 = vmin.f32 %v2563_v32, 0.0  ;;  %v2579_v37 = vmax.f32 %v2563_v32, 0.0 }
 0x1e5   : > { %v2596_v58 = vmin.f32 %v2564_v34, 0.0  ;;  %v2417_v36 = vpop.f32.mrb[2].mxu0  ;;  %v2580_v42 = vmax.f32 %v2564_v34, 0.0 }
 0x1e6   : > { %v2611_v38 = vmul.f32 0.2, %v2595_v35  ;;  %v2567_v39 = vadd.f32 %v12358_v15, %v2417_v36  ;;  %v2419_v40 = vpop.f32.mrb[3].mxu0  ;;  %v2500_v41 = vpop.f32.mrb[0].mxu1 }
 0x1e7   : > { %v2612_v43 = vmul.f32 0.2, %v2596_v58  ;;  %v2568_v44 = vadd.f32 %v12358_v15, %v2419_v40  ;;  %v2565_v45 = vadd.f32 %v2546_v26, %v2500_v41  ;;  %v2502_v46 = vpop.f32.mrb[1].mxu1  ;;  %v2561_v36 = vpop.permute.xlu0 %2560 }
 0x1e8   : > { %v2627_v47 = vadd.f32 %v2611_v38, %v2579_v37  ;;  %v2583_v48 = vmax.f32 %v2567_v39, 0.0  ;;  %v2599_v49 = vmin.f32 %v2567_v39, 0.0  ;;  %v2566_v50 = vadd.f32 %v2546_v26, %v2502_v46 }
 0x1e9   : > { %v12384_v51 = vadd.f32 %v2612_v43, %v2580_v42  ;;  %v2584_v52 = vmax.f32 %v2568_v44, 0.0  ;;  %v2600_v53 = vmin.f32 %v2568_v44, 0.0  ;;  %v2581_v54 = vmax.f32 %v2565_v45, 0.0  ;;  %v2423_v55 = vpop.f32.mrb[4].mxu0 }
 0x1ea   : > { %v2664_v56 = vsel %vm2660_vm13, %v2627_v47, 0.0  ;;  %v2615_v57 = vmul.f32 0.2, %v2599_v49  ;;  %v2597_v59 = vmin.f32 %v2565_v45, 0.0  ;;  %v2582_v60 = vmax.f32 %v2566_v50, 0.0  ;;  %v2425_v61 = vpop.f32.mrb[5].mxu0 }
 0x1eb   : > { %2680 = vst [vmem:[#allocation2 + $0x8] sm:$0xff] %v2664_v56  ;;  %v12391_v62 = vsel %vm2661_vm14, %v12384_v51, 0.0  ;;  %v2616_v63 = vmul.f32 0.2, %v2600_v53  ;;  %v2598_v1 = vmin.f32 %v2566_v50, 0.0  ;;  %v2571_v2 = vadd.f32 %v12363_v19, %v2423_v55  ;;  %v2506_v3 = vpop.f32.mrb[2].mxu1 }
 0x1ec   : > { %v2631_v4 = vadd.f32 %v2615_v57, %v2583_v48  ;;  %2702 = vst.msk [vmem:[#allocation2 + $0x8] sm:$0xff] %vm2701_vm2, %v11863_v0  ;;  %v2613_v6 = vmul.f32 0.2, %v2597_v59  ;;  %v2572_v9 = vadd.f32 %v12363_v19, %v2425_v61  ;;  %v2569_v10 = vadd.f32 %v12358_v15, %v2506_v3  ;;  %v2508_v5 = vpop.f32.mrb[3].mxu1 }
 0x1ed   : > { %v12398_v12 = vadd.f32 %v2616_v63, %v2584_v52  ;;  %v2614_v13 = vmul.f32 0.2, %v2598_v1  ;;  %v2587_v16 = vmax.f32 %v2571_v2, 0.0  ;;  %v2603_v17 = vmin.f32 %v2571_v2, 0.0  ;;  %v2429_v18 = vpop.f32.mrb[6].mxu0 }
 0x1ee   : > { %v2668_v20 = vsel %vm2660_vm13, %v2631_v4, 0.0  ;;  %v2629_v21 = vadd.f32 %v2613_v6, %v2581_v54  ;;  %v2588_v22 = vmax.f32 %v2572_v9, 0.0  ;;  %v2604_v24 = vmin.f32 %v2572_v9, 0.0  ;;  %v2431_v25 = vpop.f32.mrb[7].mxu0  ;;  %v2512_v26 = vpop.f32.mrb[4].mxu1 }
 0x1ef   : > { %2685 = vst [vmem:[#allocation2 + $0x30] sm:$0xff] %v2668_v20  ;;  %v12405_v30 = vsel %vm2661_vm14, %v12398_v12, 0.0  ;;  %v2630_v32 = vadd.f32 %v2614_v13, %v2582_v60  ;;  %v2619_v33 = vmul.f32 0.2, %v2603_v17  ;;  %v2585_v34 = vmax.f32 %v2569_v10, 0.0  ;;  %v2514_v35 = vpop.f32.mrb[5].mxu1 }
 0x1f0   : > { %2703 = vst.msk [vmem:[#allocation2 + $0x30] sm:$0xff] %vm2701_vm2, %v11863_v0  ;;  %v2666_v58 = vsel %vm2662_vm15, %v2629_v21, 0.0  ;;  %v2620_v37 = vmul.f32 0.2, %v2604_v24  ;;  %v2601_v38 = vmin.f32 %v2569_v10, 0.0  ;;  %v2570_v39 = vadd.f32 %v12358_v15, %v2508_v5 }
 0x1f1   : > { %2682 = vst [vmem:[#allocation2 + $0x18] sm:$0xff] %v2666_v58  ;;  %v2667_v40 = vsel %vm2663_vm1, %v2630_v32, 0.0  ;;  %v2635_v41 = vadd.f32 %v2619_v33, %v2587_v16  ;;  %v2575_v42 = vadd.f32 %v2561_v36, %v2429_v18  ;;  %v2576_v43 = vadd.f32 %v2561_v36, %v2431_v25 }
 0x1f2   : > { %2707 = vst.msk [vmem:[#allocation2 + $0x18] sm:$0xff] %vm2706_vm3, %v11863_v0  ;;  %v12417_v44 = vadd.f32 %v2620_v37, %v2588_v22  ;;  %v2617_v45 = vmul.f32 0.2, %v2601_v38  ;;  %v2586_v46 = vmax.f32 %v2570_v39, 0.0  ;;  %v2602_v47 = vmin.f32 %v2570_v39, 0.0  ;;  %v2518_v48 = vpop.f32.mrb[6].mxu1 }
 0x1f3   : > { %2684 = vst.msk [vmem:[#allocation2 + $0x20] sm:$0xff] %vm2683_vm6, %v2667_v40  ;;  %v2672_v15 = vsel %vm2660_vm13, %v2635_v41, 0.0  ;;  %v2591_v49 = vmax.f32 %v2575_v42, 0.0  ;;  %v2607_v50 = vmin.f32 %v2575_v42, 0.0  ;;  %v2592_v52 = vmax.f32 %v2576_v43, 0.0  ;;  %v2520_v53 = vpop.f32.mrb[7].mxu1 }
 0x1f4   : > { %2708 = vst.msk [vmem:[#allocation2 + $0x20] sm:$0xff] %vm2683_vm6, %v11863_v0  ;;  %2689 = vst [vmem:[#allocation2 + $0x58] sm:$0xff] %v2672_v15  ;;  %v12426_v54 = vsel %vm2661_vm14, %v12417_v44, 0.0  ;;  %v2633_v55 = vadd.f32 %v2617_v45, %v2585_v34  ;;  %v2618_v56 = vmul.f32 0.2, %v2602_v47  ;;  %v2608_v57 = vmin.f32 %v2576_v43, 0.0 }
 0x1f5   : > { %2704 = vst.msk [vmem:[#allocation2 + $0x58] sm:$0xff] %vm2701_vm2, %v11863_v0  ;;  %v2623_v59 = vmul.f32 0.2, %v2607_v50  ;;  %v2573_v60 = vadd.f32 %v12363_v19, %v2512_v26  ;;  %v2574_v61 = vadd.f32 %v12363_v19, %v2514_v35  ;;  %v2577_v63 = vadd.f32 %v2561_v36, %v2518_v48  ;;  %v2720_v13 = vld [vmem:[#allocation2 + $0x8] sm:$0xff] }
 0x1f6   : > { %v2670_v1 = vsel %vm2662_vm15, %v2633_v55, 0.0  ;;  %v2634_v2 = vadd.f32 %v2618_v56, %v2586_v46  ;;  %v2624_v3 = vmul.f32 0.2, %v2608_v57  ;;  %v2578_v4 = vadd.f32 %v2561_v36, %v2520_v53  ;;  %v2742_v53 = vpop.permute.xlu0 %2741 }
 0x1f7   : > { %2687 = vst [vmem:[#allocation2 + $0x40] sm:$0xff] %v2670_v1  ;;  %v2639_v6 = vadd.f32 %v2623_v59, %v2591_v49  ;;  %v2589_v9 = vmax.f32 %v2573_v60, 0.0  ;;  %v2605_v10 = vmin.f32 %v2573_v60, 0.0  ;;  %v2590_v5 = vmax.f32 %v2574_v61, 0.0  ;;  %v2724_v20 = vld [vmem:[#allocation2 + $0x30] sm:$0xff] }
 0x1f8   : > { %2709 = vst.msk [vmem:[#allocation2 + $0x40] sm:$0xff] %vm2706_vm3, %v11863_v0  ;;  %v2671_v16 = vsel %vm2663_vm1, %v2634_v2, 0.0  ;;  %v2640_v19 = vadd.f32 %v2624_v3, %v2592_v52  ;;  %v2606_v17 = vmin.f32 %v2574_v61, 0.0  ;;  %v2593_v18 = vmax.f32 %v2577_v63, 0.0  ;;  %v12580_v2 = vld [vmem:[%s14244_s4 + $0x8] sm:$0xff]  ;;  %v12593_v3 = vld [vmem:[%s14244_s4 + $0x20] sm:$0xff] }
 0x1f9   : > { %2688 = vst.msk [vmem:[#allocation2 + $0x48] sm:$0xff] %vm2683_vm6, %v2671_v16  ;;  %v2676_v21 = vsel %vm2660_vm13, %v2639_v6, 0.0  ;;  %v2621_v22 = vmul.f32 0.2, %v2605_v10  ;;  %v2609_v24 = vmin.f32 %v2577_v63, 0.0  ;;  %v2594_v25 = vmax.f32 %v2578_v4, 0.0 }
 0x1fa   : > { %v12441_v26 = vld [vmem:[#allocation2 + $0x18] sm:$0xff]  ;;  %2710 = vst.msk [vmem:[#allocation2 + $0x48] sm:$0xff] %vm2683_vm6, %v11863_v0  ;;  %2693 = vst [vmem:[#allocation2 + $0x80] sm:$0xff] %v2676_v21  ;;  %v12447_v32 = vsel %vm2661_vm14, %v2640_v19, 0.0  ;;  %v2622_v33 = vmul.f32 0.2, %v2606_v17  ;;  %v11032_v35 = vpack.i.bf16 %v12391_v62, %v2720_v13  ;;  %v11047_v37 = vpack.i.bf16 %v12405_v30, %v2724_v20  ;;  %v2744_v61 = vpop.permute.xlu0 %2743 }
 0x1fb   : > { %v2610_v34 = vmin.f32 %v2578_v4, 0.0  ;;  %2705 = vst.msk [vmem:[#allocation2 + $0x80] sm:$0xff] %vm2701_vm2, %v11863_v0  ;;  %v2637_v58 = vadd.f32 %v2621_v22, %v2589_v9  ;;  %v2625_v36 = vmul.f32 0.2, %v2609_v24  ;;  %v12456_v40 = vpack.i.bf16 %v12441_v26, %v12391_v62  ;;  %v12614_v9 = vld [vmem:[%s14244_s4 + $0x38] sm:$0xff]  ;;  %v12623_v10 = vld [vmem:[%s14244_s4 + $0x50] sm:$0xff] }
 0x1fc   : > { %v2638_v38 = vadd.f32 %v2622_v33, %v2590_v5  ;;  %11033 = vrot.lane.b32.xlu1 %v11032_v35, %s11881_s11  ;;  %v10222_v41 = vpack.c.bf16 %v2724_v20, %v2720_v13  ;;  %11048 = vrot.lane.b32.xlu0 %v11047_v37, %s11881_s11  ;;  %v11822_v46 = vpack.c.bf16 %v12398_v12, %v12384_v51  ;;  %v2728_v31 = vld [vmem:[#allocation2 + $0x58] sm:$0xff]  ;;  %v11024_v5 = vpop.permute.xlu1 %11023  ;;  %vm5089_vm2 = vcmask 293888  }
 0x1fd   : > { %v2626_v39 = vmul.f32 0.2, %v2610_v34  ;;  %v2674_v42 = vsel %vm2662_vm15, %v2637_v58, 0.0  ;;  %v2641_v43 = vadd.f32 %v2625_v36, %v2593_v18  ;;  %v11825_v51 = vpack.c.bf16 %v2640_v19, %v12417_v44 }
 0x1fe   : > { %11823 = vmatprep.subr.msk.bf16.mxu0 %vm12464_vm9, %v11822_v46  ;;  %2691 = vst [vmem:[#allocation2 + $0x68] sm:$0xff] %v2674_v42  ;;  %v2675_v62 = vsel %vm2663_vm1, %v2638_v38, 0.0  ;;  %v12505_v52 = vpack.i.bf16 %v2724_v20, %v2720_v13  ;;  %v11062_v60 = vpack.i.bf16 %v12426_v54, %v2728_v31  ;;  %v11026_v22 = vunpack.i.h.bf16 %v11024_v5 }
 0x1ff   : > { %v2642_v47 = vadd.f32 %v2626_v39, %v2594_v25  ;;  %10223 = vmatpush1.bf16.msra.mxu0 %v10222_v41  ;;  %2711 = vst.msk [vmem:[#allocation2 + $0x68] sm:$0xff] %vm2706_vm3, %v11863_v0  ;;  %v2678_v48 = vsel %vm2662_vm15, %v2641_v43, 0.0  ;;  %v12479_v15 = vld [vmem:[#allocation2 + $0x40] sm:$0xff]  ;;  %v11025_v24 = vunpack.i.l.bf16 %v11024_v5 }
 0x200   : > { %2692 = vst.msk [vmem:[#allocation2 + $0x70] sm:$0xff] %vm2683_vm6, %v2675_v62  ;;  %11826 = vmatprep.subr.msk.bf16.mxu0 %vm12464_vm9, %v11825_v51  ;;  %2695 = vst [vmem:[#allocation2 + $0x90] sm:$0xff] %v2678_v48  ;;  %11038 = vrot.lane.b32.xlu1 %v12456_v40, %s11864_s21  ;;  %v12492_v49 = vpack.i.bf16 %v12479_v15, %v12405_v30  ;;  %v10228_v44 = vpack.c.bf16 %v12479_v15, %v12441_v26  ;;  %v12641_v13 = vpop.permute.xlu1 %11028  ;;  %v4173_v41 = vld [vmem:[#allocation2 + $0x20] sm:$0xff] }
 0x201   : > { %2712 = vst.msk [vmem:[#allocation2 + $0x70] sm:$0xff] %vm2683_vm6, %v11863_v0  ;;  %v2679_v12 = vsel %vm2663_vm1, %v2642_v47, 0.0  ;;  %v11157_v4 = vpack.i.bf16 %v12479_v15, %v12441_v26  ;;  %v4177_v42 = vld [vmem:[#allocation2 + $0x48] sm:$0xff]  ;;  %v11031_v48 = vunpack.i.h.bf16 %v12641_v13  ;;  %v11030_v15 = vunpack.i.l.bf16 %v12641_v13 }
 0x202   : > { %2713 = vst.msk [vmem:[#allocation2 + $0x90] sm:$0xff] %vm2706_vm3, %v11863_v0  ;;  %11053 = vrot.lane.b32.xlu0 %v12492_v49, %s11864_s21  ;;  %v2732_v50 = vld [vmem:[#allocation2 + $0x80] sm:$0xff]  ;;  %10229 = vmatprep.subr.bf16.mxu1 %v10228_v44  ;;  %v11267_v47 = vpack.i.bf16 %v4177_v42, %v4173_v41  ;;  %vm4242_vm1 = vcmask 760832   ;;  %vm5075_vm3 = vcmask 850944  }
 0x203   : > { %2696 = vst.msk [vmem:[#allocation2 + $0x98] sm:$0xff] %vm2683_vm6, %v2679_v12  ;;  %10231 = vmatpush3.bf16.msra.mxu1 %v10228_v44  ;;  %v10226_v30 = vpack.c.bf16 %v2732_v50, %v2728_v31  ;;  %v11072_v63 = vpack.i.bf16 %v12447_v32, %v2732_v50 }
 0x204   : > { %2714 = vst.msk [vmem:[#allocation2 + $0x98] sm:$0xff] %vm2683_vm6, %v11863_v0  ;;  %11043 = vrot.lane.b32.xlu1 %v12456_v40, %s11883_s20  ;;  %v12649_v16 = vpop.permute.xlu1 %3185  ;;  %vm5094_vm6 = vcmask 851488  }
 0x205   : > { %10227 = vmatpush1.bf16.msra.mxu0 %v10226_v30 }
 0x206   : > { %v2730_v55 = vld [vmem:[#allocation2 + $0x68] sm:$0xff] }
 0x207   : > { %v12508_v56 = vpack.i.bf16 %v2730_v55, %v12426_v54  ;;  %v12544_v54 = vpack.i.bf16 %v2732_v50, %v2728_v31 }
 0x208   : > { %11058 = vrot.lane.b32.xlu1 %v12505_v52, %s11864_s21  ;;  %9515 = vmatmul.mubr.msk.f32.vlgmr.msra.gmra.mrb[8].mxu0 %vm2747_vm12, %v12365_v23  ;;  %v2746_v23 = vpop.permute.xlu0 %2745  ;;  %v4181_v46 = vld [vmem:[#allocation2 + $0x70] sm:$0xff] }
 0x209   : > { %v2734_v57 = vld [vmem:[#allocation2 + $0x90] sm:$0xff]  ;;  %11068 = vrot.lane.b32.xlu0 %v12508_v56, %s11864_s21  ;;  %2826 = vmatprep.mubr.f32.mxu0 %v11863_v0 }
 0x20a   : > { %v10232_v59 = vpack.c.bf16 %v2734_v57, %v2730_v55  ;;  %v12547_v1 = vpack.i.bf16 %v2734_v57, %v12447_v32  ;;  %v11182_v6 = vpack.i.bf16 %v2734_v57, %v2730_v55 }
 0x20b   : > { %v4185_v62 = vld [vmem:[#allocation2 + $0x98] sm:$0xff] }
 0x20c   : > { %10233 = vmatprep.subr.bf16.mxu1 %v10232_v59  ;;  %11063 = vrot.lane.b32.xlu1 %v11062_v60, %s11881_s11  ;;  %v12653_v19 = vpop.permute.xlu0 %3187  ;;  %v11277_v30 = vpack.i.bf16 %v4185_v62, %v4181_v46  ;;  %v4978_v62 = vld [vmem:[%s14245_s5 + $0x8] sm:$0xff] }
 0x20d   : > { %10235 = vmatpush3.bf16.msra.mxu1 %v10232_v59  ;;  %11073 = vrot.lane.b32.xlu0 %v11072_v63, %s11881_s11 }
 0x20e   : > { %9516 = vmatmul.mubr.msk.f32.gmra.mrb[10].mxu0 %vm2747_vm12, %v2742_v53 }
 0x20f   : > { %2832 = vmatprep.mubr.f32.mxu0 %v11863_v0 }
 0x210   : > { %9878 = vmatmul.mubr.msk.f32.vlgmr.msra.gmra.mrb[8].mxu1 %vm2747_vm12, %v2742_v53  ;;  %11083 = vrot.lane.b32.xlu1 %v12505_v52, %s11883_s20 }
 0x211   : > { %9880 = vmatprep.mubr.msk.f32.mxu1 %vm2747_vm12, %v2744_v61  ;;  %11078 = vrot.lane.b32.xlu0 %v12492_v49, %s11883_s20 }
 0x212   : > { %9517 = vmatmul.mubr.msk.f32.gmra.mrb[12].mxu0 %vm2747_vm12, %v2744_v61 }
 0x213   : > { %2838 = vmatprep.mubr.f32.mxu0 %v11863_v0 }
 0x214   : > { %9881 = vmatmul.mubr.msk.f32.gmra.mrb[10].mxu1 %vm2747_vm12, %v2746_v23  ;;  %11088 = vrot.lane.b32.xlu1 %v12508_v56, %s11883_s20 }
 0x215   : > { %9891 = vmatprep.mubr.msk.f32.mxu1 %vm2747_vm12, %v12327_v7  ;;  %3189 = vrot.lane.b32.xlu0 %v12342_v8, %s11882_s24 }
 0x216   : > { %9518 = vmatmul.mubr.msk.f32.gmra.mrb[14].mxu0 %vm2747_vm12, %v2746_v23 }
 0x217   : > { %3075 = vmatprep.mubr.f32.mxu0 %v11863_v0 }
 0x218   : > { %3431 = vrot.lane.b32.xlu1 %v12327_v7, %s11884_s30 }
 0x219   : > { %3191 = vrot.lane.b32.xlu0 %v12350_v14, %s11882_s24 }
 0x21c   : > { %11093 = vrot.lane.b32.xlu1 %v12547_v1, %s11864_s21 }
 0x21d   : > { %11098 = vrot.lane.b32.xlu0 %v12544_v54, %s11864_s21 }
 0x220   : > { %11103 = vrot.lane.b32.xlu1 %v12456_v40, %s11868_s17 }
 0x221   : > { %3433 = vrot.lane.b32.xlu0 %v12334_v11, %s11884_s30 }
 0x224   : > { %11113 = vrot.lane.b32.xlu1 %v12505_v52, %s11868_s17 }
 0x225   : > { %11108 = vrot.lane.b32.xlu0 %v12492_v49, %s11868_s17 }
 0x228   : > { %11118 = vrot.lane.b32.xlu1 %v12508_v56, %s11868_s17 }
 0x229   : > { %3435 = vrot.lane.b32.xlu0 %v12342_v8, %s11884_s30 }
 0x22c   : > { %11128 = vrot.lane.b32.xlu1 %v12544_v54, %s11883_s20 }
 0x22d   : > { %11123 = vrot.lane.b32.xlu0 %v12547_v1, %s11883_s20 }
 0x230   : > { %11133 = vrot.lane.b32.xlu1 %v12456_v40, %s11870_s19 }
 0x231   : > { %3437 = vrot.lane.b32.xlu0 %v12350_v14, %s11884_s30 }
 0x234   : > { %11143 = vrot.lane.b32.xlu1 %v12505_v52, %s11870_s19 }
 0x235   : > { %11138 = vrot.lane.b32.xlu0 %v12492_v49, %s11870_s19 }
 0x238   : > { %3924 = vrot.lane.b32.xlu1 %v12580_v2, %s11880_s29 }
 0x239   : > { %11148 = vrot.lane.b32.xlu0 %v12508_v56, %s11870_s19 }
 0x23c   : > { %11163 = vrot.lane.b32.xlu1 %v12544_v54, %s11868_s17 }
 0x23d   : > { %11153 = vrot.lane.b32.xlu0 %v12547_v1, %s11868_s17 }
 0x240   : > { %3926 = vrot.lane.b32.xlu1 %v12593_v3, %s11880_s29 }
 0x241   : > { %11158 = vrot.lane.b32.xlu0 %v11157_v4, %s11881_s11 }
 0x244   : > { %11173 = vrot.lane.b32.xlu1 %v12492_v49, %s11885_s27 }
 0x245   : > { %11168 = vrot.lane.b32.xlu0 %v12456_v40, %s11885_s27 }
 0x248   : > { %11183 = vrot.lane.b32.xlu1 %v11182_v6, %s11881_s11 }
 0x249   : > { %11178 = vrot.lane.b32.xlu0 %v12505_v52, %s11885_s27 }
 0x24c   : > { %11188 = vrot.lane.b32.xlu1 %v12547_v1, %s11870_s19 }
 0x24d   : > { %11193 = vrot.lane.b32.xlu0 %v12544_v54, %s11870_s19 }
 0x250   : > { %11198 = vrot.lane.b32.xlu1 %v12508_v56, %s11885_s27 }
 0x251   : > { %3928 = vrot.lane.b32.xlu0 %v12614_v9, %s11880_s29 }
 0x254   : > { %4186 = vrot.lane.b32.xlu1 %v12580_v2, %s11882_s24 }
 0x255   : > { %3930 = vrot.lane.b32.xlu0 %v12623_v10, %s11880_s29 }
 0x258   : > { %11203 = vrot.lane.b32.xlu1 %v12456_v40, %s14264_s25 }
 0x259   : > { %4188 = vrot.lane.b32.xlu0 %v12593_v3, %s11882_s24 }
 0x25c   : > { %11218 = vrot.lane.b32.xlu1 %v12544_v54, %s11885_s27 }
 0x25d   : > { %11208 = vrot.lane.b32.xlu0 %v12547_v1, %s11885_s27 }
 0x260   : > { %11223 = vrot.lane.b32.xlu1 %v12505_v52, %s14264_s25 }
 0x261   : > { %11213 = vrot.lane.b32.xlu0 %v12492_v49, %s14264_s25 }
 0x264   : > { %11228 = vrot.lane.b32.xlu1 %v12508_v56, %s14264_s25 }
 0x265   : > { %4190 = vrot.lane.b32.xlu0 %v12614_v9, %s11882_s24 }
 0x268   : > { %4461 = vrot.lane.b32.xlu1 %v12580_v2, %s11884_s30 }
 0x269   : > { %4192 = vrot.lane.b32.xlu0 %v12623_v10, %s11882_s24 }
 0x26c   : > { %11238 = vrot.lane.b32.xlu1 %v12544_v54, %s14264_s25 }
 0x26d   : > { %11233 = vrot.lane.b32.xlu0 %v12547_v1, %s14264_s25 }
 0x26e   : > { %v12659_v17 = vpop.permute.xlu1 %11033  ;;  %v12663_v21 = vpop.permute.xlu0 %11048 }
 0x26f   : > { %v11036_v18 = vunpack.i.h.bf16 %v12659_v17  ;;  %v11035_v20 = vunpack.i.l.bf16 %v12659_v17  ;;  %v11051_v25 = vunpack.i.h.bf16 %v12663_v21  ;;  %v11050_v26 = vunpack.i.l.bf16 %v12663_v21 }
 0x270   : > { %11243 = vrot.lane.b32.xlu1 %v12456_v40, %s14262_s26 }
 0x271   : > { %4463 = vrot.lane.b32.xlu0 %v12593_v3, %s11884_s30  ;;  %v2979_v32 = vsel %vm2978_vm10, %v11025_v24, %v11035_v20  ;;  %v2982_v33 = vsel %vm2978_vm10, %v11026_v22, %v11050_v26  ;;  %v2980_v35 = vsel %vm2978_vm10, %v11035_v20, %v11036_v18  ;;  %v2983_v58 = vsel %vm2978_vm10, %v11050_v26, %v11051_v25 }
 0x272   : > { %v12673_v34 = vpop.permute.xlu1 %11038  ;;  %v10236_v36 = vpack.c.bf16 %v2983_v58, %v2980_v35  ;;  %v10238_v37 = vpack.c.bf16 %v2982_v33, %v2979_v32  ;;  %v4977_v35 = vld [vmem:[%s14245_s5] sm:$0xff] }
 0x273   : > { %v11040_v53 = vunpack.i.l.bf16 %v12673_v34 }
 0x274   : > { %11253 = vrot.lane.b32.xlu1 %v12505_v52, %s14262_s26  ;;  %v12685_v38 = vpop.permute.xlu0 %11053  ;;  %10237 = vmatprep.subr.bf16.mxu0 %v10236_v36  ;;  %v14260_v52 = vunpack.i.h.bf16 %v12673_v34 }
 0x275   : > { %11248 = vrot.lane.b32.xlu0 %v12492_v49, %s14262_s26  ;;  %10239 = vmatpush1.bf16.msra.mxu0 %v10238_v37  ;;  %v14259_v51 = vunpack.i.h.bf16 %v12685_v38  ;;  %v11055_v12 = vunpack.i.l.bf16 %v12685_v38 }
 0x276   : > { %v12687_v39 = vpop.permute.xlu1 %11043  ;;  %v3218_v13 = vsel %vm437_vm0, %v11040_v53, %v14260_v52 }
 0x278   : > { %11258 = vrot.lane.b32.xlu1 %v12508_v56, %s14262_s26 }
 0x279   : > { %4465 = vrot.lane.b32.xlu0 %v12614_v9, %s11884_s30 }
 0x27a   : > { %v11059_v40 = vpop.permute.xlu1 %11058 }
 0x27b   : > { %v12693_v43 = vpop.permute.xlu0 %11068  ;;  %v11061_v57 = vunpack.i.h.bf16 %v11059_v40  ;;  %v11060_v59 = vunpack.i.l.bf16 %v11059_v40 }
 0x27c   : > { %11273 = vrot.lane.b32.xlu1 %v12544_v54, %s14262_s26  ;;  %v14258_v37 = vunpack.i.h.bf16 %v12693_v43  ;;  %v11070_v40 = vunpack.i.l.bf16 %v12693_v43 }
 0x27d   : > { %11263 = vrot.lane.b32.xlu0 %v12547_v1, %s14262_s26  ;;  %v3220_v1 = vsel %vm437_vm0, %v11055_v12, %v14259_v51  ;;  %v3217_v20 = vsel %vm437_vm0, %v11060_v59, %v11040_v53  ;;  %v3219_v22 = vsel %vm437_vm0, %v11061_v57, %v11055_v12  ;;  %v11045_v12 = vunpack.i.l.bf16 %v12687_v39 }
 0x27e   : > { %v12703_v49 = vpop.permute.xlu1 %11063  ;;  %v10252_v24 = vpack.c.bf16 %v3220_v1, %v3218_v13  ;;  %v10254_v33 = vpack.c.bf16 %v3219_v22, %v3217_v20  ;;  %v3222_v57 = vsel %vm437_vm0, %v11070_v40, %v14258_v37 }
 0x27f   : > { %v11066_v44 = vunpack.i.h.bf16 %v12703_v49  ;;  %v11065_v31 = vunpack.i.l.bf16 %v12703_v49  ;;  %v12707_v50 = vpop.permute.xlu0 %11073  ;;  %v14269_v49 = vunpack.i.h.bf16 %v12685_v38 }
 0x280   : > { %v11076_v55 = vunpack.i.h.bf16 %v12707_v50  ;;  %v11075_v56 = vunpack.i.l.bf16 %v12707_v50  ;;  %4467 = vrot.lane.b32.xlu1 %v12623_v10, %s11884_s30 }
 0x281   : > { %v2985_v60 = vsel %vm2978_vm10, %v11030_v15, %v11065_v31  ;;  %11268 = vrot.lane.b32.xlu0 %v11267_v47, %s11885_s27  ;;  %v2986_v61 = vsel %vm2978_vm10, %v11065_v31, %v11066_v44  ;;  %v14256_v15 = vunpack.i.h.bf16 %v12687_v39 }
 0x282   : > { %v2988_v63 = vsel %vm2978_vm10, %v11031_v48, %v11075_v56  ;;  %v12721_v23 = vpop.permute.xlu1 %11083  ;;  %v2989_v54 = vsel %vm2978_vm10, %v11075_v56, %v11076_v55 }
 0x283   : > { %v12729_v4 = vpop.permute.xlu0 %11078  ;;  %v10240_v6 = vpack.c.bf16 %v2989_v54, %v2986_v61  ;;  %v10242_v5 = vpack.c.bf16 %v2988_v63, %v2985_v60  ;;  %v11086_v53 = vunpack.i.h.bf16 %v12721_v23  ;;  %v11085_v56 = vunpack.i.l.bf16 %v12721_v23 }
 0x284   : > { %11283 = vrot.lane.b32.xlu1 %v11267_v47, %s14264_s25  ;;  %v14255_v41 = vunpack.i.h.bf16 %v12729_v4  ;;  %v11080_v42 = vunpack.i.l.bf16 %v12729_v4 }
 0x285   : > { %11278 = vrot.lane.b32.xlu0 %v11277_v30, %s11885_s27  ;;  %10241 = vmatprep.subr.bf16.mxu0 %v10240_v6  ;;  %v3464_v13 = vsel %vm3463_vm11, %v11085_v56, %v11045_v12 }
 0x286   : > { %10243 = vmatpush1.bf16.msra.mxu0 %v10242_v5  ;;  %v12738_v26 = vpop.permute.xlu1 %11088  ;;  %v3467_v54 = vsel %vm3463_vm11, %v11080_v42, %v14255_v41  ;;  %v3465_v5 = vsel %vm3463_vm11, %v11045_v12, %v14256_v15  ;;  %v3466_v20 = vsel %vm3463_vm11, %v11086_v53, %v11080_v42 }
 0x287   : > { %v12740_v32 = vpop.permute.xlu0 %3189  ;;  %10253 = vmatprep.subr.bf16.mxu0 %v10252_v24  ;;  %v10268_v22 = vpack.c.bf16 %v3467_v54, %v3465_v5  ;;  %v11090_v42 = vunpack.i.l.bf16 %v12738_v26 }
 0x288   : > { %11293 = vrot.lane.b32.xlu1 %v11267_v47, %s14262_s26 }
 0x289   : > { %11288 = vrot.lane.b32.xlu0 %v11277_v30, %s14264_s25  ;;  %9523 = vmatmul.mubr.msk.f32.vlgmr.msra.gmra.mrb[8].mxu0 %vm2747_vm12, %v12327_v7  ;;  %v4979_v7 = vld [vmem:[%s14245_s5 + $0x10] sm:$0xff] }
 0x28a   : > { %10255 = vmatpush1.bf16.msra.mxu0 %v10254_v33  ;;  %v12749_v58 = vpop.permute.xlu1 %3431  ;;  %3081 = vmatprep.mubr.f32.mxu0 %v11863_v0 }
 0x28b   : > { %v12752_v36 = vpop.permute.xlu0 %3191 }
 0x28c   : > { %4983 = vperm.xlu1 %11021, %v4977_v35   ;;  %v10270_v35 = vpack.c.bf16 %v3466_v20, %v3464_v13 }
 0x28d   : > { %11298 = vrot.lane.b32.xlu0 %v11277_v30, %s14262_s26  ;;  %9524 = vmatmul.mubr.msk.f32.gmra.mrb[10].mxu0 %vm2747_vm12, %v12334_v11 }
 0x28e   : > { %v12764_v46 = vpop.permute.xlu1 %11093  ;;  %3087 = vmatprep.mubr.f32.mxu0 %v11863_v0 }
 0x28f   : > { %v14257_v47 = vunpack.i.h.bf16 %v12764_v46  ;;  %v11095_v11 = vunpack.i.l.bf16 %v12764_v46  ;;  %v11099_v48 = vpop.permute.xlu0 %11098 }
 0x290   : > { %v11101_v31 = vunpack.i.h.bf16 %v11099_v48  ;;  %v11100_v30 = vunpack.i.l.bf16 %v11099_v48  ;;  %4993 = vperm.xlu1 %11021, %v4979_v7  }
 0x291   : > { %4988 = vperm.xlu0 %11020, %v4978_v62   ;;  %9525 = vmatmul.mubr.msk.f32.gmra.mrb[12].mxu0 %vm2747_vm12, %v12342_v8  ;;  %v3224_v59 = vsel %vm437_vm0, %v11095_v11, %v14257_v47  ;;  %v4980_v8 = vld [vmem:[%s14245_s5 + $0x18] sm:$0xff] }
 0x292   : > { %v3223_v60 = vsel %vm437_vm0, %v11101_v31, %v11095_v11  ;;  %v3221_v61 = vsel %vm437_vm0, %v11100_v30, %v11070_v40  ;;  %v12786_v63 = vpop.permute.xlu1 %11103  ;;  %3093 = vmatprep.mubr.f32.mxu0 %v11863_v0  ;;  %v10256_v23 = vpack.c.bf16 %v3224_v59, %v3222_v57 }
 0x293   : > { %v12795_v1 = vpop.permute.xlu0 %3433  ;;  %v10258_v6 = vpack.c.bf16 %v3223_v60, %v3221_v61  ;;  %v14252_v53 = vunpack.i.h.bf16 %v12786_v63  ;;  %v11105_v56 = vunpack.i.l.bf16 %v12786_v63 }
 0x294   : > { %10257 = vmatprep.subr.bf16.mxu0 %v10256_v23 }
 0x295   : > { %4998 = vperm.xlu0 %11020, %v4980_v8   ;;  %9526 = vmatmul.mubr.msk.f32.gmra.mrb[14].mxu0 %vm2747_vm12, %v12350_v14  ;;  %v14254_v14 = vunpack.i.h.bf16 %v12738_v26 }
 0x296   : > { %10259 = vmatpush1.bf16.msra.mxu0 %v10258_v6  ;;  %v11114_v24 = vpop.permute.xlu1 %11113  ;;  %3309 = vmatprep.mubr.f32.mxu0 %v11863_v0 }
 0x297   : > { %v12805_v33 = vpop.permute.xlu0 %11108  ;;  %10269 = vmatprep.subr.bf16.mxu0 %v10268_v22  ;;  %v11116_v60 = vunpack.i.h.bf16 %v11114_v24  ;;  %v11115_v61 = vunpack.i.l.bf16 %v11114_v24  ;;  %v3469_v6 = vsel %vm3463_vm11, %v11090_v42, %v14254_v14 }
 0x298   : > { %v14251_v62 = vunpack.i.h.bf16 %v12805_v33  ;;  %v11110_v11 = vunpack.i.l.bf16 %v12805_v33 }
 0x299   : > { %9531 = vmatmul.mubr.msk.f32.vlgmr.msra.gmra.mrb[8].mxu0 %vm2747_vm12, %v12649_v16 }
 0x29a   : > { %10271 = vmatpush1.bf16.msra.mxu0 %v10270_v35  ;;  %v12809_v40 = vpop.permute.xlu1 %11118  ;;  %3315 = vmatprep.mubr.f32.mxu0 %v11863_v0  ;;  %v3709_v13 = vsel %vm1105_vm4, %v11110_v11, %v14251_v62  ;;  %v3707_v35 = vsel %vm1105_vm4, %v11105_v56, %v14252_v53 }
 0x29b   : > { %v12812_v7 = vpop.permute.xlu0 %3435 }
 0x29d   : > { %9532 = vmatmul.mubr.msk.f32.gmra.mrb[10].mxu0 %vm2747_vm12, %v12653_v19 }
 0x29e   : > { %v11129_v48 = vpop.permute.xlu1 %11128  ;;  %3321 = vmatprep.mubr.f32.mxu0 %v11863_v0 }
 0x29f   : > { %v11131_v12 = vunpack.i.h.bf16 %v11129_v48  ;;  %v11130_v31 = vunpack.i.l.bf16 %v11129_v48  ;;  %v12821_v30 = vpop.permute.xlu0 %11123  ;;  %v3706_v48 = vsel %vm1105_vm4, %v11115_v61, %v11105_v56  ;;  %v11120_v61 = vunpack.i.l.bf16 %v12809_v40 }
 0x2a0   : > { %v14253_v57 = vunpack.i.h.bf16 %v12821_v30  ;;  %v11125_v59 = vunpack.i.l.bf16 %v12821_v30 }
 0x2a1   : > { %v3468_v8 = vsel %vm3463_vm11, %v11130_v31, %v11090_v42  ;;  %9533 = vmatmul.mubr.msk.f32.gmra.mrb[12].mxu0 %vm2747_vm12, %v12740_v32  ;;  %v3708_v42 = vsel %vm1105_vm4, %v11116_v60, %v11110_v11  ;;  %v11121_v60 = vunpack.i.h.bf16 %v12809_v40 }
 0x2a2   : > { %v3470_v23 = vsel %vm3463_vm11, %v11131_v12, %v11125_v59  ;;  %v12831_v54 = vpop.permute.xlu1 %11133  ;;  %3327 = vmatprep.mubr.f32.mxu0 %v11863_v0  ;;  %v3471_v5 = vsel %vm3463_vm11, %v11125_v59, %v14253_v57  ;;  %v10284_v12 = vpack.c.bf16 %v3709_v13, %v3707_v35 }
 0x2a3   : > { %v12843_v20 = vpop.permute.xlu0 %3437  ;;  %v10272_v22 = vpack.c.bf16 %v3471_v5, %v3469_v6  ;;  %v10274_v24 = vpack.c.bf16 %v3470_v23, %v3468_v8  ;;  %v10286_v8 = vpack.c.bf16 %v3708_v42, %v3706_v48  ;;  %v11136_v35 = vunpack.i.h.bf16 %v12831_v54 }
 0x2a4   : > { %v11135_v48 = vunpack.i.l.bf16 %v12831_v54  ;;  %v3711_v14 = vsel %vm1105_vm4, %v11120_v61, %v11121_v60 }
 0x2a5   : > { %9534 = vmatmul.mubr.msk.f32.gmra.mrb[14].mxu0 %vm2747_vm12, %v12752_v36  ;;  %10273 = vmatprep.subr.bf16.mxu0 %v10272_v22 }
 0x2a6   : > { %10275 = vmatpush1.bf16.msra.mxu0 %v10274_v24  ;;  %v11144_v31 = vpop.permute.xlu1 %11143  ;;  %3556 = vmatprep.mubr.f32.mxu0 %v11863_v0  ;;  %v3957_v51 = vsel %vm1349_vm5, %v11135_v48, %v11136_v35 }
 0x2a7   : > { %v12853_v59 = vpop.permute.xlu0 %11138  ;;  %10285 = vmatprep.subr.bf16.mxu0 %v10284_v12  ;;  %v11145_v62 = vunpack.i.l.bf16 %v11144_v31 }
 0x2a8   : > { %v14261_v23 = vunpack.i.h.bf16 %v12853_v59  ;;  %v11140_v6 = vunpack.i.l.bf16 %v12853_v59 }
 0x2a9   : > { %9539 = vmatmul.mubr.msk.f32.vlgmr.msra.gmra.mrb[8].mxu0 %vm2747_vm12, %v12749_v58  ;;  %v3956_v52 = vsel %vm1349_vm5, %v11145_v62, %v11135_v48 }
 0x2aa   : > { %10287 = vmatpush1.bf16.msra.mxu0 %v10286_v8  ;;  %v12857_v56 = vpop.permute.xlu1 %3924  ;;  %3562 = vmatprep.mubr.f32.mxu0 %v11863_v0  ;;  %v11146_v8 = vunpack.i.h.bf16 %v11144_v31  ;;  %v3959_v31 = vsel %vm1349_vm5, %v11140_v6, %v14261_v23 }
 0x2ab   : > { %v12860_v11 = vpop.permute.xlu0 %11148 }
 0x2ac   : > { %v11151_v21 = vunpack.i.h.bf16 %v12860_v11 }
 0x2ad   : > { %9540 = vmatmul.mubr.msk.f32.gmra.mrb[10].mxu0 %vm2747_vm12, %v12795_v1 }
 0x2ae   : > { %v11164_v5 = vpop.permute.xlu1 %11163  ;;  %3568 = vmatprep.mubr.f32.mxu0 %v11863_v0 }
 0x2af   : > { %v11166_v13 = vunpack.i.h.bf16 %v11164_v5  ;;  %v11165_v22 = vunpack.i.l.bf16 %v11164_v5  ;;  %v12869_v24 = vpop.permute.xlu0 %11153 }
 0x2b0   : > { %v11156_v42 = vunpack.i.h.bf16 %v12869_v24  ;;  %v11155_v12 = vunpack.i.l.bf16 %v12869_v24 }
 0x2b1   : > { %v3710_v53 = vsel %vm1105_vm4, %v11165_v22, %v11120_v61  ;;  %9541 = vmatmul.mubr.msk.f32.gmra.mrb[12].mxu0 %vm2747_vm12, %v12812_v7  ;;  %v3958_v61 = vsel %vm1349_vm5, %v11146_v8, %v11140_v6 }
 0x2b2   : > { %v3712_v57 = vsel %vm1105_vm4, %v11166_v13, %v11155_v12  ;;  %v12879_v5 = vpop.permute.xlu1 %3926  ;;  %3574 = vmatprep.mubr.f32.mxu0 %v11863_v0  ;;  %v3713_v41 = vsel %vm1105_vm4, %v11155_v12, %v11156_v42  ;;  %v10300_v12 = vpack.c.bf16 %v3959_v31, %v3957_v51 }
 0x2b3   : > { %v11159_v22 = vpop.permute.xlu0 %11158  ;;  %v10288_v15 = vpack.c.bf16 %v3713_v41, %v3711_v14  ;;  %v10290_v47 = vpack.c.bf16 %v3712_v57, %v3710_v53  ;;  %v10302_v57 = vpack.c.bf16 %v3958_v61, %v3956_v52 }
 0x2b4   : > { %v11161_v13 = vunpack.i.h.bf16 %v11159_v22  ;;  %v11160_v37 = vunpack.i.l.bf16 %v11159_v22 }
 0x2b5   : > { %9542 = vmatmul.mubr.msk.f32.gmra.mrb[14].mxu0 %vm2747_vm12, %v12843_v20  ;;  %10289 = vmatprep.subr.bf16.mxu0 %v10288_v15 }
 0x2b6   : > { %10291 = vmatpush1.bf16.msra.mxu0 %v10290_v47  ;;  %v12898_v23 = vpop.permute.xlu1 %11173  ;;  %3802 = vmatprep.mubr.f32.mxu0 %v11863_v0  ;;  %v2981_v41 = vsel %vm2978_vm10, %v11036_v18, %v11160_v37  ;;  %v2984_v14 = vsel %vm2978_vm10, %v11051_v25, %v11161_v13  ;;  %v11150_v25 = vunpack.i.l.bf16 %v12860_v11 }
 0x2b7   : > { %v12907_v62 = vpop.permute.xlu0 %11168  ;;  %10301 = vmatprep.subr.bf16.mxu0 %v10300_v12  ;;  %v10244_v53 = vpack.c.bf16 %v2984_v14, %v2981_v41  ;;  %v11176_v37 = vunpack.i.h.bf16 %v12898_v23  ;;  %v11175_v52 = vunpack.i.l.bf16 %v12898_v23  ;;  %v14268_v41 = vunpack.i.h.bf16 %v12673_v34 }
 0x2b8   : > { %v11171_v15 = vunpack.i.h.bf16 %v12907_v62  ;;  %v11170_v6 = vunpack.i.l.bf16 %v12907_v62  ;;  %v3961_v50 = vsel %vm1349_vm5, %v11150_v25, %v11151_v21 }
 0x2b9   : > { %10245 = vmatprep.subr.bf16.mxu1 %v10244_v53  ;;  %9547 = vmatmul.mubr.msk.f32.vlgmr.msra.gmra.mrb[8].mxu0 %vm2747_vm12, %v12580_v2  ;;  %v10260_v14 = vpack.c.bf16 %v14269_v49, %v14268_v41 }
 0x2ba   : > { %10247 = vmatpush3.bf16.msra.mxu1 %v10244_v53  ;;  %10303 = vmatpush1.bf16.msra.mxu0 %v10302_v57  ;;  %v11184_v51 = vpop.permute.xlu1 %11183  ;;  %v4244_v38 = vsel %vm4242_vm1, %v11170_v6, %v11171_v15 }
 0x2bb   : > { %v11186_v47 = vunpack.i.h.bf16 %v11184_v51  ;;  %v11185_v17 = vunpack.i.l.bf16 %v11184_v51  ;;  %v11179_v18 = vpop.permute.xlu0 %11178  ;;  %3808 = vmatprep.mubr.f32.mxu0 %v11863_v0 }
 0x2bc   : > { %v11181_v57 = vunpack.i.h.bf16 %v11179_v18  ;;  %v11180_v51 = vunpack.i.l.bf16 %v11179_v18 }
 0x2bd   : > { %9548 = vmatmul.mubr.msk.f32.gmra.mrb[10].mxu0 %vm2747_vm12, %v12593_v3  ;;  %v2987_v48 = vsel %vm2978_vm10, %v11066_v44, %v11185_v17  ;;  %v2990_v8 = vsel %vm2978_vm10, %v11076_v55, %v11186_v47  ;;  %v4247_v55 = vsel %vm4242_vm1, %v11175_v52, %v11176_v37 }
 0x2be   : > { %v12926_v31 = vpop.permute.xlu1 %11188  ;;  %3814 = vmatprep.mubr.f32.mxu0 %v11863_v0  ;;  %v10248_v22 = vpack.c.bf16 %v2990_v8, %v2987_v48  ;;  %v4246_v49 = vsel %vm4242_vm1, %v11181_v57, %v11175_v52 }
 0x2bf   : > { %v11191_v13 = vunpack.i.h.bf16 %v12926_v31  ;;  %v11190_v61 = vunpack.i.l.bf16 %v12926_v31  ;;  %v11194_v12 = vpop.permute.xlu0 %11193 }
 0x2c0   : > { %v11196_v44 = vunpack.i.h.bf16 %v11194_v12  ;;  %v11195_v53 = vunpack.i.l.bf16 %v11194_v12  ;;  %10249 = vmatprep.subr.bf16.mxu1 %v10248_v22  ;;  %v11818_v12 = vld [vmem:[%s14244_s4 + $0x18] sm:$0xff] }
 0x2c1   : > { %9549 = vmatmul.mubr.msk.f32.gmra.mrb[12].mxu0 %vm2747_vm12, %v12614_v9  ;;  %10251 = vmatpush3.bf16.msra.mxu1 %v10248_v22  ;;  %v3963_v34 = vsel %vm1349_vm5, %v11190_v61, %v11191_v13 }
 0x2c2   : > { %v3962_v47 = vsel %vm1349_vm5, %v11196_v44, %v11190_v61  ;;  %v3960_v17 = vsel %vm1349_vm5, %v11195_v53, %v11150_v25  ;;  %v12951_v48 = vpop.permute.xlu1 %11198  ;;  %10261 = vmatprep.subr.bf16.mxu1 %v10260_v14  ;;  %3820 = vmatprep.mubr.f32.mxu0 %v11863_v0  ;;  %v10304_v18 = vpack.c.bf16 %v3963_v34, %v3961_v50  ;;  %v14270_v61 = vunpack.i.h.bf16 %v12693_v43  ;;  %v11819_v43 = vld [vmem:[%s14244_s4 + $0x30] sm:$0xff] }
 0x2c3   : > { %v12954_v8 = vpop.permute.xlu0 %3928  ;;  %v10306_v22 = vpack.c.bf16 %v3962_v47, %v3960_v17  ;;  %v14271_v25 = vunpack.i.h.bf16 %v12764_v46  ;;  %v4243_v44 = vsel %vm4242_vm1, %v11180_v51, %v11170_v6  ;;  %v10316_v53 = vpack.c.bf16 %v4247_v55, %v4244_v38  ;;  %v11820_v46 = vld [vmem:[%s14244_s4 + $0x48] sm:$0xff] }
 0x2c4   : > { %9892 = vmatmul.mubr.msk.f32.vlgmr.msra.gmra.mrb[8].mxu1 %vm2747_vm12, %v11818_v12  ;;  %10305 = vmatprep.subr.bf16.mxu0 %v10304_v18  ;;  %v10318_v52 = vpack.c.bf16 %v4246_v49, %v4243_v44  ;;  %v14272_v6 = vunpack.i.h.bf16 %v12687_v39  ;;  %v11201_v38 = vunpack.i.h.bf16 %v12951_v48  ;;  %v11200_v39 = vunpack.i.l.bf16 %v12951_v48 }
 0x2c5   : > { %v10264_v41 = vpack.c.bf16 %v14271_v25, %v14270_v61  ;;  %9550 = vmatmul.mubr.msk.f32.gmra.mrb[14].mxu0 %vm2747_vm12, %v12623_v10  ;;  %10263 = vmatpush3.bf16.msra.mxu1 %v10260_v14  ;;  %v14273_v14 = vunpack.i.h.bf16 %v12729_v4  ;;  %v14275_v4 = vunpack.i.h.bf16 %v12821_v30  ;;  %v14277_v30 = vunpack.i.h.bf16 %v12805_v33 }
 0x2c6   : > { %10307 = vmatpush1.bf16.msra.mxu0 %v10306_v22  ;;  %v12968_v50 = vpop.permute.xlu1 %4186  ;;  %9894 = vmatprep.mubr.msk.f32.mxu1 %vm2747_vm12, %v11819_v43 }
 0x2c7   : > { %10265 = vmatprep.subr.bf16.mxu1 %v10264_v41  ;;  %v12970_v34 = vpop.permute.xlu0 %3930  ;;  %10317 = vmatprep.subr.bf16.mxu0 %v10316_v53  ;;  %v10276_v55 = vpack.c.bf16 %v14273_v14, %v14272_v6 }
 0x2c8   : > { %4048 = vmatprep.mubr.f32.mxu0 %v11863_v0  ;;  %9895 = vmatmul.mubr.msk.f32.gmra.mrb[10].mxu1 %vm2747_vm12, %v11820_v46 }
 0x2c9   : > { %9555 = vmatmul.mubr.msk.f32.vlgmr.msra.gmra.mrb[8].mxu0 %vm2747_vm12, %v12857_v56  ;;  %10267 = vmatpush3.bf16.msra.mxu1 %v10264_v41  ;;  %v4250_v41 = vsel %vm4242_vm1, %v11200_v39, %v11201_v38 }
 0x2ca   : > { %9905 = vmatprep.mubr.msk.f32.mxu1 %vm2747_vm12, %v12649_v16  ;;  %10319 = vmatpush1.bf16.msra.mxu0 %v10318_v52  ;;  %v12989_v57 = vpop.permute.xlu1 %11203  ;;  %v14274_v16 = vunpack.i.h.bf16 %v12738_v26 }
 0x2cb   : > { %v12991_v51 = vpop.permute.xlu0 %4188  ;;  %10277 = vmatprep.subr.bf16.mxu1 %v10276_v55  ;;  %4054 = vmatprep.mubr.f32.mxu0 %v11863_v0  ;;  %v11206_v49 = vunpack.i.h.bf16 %v12989_v57 }
 0x2cc   : > { %9906 = vmatmul.mubr.msk.f32.vlgmr.msra.gmra.mrb[8].mxu1 %vm2747_vm12, %v12653_v19  ;;  %v10280_v47 = vpack.c.bf16 %v14275_v4, %v14274_v16 }
 0x2cd   : > { %9556 = vmatmul.mubr.msk.f32.gmra.mrb[10].mxu0 %vm2747_vm12, %v12879_v5  ;;  %9908 = vmatprep.mubr.msk.f32.mxu1 %vm2747_vm12, %v12740_v32  ;;  %v14276_v32 = vunpack.i.h.bf16 %v12786_v63 }
 0x2ce   : > { %10279 = vmatpush3.bf16.msra.mxu1 %v10276_v55  ;;  %v11219_v17 = vpop.permute.xlu1 %11218  ;;  %4060 = vmatprep.mubr.f32.mxu0 %v11863_v0 }
 0x2cf   : > { %v11221_v19 = vunpack.i.h.bf16 %v11219_v17  ;;  %v11220_v18 = vunpack.i.l.bf16 %v11219_v17  ;;  %v13007_v22 = vpop.permute.xlu0 %11208  ;;  %10281 = vmatprep.subr.bf16.mxu1 %v10280_v47  ;;  %v10292_v25 = vpack.c.bf16 %v14277_v30, %v14276_v32 }
 0x2d0   : > { %v11211_v12 = vunpack.i.h.bf16 %v13007_v22  ;;  %v11210_v61 = vunpack.i.l.bf16 %v13007_v22  ;;  %9909 = vmatmul.mubr.msk.f32.gmra.mrb[10].mxu1 %vm2747_vm12, %v12752_v36  ;;  %v11205_v36 = vunpack.i.l.bf16 %v12989_v57 }
 0x2d1   : > { %v4249_v26 = vsel %vm4242_vm1, %v11220_v18, %v11200_v39  ;;  %9557 = vmatmul.mubr.msk.f32.gmra.mrb[12].mxu0 %vm2747_vm12, %v12954_v8  ;;  %9919 = vmatprep.mubr.msk.f32.mxu1 %vm2747_vm12, %v12749_v58  ;;  %v10296_v39 = vpack.c.bf16 %v11156_v42, %v11121_v60  ;;  %v14278_v42 = vunpack.i.h.bf16 %v12853_v59 }
 0x2d2   : > { %v4252_v44 = vsel %vm4242_vm1, %v11221_v19, %v11210_v61  ;;  %10283 = vmatpush3.bf16.msra.mxu1 %v10280_v47  ;;  %v11224_v53 = vpop.permute.xlu1 %11223  ;;  %4066 = vmatprep.mubr.f32.mxu0 %v11863_v0  ;;  %v4253_v58 = vsel %vm4242_vm1, %v11210_v61, %v11211_v12 }
 0x2d3   : > { %v11226_v63 = vunpack.i.h.bf16 %v11224_v53  ;;  %v11225_v33 = vunpack.i.l.bf16 %v11224_v53  ;;  %v13032_v43 = vpop.permute.xlu0 %11213  ;;  %10293 = vmatprep.subr.bf16.mxu1 %v10292_v25  ;;  %v10320_v46 = vpack.c.bf16 %v4253_v58, %v4250_v41  ;;  %v10322_v52 = vpack.c.bf16 %v4252_v44, %v4249_v26 }
 0x2d4   : > { %v11216_v6 = vunpack.i.h.bf16 %v13032_v43  ;;  %v11215_v14 = vunpack.i.l.bf16 %v13032_v43  ;;  %v10308_v17 = vpack.c.bf16 %v14278_v42, %v11136_v35  ;;  %v4721_v43 = vld [vmem:[%s14244_s4 + $0x40] sm:$0xff] }
 0x2d5   : > { %v4501_v55 = vsel %vm1837_vm7, %v11225_v33, %v11205_v36  ;;  %9920 = vmatmul.mubr.msk.f32.vlgmr.msra.gmra.mrb[8].mxu1 %vm2747_vm12, %v12795_v1  ;;  %9558 = vmatmul.mubr.msk.f32.gmra.mrb[14].mxu0 %vm2747_vm12, %v12970_v34  ;;  %v4502_v1 = vsel %vm1837_vm7, %v11205_v36, %v11206_v49 }
 0x2d6   : > { %v4504_v16 = vsel %vm1837_vm7, %v11226_v63, %v11215_v14  ;;  %10321 = vmatprep.subr.bf16.mxu0 %v10320_v46  ;;  %9922 = vmatprep.mubr.msk.f32.mxu1 %vm2747_vm12, %v12812_v7  ;;  %v13048_v4 = vpop.permute.xlu1 %11228  ;;  %v4505_v47 = vsel %vm1837_vm7, %v11215_v14, %v11216_v6 }
 0x2d7   : > { %10295 = vmatpush3.bf16.msra.mxu1 %v10292_v25  ;;  %10323 = vmatpush1.bf16.msra.mxu0 %v10322_v52  ;;  %v13056_v40 = vpop.permute.xlu0 %4190  ;;  %v10332_v60 = vpack.c.bf16 %v4505_v47, %v4502_v1  ;;  %v10334_v24 = vpack.c.bf16 %v4504_v16, %v4501_v55  ;;  %v11230_v18 = vunpack.i.l.bf16 %v13048_v4 }
 0x2d8   : > { %10297 = vmatprep.subr.bf16.mxu1 %v10296_v39  ;;  %4339 = vmatprep.mubr.f32.mxu0 %v11863_v0 }
 0x2d9   : > { %9923 = vmatmul.mubr.msk.f32.gmra.mrb[10].mxu1 %vm2747_vm12, %v12843_v20  ;;  %10333 = vmatprep.subr.bf16.mxu0 %v10332_v60  ;;  %v11231_v20 = vunpack.i.h.bf16 %v13048_v4  ;;  %v4722_v4 = vld [vmem:[%s14244_s4 + $0x58] sm:$0xff] }
 0x2da   : > { %9563 = vmatmul.mubr.msk.f32.vlgmr.msra.gmra.mrb[8].mxu0 %vm2747_vm12, %v12968_v50  ;;  %v13063_v7 = vpop.permute.xlu1 %4461  ;;  %9933 = vmatprep.mubr.msk.f32.mxu1 %vm2747_vm12, %v12580_v2  ;;  %v10312_v2 = vpack.c.bf16 %v11191_v13, %v11151_v21 }
 0x2db   : > { %10299 = vmatpush3.bf16.msra.mxu1 %v10296_v39  ;;  %10335 = vmatpush1.bf16.msra.mxu0 %v10334_v24  ;;  %v13071_v19 = vpop.permute.xlu0 %4192 }
 0x2dc   : > { %10309 = vmatprep.subr.bf16.mxu1 %v10308_v17  ;;  %4345 = vmatprep.mubr.f32.mxu0 %v11863_v0 }
 0x2de   : > { %9934 = vmatmul.mubr.msk.f32.vlgmr.msra.gmra.mrb[8].mxu1 %vm2747_vm12, %v12593_v3  ;;  %9564 = vmatmul.mubr.msk.f32.gmra.mrb[10].mxu0 %vm2747_vm12, %v12991_v51  ;;  %v11239_v54 = vpop.permute.xlu1 %11238 }
 0x2df   : > { %10311 = vmatpush3.bf16.msra.mxu1 %v10308_v17  ;;  %v11241_v59 = vunpack.i.h.bf16 %v11239_v54  ;;  %v11240_v35 = vunpack.i.l.bf16 %v11239_v54  ;;  %v13084_v61 = vpop.permute.xlu0 %11233  ;;  %9936 = vmatprep.mubr.msk.f32.mxu1 %vm2747_vm12, %v12614_v9  ;;  %v4508_v9 = vsel %vm1837_vm7, %v11230_v18, %v11231_v20 }
 0x2e0   : > { %v11236_v26 = vunpack.i.h.bf16 %v13084_v61  ;;  %v11235_v3 = vunpack.i.l.bf16 %v13084_v61  ;;  %10313 = vmatprep.subr.bf16.mxu1 %v10312_v2  ;;  %4351 = vmatprep.mubr.f32.mxu0 %v11863_v0 }
 0x2e1   : > { %v4507_v11 = vsel %vm1837_vm7, %v11240_v35, %v11230_v18 }
 0x2e2   : > { %v4510_v31 = vsel %vm1837_vm7, %v11241_v59, %v11235_v3  ;;  %9937 = vmatmul.mubr.msk.f32.gmra.mrb[10].mxu1 %vm2747_vm12, %v12623_v10  ;;  %9565 = vmatmul.mubr.msk.f32.gmra.mrb[12].mxu0 %vm2747_vm12, %v13056_v40  ;;  %v13097_v21 = vpop.permute.xlu1 %11243  ;;  %v4511_v13 = vsel %vm1837_vm7, %v11235_v3, %v11236_v26 }
 0x2e3   : > { %10315 = vmatpush3.bf16.msra.mxu1 %v10312_v2  ;;  %9947 = vmatprep.mubr.msk.f32.mxu1 %vm2747_vm12, %v12857_v56  ;;  %v13107_v32 = vpop.permute.xlu0 %4463  ;;  %v10336_v10 = vpack.c.bf16 %v4511_v13, %v4508_v9  ;;  %v10338_v30 = vpack.c.bf16 %v4510_v31, %v4507_v11  ;;  %v11246_v25 = vunpack.i.h.bf16 %v13097_v21  ;;  %v11245_v41 = vunpack.i.l.bf16 %v13097_v21  ;;  %v13252_v21 = vld [vmem:[%s14246_s6 + $0x18] sm:$0xff] }
 0x2e4   : > { %4357 = vmatprep.mubr.f32.mxu0 %v11863_v0  ;;  %5125 = vrot.lane.b32.xlu0 %v13252_v21, %s11880_s29 }
 0x2e5   : > { %10337 = vmatprep.subr.bf16.mxu0 %v10336_v10  ;;  %v4756_v46 = vsel %vm2081_vm8, %v11245_v41, %v11246_v25 }
 0x2e6   : > { %9948 = vmatmul.mubr.msk.f32.vlgmr.msra.gmra.mrb[8].mxu1 %vm2747_vm12, %v12879_v5  ;;  %9566 = vmatmul.mubr.msk.f32.gmra.mrb[14].mxu0 %vm2747_vm12, %v13071_v19  ;;  %v11254_v36 = vpop.permute.xlu1 %11253 }
 0x2e7   : > { %9950 = vmatprep.mubr.msk.f32.mxu1 %vm2747_vm12, %v12954_v8  ;;  %10339 = vmatpush1.bf16.msra.mxu0 %v10338_v30  ;;  %v11256_v56 = vunpack.i.h.bf16 %v11254_v36  ;;  %v11255_v44 = vunpack.i.l.bf16 %v11254_v36  ;;  %v13118_v53 = vpop.permute.xlu0 %11248 }
 0x2e8   : > { %v11251_v58 = vunpack.i.h.bf16 %v13118_v53  ;;  %v11250_v63 = vunpack.i.l.bf16 %v13118_v53  ;;  %4597 = vmatprep.mubr.f32.mxu0 %v11863_v0  ;;  %v5107_v53 = vld [vmem:[#allocation3 + $0x20] sm:$0xff] }
 0x2e9   : > { %v4755_v5 = vsel %vm2081_vm8, %v11255_v44, %v11245_v41 }
 0x2ea   : > { %v4758_v33 = vsel %vm2081_vm8, %v11256_v56, %v11250_v63  ;;  %9951 = vmatmul.mubr.msk.f32.gmra.mrb[10].mxu1 %vm2747_vm12, %v12970_v34  ;;  %9571 = vmatmul.mubr.msk.f32.vlgmr.msra.gmra.mrb[8].mxu0 %vm2747_vm12, %v13063_v7  ;;  %v13129_v8 = vpop.permute.xlu1 %11258  ;;  %v4759_v52 = vsel %vm2081_vm8, %v11250_v63, %v11251_v58  ;;  %v4719_v63 = vld [vmem:[%s14244_s4 + $0x10] sm:$0xff] }
 0x2eb   : > { %9961 = vmatprep.mubr.msk.f32.mxu1 %vm2747_vm12, %v12968_v50  ;;  %v13139_v14 = vpop.permute.xlu0 %4465  ;;  %4603 = vmatprep.mubr.f32.mxu0 %v11863_v0  ;;  %v10348_v34 = vpack.c.bf16 %v4759_v52, %v4756_v46  ;;  %v10350_v55 = vpack.c.bf16 %v4758_v33, %v4755_v5  ;;  %v11261_v39 = vunpack.i.h.bf16 %v13129_v8  ;;  %v11260_v16 = vunpack.i.l.bf16 %v13129_v8  ;;  %v13267_v8 = vld [vmem:[%s14246_s6 + $0x48] sm:$0xff] }
 0x2ec   : > { %5129 = vrot.lane.b32.xlu0 %v13267_v8, %s11880_s29 }
 0x2ed   : > { %10349 = vmatprep.subr.bf16.mxu0 %v10348_v34  ;;  %v4762_v2 = vsel %vm2081_vm8, %v11260_v16, %v11261_v39 }
 0x2ee   : > { %9572 = vmatmul.mubr.msk.f32.gmra.mrb[10].mxu0 %vm2747_vm12, %v13107_v32  ;;  %v11274_v1 = vpop.permute.xlu1 %11273 }
 0x2ef   : > { %10351 = vmatpush1.bf16.msra.mxu0 %v10350_v55  ;;  %v11276_v47 = vunpack.i.h.bf16 %v11274_v1  ;;  %v11275_v60 = vunpack.i.l.bf16 %v11274_v1  ;;  %v13146_v24 = vpop.permute.xlu0 %11263  ;;  %4609 = vmatprep.mubr.f32.mxu0 %v11863_v0 }
 0x2f0   : > { %v11266_v50 = vunpack.i.h.bf16 %v13146_v24  ;;  %v11265_v42 = vunpack.i.l.bf16 %v13146_v24 }
 0x2f1   : > { %v4761_v17 = vsel %vm2081_vm8, %v11275_v60, %v11260_v16 }
 0x2f2   : > { %v4764_v18 = vsel %vm2081_vm8, %v11276_v47, %v11265_v42  ;;  %9573 = vmatmul.mubr.msk.f32.gmra.mrb[12].mxu0 %vm2747_vm12, %v13139_v14  ;;  %v13155_v54 = vpop.permute.xlu1 %4467  ;;  %v4765_v59 = vsel %vm2081_vm8, %v11265_v42, %v11266_v50 }
 0x2f3   : > { %v11269_v35 = vpop.permute.xlu0 %11268  ;;  %4615 = vmatprep.mubr.f32.mxu0 %v11863_v0  ;;  %v10352_v3 = vpack.c.bf16 %v4765_v59, %v4762_v2  ;;  %v10354_v11 = vpack.c.bf16 %v4764_v18, %v4761_v17 }
 0x2f4   : > { %v11271_v31 = vunpack.i.h.bf16 %v11269_v35  ;;  %v11270_v9 = vunpack.i.l.bf16 %v11269_v35 }
 0x2f5   : > { %10353 = vmatprep.subr.bf16.mxu0 %v10352_v3 }
 0x2f6   : > { %9574 = vmatmul.mubr.msk.f32.gmra.mrb[14].mxu0 %vm2747_vm12, %v13155_v54  ;;  %v11284_v13 = vpop.permute.xlu1 %11283  ;;  %v4245_v10 = vsel %vm4242_vm1, %v11171_v15, %v11270_v9  ;;  %v4248_v30 = vsel %vm4242_vm1, %v11176_v37, %v11271_v31 }
 0x2f7   : > { %10355 = vmatpush1.bf16.msra.mxu0 %v10354_v11  ;;  %v11286_v41 = vunpack.i.h.bf16 %v11284_v13  ;;  %v11285_v36 = vunpack.i.l.bf16 %v11284_v13  ;;  %v11279_v56 = vpop.permute.xlu0 %11278  ;;  %4855 = vmatprep.mubr.f32.mxu0 %v11863_v0  ;;  %v10324_v44 = vpack.c.bf16 %v4248_v30, %v4245_v10 }
 0x2f8   : > { %v11281_v5 = vunpack.i.h.bf16 %v11279_v56  ;;  %v11280_v33 = vunpack.i.l.bf16 %v11279_v56 }
 0x2f9   : > { %10325 = vmatprep.subr.bf16.mxu1 %v10324_v44  ;;  %v4503_v23 = vsel %vm1837_vm7, %v11206_v49, %v11285_v36  ;;  %v4506_v15 = vsel %vm1837_vm7, %v11216_v6, %v11286_v41  ;;  %v4720_v49 = vld [vmem:[%s14244_s4 + $0x28] sm:$0xff] }
 0x2fa   : > { %9579 = vmatmul.mubr.msk.f32.vlgmr.msra.gmra.mrb[8].mxu0 %vm2747_vm12, %v4719_v63  ;;  %10327 = vmatpush3.bf16.msra.mxu1 %v10324_v44  ;;  %v4251_v62 = vsel %vm4242_vm1, %v11201_v38, %v11280_v33  ;;  %v4254_v37 = vsel %vm4242_vm1, %v11211_v12, %v11281_v5  ;;  %v11294_v52 = vpop.permute.xlu1 %11293  ;;  %v10340_v38 = vpack.c.bf16 %v4506_v15, %v4503_v23 }
 0x2fb   : > { %v11289_v46 = vpop.permute.xlu0 %11288  ;;  %4861 = vmatprep.mubr.f32.mxu0 %v11863_v0  ;;  %v10328_v57 = vpack.c.bf16 %v4254_v37, %v4251_v62  ;;  %v11296_v22 = vunpack.i.h.bf16 %v11294_v52  ;;  %v11295_v12 = vunpack.i.l.bf16 %v11294_v52 }
 0x2fc   : > { %v11291_v48 = vunpack.i.h.bf16 %v11289_v46  ;;  %v11290_v34 = vunpack.i.l.bf16 %v11289_v46 }
 0x2fd   : > { %10329 = vmatprep.subr.bf16.mxu1 %v10328_v57 }
 0x2fe   : > { %9580 = vmatmul.mubr.msk.f32.gmra.mrb[10].mxu0 %vm2747_vm12, %v4720_v49  ;;  %10331 = vmatpush3.bf16.msra.mxu1 %v10328_v57  ;;  %v4509_v6 = vsel %vm1837_vm7, %v11231_v20, %v11290_v34  ;;  %v4512_v55 = vsel %vm1837_vm7, %v11236_v26, %v11291_v48  ;;  %v4757_v20 = vsel %vm2081_vm8, %v11246_v25, %v11295_v12  ;;  %v5103_v25 = vld [vmem:[#allocation3] sm:$0xff] }
 0x2ff   : > { %10341 = vmatprep.subr.bf16.mxu1 %v10340_v38  ;;  %4867 = vmatprep.mubr.f32.mxu0 %v11863_v0  ;;  %v11299_v16 = vpop.permute.xlu0 %11298  ;;  %v10344_v1 = vpack.c.bf16 %v4512_v55, %v4509_v6 }
 0x300   : > { %v11301_v47 = vunpack.i.h.bf16 %v11299_v16  ;;  %v11300_v60 = vunpack.i.l.bf16 %v11299_v16 }
 0x301   : > { %9962 = vmatmul.mubr.msk.f32.vlgmr.msra.gmra.mrb[8].mxu1 %vm2747_vm12, %v12991_v51  ;;  %v4760_v51 = vsel %vm2081_vm8, %v11251_v58, %v11296_v22  ;;  %v11302_v58 = vpack.i.bf16 %v5107_v53, %v5103_v25 }
 0x302   : > { %9581 = vmatmul.mubr.msk.f32.gmra.mrb[12].mxu0 %vm2747_vm12, %v4721_v43  ;;  %9964 = vmatprep.mubr.msk.f32.mxu1 %vm2747_vm12, %v13056_v40  ;;  %v10356_v40 = vpack.c.bf16 %v4760_v51, %v4757_v20  ;;  %v4763_v61 = vsel %vm2081_vm8, %v11261_v39, %v11300_v60  ;;  %v4766_v26 = vsel %vm2081_vm8, %v11266_v50, %v11301_v47 }
 0x303   : > { %10343 = vmatpush3.bf16.msra.mxu1 %v10340_v38  ;;  %4873 = vmatprep.mubr.f32.mxu0 %v11863_v0 }
 0x304   : > { %10345 = vmatprep.subr.bf16.mxu1 %v10344_v1 }
 0x305   : > { %9965 = vmatmul.mubr.msk.f32.gmra.mrb[10].mxu1 %vm2747_vm12, %v13071_v19  ;;  %v10360_v19 = vpack.c.bf16 %v4766_v26, %v4763_v61 }
 0x306   : > { %9582 = vmatmul.mubr.msk.f32.gmra.mrb[14].mxu0 %vm2747_vm12, %v4722_v4  ;;  %9975 = vmatprep.mubr.msk.f32.mxu1 %vm2747_vm12, %v13063_v7  ;;  %v13245_v7 = vld [vmem:[%s14246_s6] sm:$0xff] }
 0x307   : > { %10347 = vmatpush3.bf16.msra.mxu1 %v10344_v1  ;;  %7497 = vmatprep.mubr.f32.mxu0 %v11863_v0 }
 0x308   : > { %10357 = vmatprep.subr.bf16.mxu1 %v10356_v40  ;;  %5123 = vrot.lane.b32.xlu1 %v13245_v7, %s11880_s29 }
 0x30a   : > { %9976 = vmatmul.mubr.msk.f32.vlgmr.msra.gmra.mrb[8].mxu1 %vm2747_vm12, %v13107_v32  ;;  %v13259_v32 = vld [vmem:[%s14246_s6 + $0x30] sm:$0xff] }
 0x30b   : > { %9978 = vmatprep.mubr.msk.f32.mxu1 %vm2747_vm12, %v13139_v14  ;;  %10359 = vmatpush3.bf16.msra.mxu1 %v10356_v40  ;;  %v13271_v14 = vpop.permute.xlu1 %4983 }
 0x30c   : > { %10361 = vmatprep.subr.bf16.mxu1 %v10360_v19  ;;  %5127 = vrot.lane.b32.xlu1 %v13259_v32, %s11880_s29 }
 0x30e   : > { %9979 = vmatmul.mubr.msk.f32.gmra.mrb[10].mxu1 %vm2747_vm12, %v13155_v54 }
 0x30f   : > { %10363 = vmatpush3.bf16.msra.mxu1 %v10360_v19  ;;  %9989 = vmatprep.mubr.msk.f32.mxu1 %vm2747_vm12, %v4719_v63  ;;  %v13279_v41 = vpop.permute.xlu1 %4993 }
 0x310   : > { %11303 = vrot.lane.b32.xlu1 %v11302_v58, %s11881_s11  ;;  %v13275_v18 = vpop.permute.xlu0 %4988 }
 0x312   : > { %9990 = vmatmul.mubr.msk.f32.vlgmr.msra.gmra.mrb[8].mxu1 %vm2747_vm12, %v4720_v49 }
 0x313   : > { %9992 = vmatprep.mubr.msk.f32.mxu1 %vm2747_vm12, %v4721_v43 }
 0x314   : > { %v4999_v48 = vpop.permute.xlu0 %4998 }
 0x316   : > { %9993 = vmatmul.mubr.msk.f32.gmra.mrb[10].mxu1 %vm2747_vm12, %v4722_v4 }
 0x317   : > { %5203 = vmatprep.mubr.f32.mxu1 %v11863_v0 }
 0x3cd   : > { %v4857_v39 = vpop.f32.mrb[8].mxu0 }
 0x3ce   : > { %v5001_v24 = vadd.f32 %v13271_v14, %v4857_v39  ;;  %v4859_v50 = vpop.f32.mrb[9].mxu0 }
 0x3cf   : > { %v5002_v42 = vadd.f32 %v13271_v14, %v4859_v50 }
 0x3d0   : > { %v5025_v17 = vmin.f32 %v5001_v24, 0.0  ;;  %v5013_v59 = vmax.f32 %v5001_v24, 0.0 }
 0x3d1   : > { %v5026_v54 = vmin.f32 %v5002_v42, 0.0  ;;  %v4863_v2 = vpop.f32.mrb[10].mxu0  ;;  %v5014_v31 = vmax.f32 %v5002_v42, 0.0 }
 0x3d2   : > { %v5037_v35 = vmul.f32 0.2, %v5025_v17  ;;  %v5004_v3 = vadd.f32 %v13275_v18, %v4863_v2  ;;  %v4865_v11 = vpop.f32.mrb[11].mxu0 }
 0x3d3   : > { %v5038_v9 = vmul.f32 0.2, %v5026_v54  ;;  %v5005_v13 = vadd.f32 %v13275_v18, %v4865_v11 }
 0x3d4   : > { %v5049_v10 = vadd.f32 %v5037_v35, %v5013_v59  ;;  %v5028_v30 = vmin.f32 %v5004_v3, 0.0  ;;  %v5016_v5 = vmax.f32 %v5004_v3, 0.0 }
 0x3d5   : > { %v5050_v36 = vadd.f32 %v5038_v9, %v5014_v31  ;;  %v5029_v56 = vmin.f32 %v5005_v13, 0.0  ;;  %v4869_v44 = vpop.f32.mrb[12].mxu0  ;;  %v5017_v15 = vmax.f32 %v5005_v13, 0.0 }
 0x3d6   : > { %v5061_v63 = vsel %vm2660_vm13, %v5049_v10, 0.0  ;;  %v5040_v33 = vmul.f32 0.2, %v5028_v30  ;;  %v5007_v23 = vadd.f32 %v13279_v41, %v4869_v44  ;;  %v4871_v62 = vpop.f32.mrb[13].mxu0  ;;  %v5115_v44 = vld [vmem:[#allocation3 + $0x60] sm:$0xff] }
 0x3d7   : > { %5073 = vst [vmem:[#allocation3 + $0x8] sm:$0xff] %v5061_v63  ;;  %v13286_v37 = vsel %vm2661_vm14, %v5050_v36, 0.0  ;;  %v5041_v46 = vmul.f32 0.2, %v5029_v56  ;;  %v5008_v57 = vadd.f32 %v13279_v41, %v4871_v62  ;;  %v5111_v56 = vld [vmem:[#allocation3 + $0x40] sm:$0xff] }
 0x3d8   : > { %5090 = vst.msk [vmem:[#allocation3 + $0x8] sm:$0xff] %vm5089_vm2, %v11863_v0  ;;  %v5052_v49 = vadd.f32 %v5040_v33, %v5016_v5  ;;  %v5031_v52 = vmin.f32 %v5007_v23, 0.0  ;;  %v5019_v43 = vmax.f32 %v5007_v23, 0.0 }
 0x3d9   : > { %v5053_v34 = vadd.f32 %v5041_v46, %v5017_v15  ;;  %v5032_v38 = vmin.f32 %v5008_v57, 0.0  ;;  %v4875_v22 = vpop.f32.mrb[14].mxu0  ;;  %v5020_v47 = vmax.f32 %v5008_v57, 0.0 }
 0x3da   : > { %v5064_v12 = vsel %vm2660_vm13, %v5052_v49, 0.0  ;;  %v5043_v6 = vmul.f32 0.2, %v5031_v52  ;;  %v5010_v55 = vadd.f32 %v4999_v48, %v4875_v22  ;;  %v4877_v16 = vpop.f32.mrb[15].mxu0  ;;  %v11327_v49 = vpack.i.bf16 %v5115_v44, %v5111_v56 }
 0x3db   : > { %5077 = vst [vmem:[#allocation3 + $0x28] sm:$0xff] %v5064_v12  ;;  %v13295_v1 = vsel %vm2661_vm14, %v5053_v34, 0.0  ;;  %v5044_v60 = vmul.f32 0.2, %v5032_v38  ;;  %v5011_v4 = vadd.f32 %v4999_v48, %v4877_v16  ;;  %v11828_v53 = vpack.c.bf16 %v5053_v34, %v5050_v36 }
 0x3dc   : > { %5091 = vst.msk [vmem:[#allocation3 + $0x28] sm:$0xff] %vm5089_vm2, %v11863_v0  ;;  %v5055_v20 = vadd.f32 %v5043_v6, %v5019_v43  ;;  %v5034_v51 = vmin.f32 %v5010_v55, 0.0  ;;  %v5022_v19 = vmax.f32 %v5010_v55, 0.0 }
 0x3dd   : > { %v5056_v40 = vadd.f32 %v5044_v60, %v5020_v47  ;;  %v5035_v61 = vmin.f32 %v5011_v4, 0.0  ;;  %11829 = vmatprep.subr.msk.bf16.mxu1 %vm12464_vm9, %v11828_v53  ;;  %v5023_v39 = vmax.f32 %v5011_v4, 0.0  ;;  %v5126_v53 = vpop.permute.xlu0 %5125 }
 0x3de   : > { %v5067_v26 = vsel %vm2660_vm13, %v5055_v20, 0.0  ;;  %v5046_v25 = vmul.f32 0.2, %v5034_v51 }
 0x3df   : > { %5080 = vst [vmem:[#allocation3 + $0x48] sm:$0xff] %v5067_v26  ;;  %v13305_v58 = vsel %vm2661_vm14, %v5056_v40, 0.0  ;;  %v5047_v24 = vmul.f32 0.2, %v5035_v61  ;;  %v5104_v50 = vld [vmem:[#allocation3 + $0x8] sm:$0xff]  ;;  %v5124_v26 = vpop.permute.xlu1 %5123 }
 0x3e0   : > { %5092 = vst.msk [vmem:[#allocation3 + $0x48] sm:$0xff] %vm5089_vm2, %v11863_v0  ;;  %v5058_v42 = vadd.f32 %v5046_v25, %v5022_v19  ;;  %v11307_v17 = vpack.i.bf16 %v13286_v37, %v5104_v50 }
 0x3e1   : > { %v5059_v54 = vadd.f32 %v5047_v24, %v5023_v39 }
 0x3e2   : > { %v5070_v2 = vsel %vm2660_vm13, %v5058_v42, 0.0  ;;  %11308 = vrot.lane.b32.xlu1 %v11307_v17, %s11881_s11 }
 0x3e3   : > { %5083 = vst [vmem:[#allocation3 + $0x68] sm:$0xff] %v5070_v2  ;;  %v13315_v59 = vsel %vm2661_vm14, %v5059_v54, 0.0  ;;  %v5108_v35 = vld [vmem:[#allocation3 + $0x28] sm:$0xff]  ;;  %v11831_v63 = vpack.c.bf16 %v5059_v54, %v5056_v40  ;;  %v5128_v42 = vpop.permute.xlu1 %5127 }
 0x3e4   : > { %5093 = vst.msk [vmem:[#allocation3 + $0x68] sm:$0xff] %vm5089_vm2, %v11863_v0  ;;  %v11312_v3 = vpack.i.bf16 %v13295_v1, %v5108_v35  ;;  %v10366_v11 = vpack.c.bf16 %v5108_v35, %v5104_v50  ;;  %v13320_v9 = vpack.i.bf16 %v5108_v35, %v5104_v50  ;;  %vm7401_vm2 = vcmask 146432  }
 0x3e5   : > { %v9991_v31 = vpop.f32.mrb[8].mxu1 }
 0x3e6   : > { %v5006_v13 = vadd.f32 %v9991_v31, %v13275_v18  ;;  %v4946_v10 = vpop.f32.mrb[9].mxu1  ;;  %11313 = vrot.lane.b32.xlu0 %v11312_v3, %s11881_s11  ;;  %10367 = vmatpush1.bf16.msra.mxu1 %v10366_v11  ;;  %v5130_v11 = vpop.permute.xlu0 %5129 }
 0x3e7   : > { %v5003_v30 = vadd.f32 %v13271_v14, %v4946_v10  ;;  %v5112_v36 = vld [vmem:[#allocation3 + $0x48] sm:$0xff]  ;;  %11832 = vmatprep.subr.msk.bf16.mxu1 %vm12464_vm9, %v11831_v63 }
 0x3e8   : > { %v5030_v5 = vmin.f32 %v5006_v13, 0.0  ;;  %v11317_v33 = vpack.i.bf16 %v13305_v58, %v5112_v36  ;;  %v5018_v15 = vmax.f32 %v5006_v13, 0.0 }
 0x3e9   : > { %v5027_v23 = vmin.f32 %v5003_v30, 0.0  ;;  %v9994_v62 = vpop.f32.mrb[10].mxu1  ;;  %v5015_v14 = vmax.f32 %v5003_v30, 0.0  ;;  %v13469_v30 = vld [vmem:[%s14246_s6 + $0x50] sm:$0xff] }
 0x3ea   : > { %v5042_v18 = vmul.f32 0.2, %v5030_v5  ;;  %v5012_v46 = vadd.f32 %v9994_v62, %v4999_v48  ;;  %v4956_v57 = vpop.f32.mrb[11].mxu1  ;;  %11318 = vrot.lane.b32.xlu0 %v11317_v33, %s11881_s11 }
 0x3eb   : > { %v5039_v52 = vmul.f32 0.2, %v5027_v23  ;;  %v5009_v34 = vadd.f32 %v13279_v41, %v4956_v57  ;;  %v5116_v38 = vld [vmem:[#allocation3 + $0x68] sm:$0xff] }
 0x3ec   : > { %v5054_v22 = vadd.f32 %v5042_v18, %v5018_v15  ;;  %v5036_v12 = vmin.f32 %v5012_v46, 0.0  ;;  %v11322_v43 = vpack.i.bf16 %v13315_v59, %v5116_v38  ;;  %v5024_v55 = vmax.f32 %v5012_v46, 0.0 }
 0x3ed   : > { %v5051_v6 = vadd.f32 %v5039_v52, %v5015_v14  ;;  %v5033_v16 = vmin.f32 %v5009_v34, 0.0  ;;  %v5021_v60 = vmax.f32 %v5009_v34, 0.0  ;;  %v13335_v41 = vpack.i.bf16 %v5116_v38, %v5112_v36 }
 0x3ee   : > { %v5066_v48 = vsel %vm2662_vm15, %v5054_v22, 0.0  ;;  %v5048_v47 = vmul.f32 0.2, %v5036_v12  ;;  %11328 = vrot.lane.b32.xlu0 %v11327_v49, %s11881_s11  ;;  %11323 = vrot.lane.b32.xlu1 %v11322_v43, %s11881_s11  ;;  %v10370_v51 = vpack.c.bf16 %v5116_v38, %v5112_v36  ;;  %v11304_v36 = vpop.permute.xlu1 %11303 }
 0x3ef   : > { %5079 = vst.msk [vmem:[#allocation3 + $0x38] sm:$0xff] %vm5075_vm3, %v5066_v48  ;;  %v5063_v4 = vsel %vm2662_vm15, %v5051_v6, 0.0  ;;  %v5045_v20 = vmul.f32 0.2, %v5033_v16  ;;  %v11305_v44 = vunpack.i.l.bf16 %v11304_v36  ;;  %v11306_v5 = vunpack.i.h.bf16 %v11304_v36 }
 0x3f0   : > { %5096 = vst.msk [vmem:[#allocation3 + $0x38] sm:$0xff] %vm5094_vm6, %v11863_v0  ;;  %v5060_v40 = vadd.f32 %v5048_v47, %v5024_v55  ;;  %10371 = vmatpush1.bf16.msra.mxu1 %v10370_v51 }
 0x3f1   : > { %5076 = vst.msk [vmem:[#allocation3 + $0x18] sm:$0xff] %vm5075_vm3, %v5063_v4  ;;  %v5057_v61 = vadd.f32 %v5045_v20, %v5021_v60 }
 0x3f2   : > { %5095 = vst.msk [vmem:[#allocation3 + $0x18] sm:$0xff] %vm5094_vm6, %v11863_v0  ;;  %v5072_v19 = vsel %vm2662_vm15, %v5060_v40, 0.0 }
 0x3f3   : > { %5085 = vst.msk [vmem:[#allocation3 + $0x78] sm:$0xff] %vm5075_vm3, %v5072_v19  ;;  %v5069_v25 = vsel %vm2662_vm15, %v5057_v61, 0.0  ;;  %9587 = vmatmul.mubr.msk.f32.vlgmr.msra.gmra.mrb[12].mxu1 %vm2747_vm12, %v5124_v26 }
 0x3f4   : > { %5098 = vst.msk [vmem:[#allocation3 + $0x78] sm:$0xff] %vm5094_vm6, %v11863_v0  ;;  %5209 = vmatprep.mubr.f32.mxu1 %v11863_v0 }
 0x3f5   : > { %5082 = vst.msk [vmem:[#allocation3 + $0x58] sm:$0xff] %vm5075_vm3, %v5069_v25  ;;  %vm7387_vm3 = vcmask 556032  }
 0x3f6   : > { %5097 = vst.msk [vmem:[#allocation3 + $0x58] sm:$0xff] %vm5094_vm6, %v11863_v0  ;;  %vm7406_vm6 = vcmask 556432  }
 0x3f7   : > { %v5110_v39 = vld [vmem:[#allocation3 + $0x38] sm:$0xff]  ;;  %9588 = vmatmul.mubr.msk.f32.gmra.mrb[14].mxu1 %vm2747_vm12, %v5126_v53 }
 0x3f8   : > { %5215 = vmatprep.mubr.f32.mxu1 %v11863_v0  ;;  %v13370_v13 = vpack.i.bf16 %v5110_v39, %v13295_v1  ;;  %v13446_v1 = vld [vmem:[%s14246_s6 + $0x8] sm:$0xff] }
 0x3f9   : > { %v5106_v24 = vld [vmem:[#allocation3 + $0x18] sm:$0xff] }
 0x3fa   : > { %v11332_v50 = vpack.i.bf16 %v5110_v39, %v5106_v24  ;;  %v10372_v17 = vpack.c.bf16 %v5110_v39, %v5106_v24  ;;  %v13362_v3 = vpack.i.bf16 %v5106_v24, %v13286_v37 }
 0x3fb   : > { %v5118_v54 = vld [vmem:[#allocation3 + $0x78] sm:$0xff]  ;;  %9589 = vmatmul.mubr.msk.f32.gmra.mrb[16].mxu1 %vm2747_vm12, %v5128_v42 }
 0x3fc   : > { %11333 = vrot.lane.b32.xlu1 %v11332_v50, %s11881_s11  ;;  %10373 = vmatprep.subr.bf16.mxu1 %v10372_v17  ;;  %v13382_v10 = vpack.i.bf16 %v5118_v54, %v13315_v59  ;;  %v13460_v59 = vld [vmem:[%s14246_s6 + $0x38] sm:$0xff] }
 0x3fd   : > { %v5114_v2 = vld [vmem:[#allocation3 + $0x58] sm:$0xff]  ;;  %10375 = vmatpush3.bf16.msra.mxu1 %v10372_v17  ;;  %5221 = vmatprep.mubr.f32.mxu1 %v11863_v0 }
 0x3fe   : > { %v11337_v35 = vpack.i.bf16 %v5118_v54, %v5114_v2  ;;  %v10376_v31 = vpack.c.bf16 %v5118_v54, %v5114_v2  ;;  %v13379_v37 = vpack.i.bf16 %v5114_v2, %v13305_v58  ;;  %v13455_v58 = vld [vmem:[%s14246_s6 + $0x20] sm:$0xff] }
 0x3ff   : > { %9590 = vmatmul.mubr.msk.f32.gmra.mrb[18].mxu1 %vm2747_vm12, %v5130_v11 }
 0x400   : > { %11338 = vrot.lane.b32.xlu0 %v11337_v35, %s11881_s11  ;;  %11343 = vrot.lane.b32.xlu1 %v13362_v3, %s11864_s21 }
 0x401   : > { %10377 = vmatprep.subr.bf16.mxu1 %v10376_v31  ;;  %10003 = vmatprep.mubr.msk.f32.mxu1 %vm2747_vm12, %v5124_v26 }
 0x402   : > { %10379 = vmatpush3.bf16.msra.mxu1 %v10376_v31 }
 0x404   : > { %11348 = vrot.lane.b32.xlu0 %v13370_v13, %s11864_s21  ;;  %11353 = vrot.lane.b32.xlu1 %v13320_v9, %s11864_s21 }
 0x405   : > { %10004 = vmatmul.mubr.msk.f32.vlgmr.msra.gmra.mrb[20].mxu1 %vm2747_vm12, %v5126_v53 }
 0x406   : > { %10006 = vmatprep.mubr.msk.f32.mxu1 %vm2747_vm12, %v5128_v42 }
 0x408   : > { %11358 = vrot.lane.b32.xlu0 %v13379_v37, %s11864_s21  ;;  %11363 = vrot.lane.b32.xlu1 %v13382_v10, %s11864_s21 }
 0x409   : > { %10007 = vmatmul.mubr.msk.f32.gmra.mrb[22].mxu1 %vm2747_vm12, %v5130_v11 }
 0x40a   : > { %5457 = vmatprep.mubr.f32.mxu1 %v11863_v0 }
 0x40c   : > { %11368 = vrot.lane.b32.xlu0 %v13335_v41, %s11864_s21  ;;  %5567 = vrot.lane.b32.xlu1 %v13245_v7, %s11882_s24 }
 0x410   : > { %5569 = vrot.lane.b32.xlu0 %v13252_v21, %s11882_s24  ;;  %5571 = vrot.lane.b32.xlu1 %v13259_v32, %s11882_s24 }
 0x414   : > { %5573 = vrot.lane.b32.xlu0 %v13267_v8, %s11882_s24  ;;  %11373 = vrot.lane.b32.xlu1 %v13362_v3, %s11883_s20 }
 0x418   : > { %11378 = vrot.lane.b32.xlu0 %v13370_v13, %s11883_s20  ;;  %11383 = vrot.lane.b32.xlu1 %v13320_v9, %s11883_s20 }
 0x41c   : > { %11388 = vrot.lane.b32.xlu0 %v13379_v37, %s11883_s20  ;;  %11393 = vrot.lane.b32.xlu1 %v13382_v10, %s11883_s20 }
 0x420   : > { %11398 = vrot.lane.b32.xlu0 %v13335_v41, %s11883_s20  ;;  %5813 = vrot.lane.b32.xlu1 %v13245_v7, %s11884_s30 }
 0x424   : > { %5815 = vrot.lane.b32.xlu0 %v13252_v21, %s11884_s30  ;;  %5817 = vrot.lane.b32.xlu1 %v13259_v32, %s11884_s30 }
 0x428   : > { %5819 = vrot.lane.b32.xlu0 %v13267_v8, %s11884_s30  ;;  %11403 = vrot.lane.b32.xlu1 %v13362_v3, %s11868_s17 }
 0x42c   : > { %11408 = vrot.lane.b32.xlu0 %v13370_v13, %s11868_s17  ;;  %11413 = vrot.lane.b32.xlu1 %v13320_v9, %s11868_s17 }
 0x430   : > { %11418 = vrot.lane.b32.xlu0 %v13379_v37, %s11868_s17  ;;  %11423 = vrot.lane.b32.xlu1 %v13382_v10, %s11868_s17 }
 0x434   : > { %11428 = vrot.lane.b32.xlu0 %v13335_v41, %s11868_s17  ;;  %11433 = vrot.lane.b32.xlu1 %v13362_v3, %s11870_s19 }
 0x438   : > { %11438 = vrot.lane.b32.xlu0 %v13370_v13, %s11870_s19  ;;  %11443 = vrot.lane.b32.xlu1 %v13320_v9, %s11870_s19 }
 0x43c   : > { %11448 = vrot.lane.b32.xlu0 %v13379_v37, %s11870_s19  ;;  %11453 = vrot.lane.b32.xlu1 %v13382_v10, %s11870_s19 }
 0x440   : > { %11458 = vrot.lane.b32.xlu0 %v13335_v41, %s11870_s19  ;;  %6305 = vrot.lane.b32.xlu1 %v13446_v1, %s11880_s29 }
 0x444   : > { %6307 = vrot.lane.b32.xlu0 %v13455_v58, %s11880_s29  ;;  %6309 = vrot.lane.b32.xlu1 %v13460_v59, %s11880_s29 }
 0x448   : > { %6311 = vrot.lane.b32.xlu0 %v13469_v30, %s11880_s29  ;;  %11463 = vrot.lane.b32.xlu1 %v13362_v3, %s11885_s27 }
 0x44c   : > { %11468 = vrot.lane.b32.xlu0 %v13370_v13, %s11885_s27  ;;  %11473 = vrot.lane.b32.xlu1 %v13320_v9, %s11885_s27 }
 0x450   : > { %11478 = vrot.lane.b32.xlu0 %v13379_v37, %s11885_s27  ;;  %11483 = vrot.lane.b32.xlu1 %v13382_v10, %s11885_s27 }
 0x454   : > { %11488 = vrot.lane.b32.xlu0 %v13335_v41, %s11885_s27  ;;  %6551 = vrot.lane.b32.xlu1 %v13446_v1, %s11882_s24  ;;  %v11309_v56 = vpop.permute.xlu1 %11308 }
 0x455   : > { %v11310_v63 = vunpack.i.l.bf16 %v11309_v56  ;;  %v11311_v33 = vunpack.i.h.bf16 %v11309_v56 }
 0x457   : > { %v5361_v18 = vsel %vm2978_vm10, %v11305_v44, %v11310_v63  ;;  %v5362_v57 = vsel %vm2978_vm10, %v11310_v63, %v11311_v33 }
 0x458   : > { %6553 = vrot.lane.b32.xlu0 %v13455_v58, %s11882_s24  ;;  %6555 = vrot.lane.b32.xlu1 %v13460_v59, %s11882_s24  ;;  %v11314_v23 = vpop.permute.xlu0 %11313 }
 0x459   : > { %v11316_v62 = vunpack.i.h.bf16 %v11314_v23  ;;  %v11315_v15 = vunpack.i.l.bf16 %v11314_v23  ;;  %v7289_v23 = vld [vmem:[%s14247_s7] sm:$0xff] }
 0x45b   : > { %v5364_v46 = vsel %vm2978_vm10, %v11306_v5, %v11315_v15  ;;  %v5365_v49 = vsel %vm2978_vm10, %v11315_v15, %v11316_v62 }
 0x45c   : > { %6557 = vrot.lane.b32.xlu0 %v13469_v30, %s11882_s24  ;;  %11493 = vrot.lane.b32.xlu1 %v13362_v3, %s14264_s25  ;;  %v11319_v14 = vpop.permute.xlu0 %11318  ;;  %v10380_v52 = vpack.c.bf16 %v5365_v49, %v5362_v57  ;;  %v10382_v34 = vpack.c.bf16 %v5364_v46, %v5361_v18 }
 0x45d   : > { %v11321_v38 = vunpack.i.h.bf16 %v11319_v14  ;;  %v11320_v22 = vunpack.i.l.bf16 %v11319_v14 }
 0x45e   : > { %10381 = vmatprep.subr.bf16.mxu1 %v10380_v52  ;;  %v7290_v52 = vld [vmem:[%s14247_s7 + $0x8] sm:$0xff] }
 0x45f   : > { %10383 = vmatpush1.bf16.msra.mxu1 %v10382_v34  ;;  %v5368_v47 = vsel %vm2978_vm10, %v11320_v22, %v11321_v38 }
 0x460   : > { %11498 = vrot.lane.b32.xlu0 %v13370_v13, %s14264_s25  ;;  %11503 = vrot.lane.b32.xlu1 %v13320_v9, %s14264_s25  ;;  %v11329_v12 = vpop.permute.xlu0 %11328  ;;  %v11324_v43 = vpop.permute.xlu1 %11323 }
 0x461   : > { %v11331_v6 = vunpack.i.h.bf16 %v11329_v12  ;;  %v11330_v55 = vunpack.i.l.bf16 %v11329_v12  ;;  %v11326_v16 = vunpack.i.h.bf16 %v11324_v43  ;;  %v11325_v48 = vunpack.i.l.bf16 %v11324_v43 }
 0x463   : > { %v5367_v60 = vsel %vm2978_vm10, %v11330_v55, %v11320_v22  ;;  %v5370_v4 = vsel %vm2978_vm10, %v11331_v6, %v11325_v48  ;;  %v5371_v20 = vsel %vm2978_vm10, %v11325_v48, %v11326_v16 }
 0x464   : > { %11508 = vrot.lane.b32.xlu0 %v13379_v37, %s14264_s25  ;;  %11513 = vrot.lane.b32.xlu1 %v13382_v10, %s14264_s25  ;;  %v10384_v51 = vpack.c.bf16 %v5371_v20, %v5368_v47  ;;  %v10386_v40 = vpack.c.bf16 %v5370_v4, %v5367_v60 }
 0x466   : > { %10385 = vmatprep.subr.bf16.mxu1 %v10384_v51 }
 0x467   : > { %10387 = vmatpush1.bf16.msra.mxu1 %v10386_v40 }
 0x468   : > { %11518 = vrot.lane.b32.xlu0 %v13335_v41, %s14264_s25  ;;  %6797 = vrot.lane.b32.xlu1 %v13446_v1, %s11884_s30 }
 0x46a   : > { %9595 = vmatmul.mubr.msk.f32.vlgmr.msra.gmra.mrb[12].mxu1 %vm2747_vm12, %v13245_v7 }
 0x46b   : > { %5463 = vmatprep.mubr.f32.mxu1 %v11863_v0 }
 0x46c   : > { %6799 = vrot.lane.b32.xlu0 %v13455_v58, %s11884_s30  ;;  %6801 = vrot.lane.b32.xlu1 %v13460_v59, %s11884_s30 }
 0x46e   : > { %v11334_v61 = vpop.permute.xlu1 %11333  ;;  %9596 = vmatmul.mubr.msk.f32.gmra.mrb[14].mxu1 %vm2747_vm12, %v13252_v21 }
 0x46f   : > { %v11336_v26 = vunpack.i.h.bf16 %v11334_v61  ;;  %v11335_v19 = vunpack.i.l.bf16 %v11334_v61  ;;  %5469 = vmatprep.mubr.f32.mxu1 %v11863_v0 }
 0x470   : > { %6803 = vrot.lane.b32.xlu0 %v13469_v30, %s11884_s30  ;;  %11523 = vrot.lane.b32.xlu1 %v13362_v3, %s14279_s23 }
 0x471   : > { %v5363_v25 = vsel %vm2978_vm10, %v11311_v33, %v11335_v19  ;;  %v5366_v53 = vsel %vm2978_vm10, %v11316_v62, %v11336_v26 }
 0x472   : > { %v11339_v39 = vpop.permute.xlu0 %11338  ;;  %v13530_v24 = vpop.permute.xlu1 %11343  ;;  %v10388_v50 = vpack.c.bf16 %v5366_v53, %v5363_v25  ;;  %9597 = vmatmul.mubr.msk.f32.gmra.mrb[16].mxu1 %vm2747_vm12, %v13259_v32 }
 0x473   : > { %v11341_v42 = vunpack.i.h.bf16 %v11339_v39  ;;  %v11340_v17 = vunpack.i.l.bf16 %v11339_v39  ;;  %v11346_v54 = vunpack.i.h.bf16 %v13530_v24  ;;  %v11345_v2 = vunpack.i.l.bf16 %v13530_v24  ;;  %5475 = vmatprep.mubr.f32.mxu1 %v11863_v0 }
 0x474   : > { %11528 = vrot.lane.b32.xlu0 %v13370_v13, %s14279_s23  ;;  %11533 = vrot.lane.b32.xlu1 %v13320_v9, %s14279_s23 }
 0x475   : > { %10389 = vmatprep.subr.bf16.mxu1 %v10388_v50  ;;  %v5369_v35 = vsel %vm2978_vm10, %v11321_v38, %v11340_v17  ;;  %v5372_v3 = vsel %vm2978_vm10, %v11326_v16, %v11341_v42  ;;  %v5600_v9 = vsel %vm437_vm0, %v11345_v2, %v11346_v54  ;;  %v7292_v16 = vld [vmem:[%s14247_s7 + $0x18] sm:$0xff] }
 0x476   : > { %10391 = vmatpush3.bf16.msra.mxu1 %v10388_v50  ;;  %v11349_v11 = vpop.permute.xlu0 %11348  ;;  %v11354_v31 = vpop.permute.xlu1 %11353  ;;  %v10392_v36 = vpack.c.bf16 %v5372_v3, %v5369_v35 }
 0x477   : > { %v11351_v56 = vunpack.i.h.bf16 %v11349_v11  ;;  %v11350_v44 = vunpack.i.l.bf16 %v11349_v11  ;;  %v11356_v13 = vunpack.i.h.bf16 %v11354_v31  ;;  %v11355_v63 = vunpack.i.l.bf16 %v11354_v31  ;;  %9598 = vmatmul.mubr.msk.f32.gmra.mrb[18].mxu1 %vm2747_vm12, %v13267_v8 }
 0x478   : > { %11538 = vrot.lane.b32.xlu0 %v13379_v37, %s14279_s23  ;;  %11543 = vrot.lane.b32.xlu1 %v13382_v10, %s14279_s23 }
 0x479   : > { %v5601_v5 = vsel %vm437_vm0, %v11356_v13, %v11350_v44  ;;  %v5599_v33 = vsel %vm437_vm0, %v11355_v63, %v11345_v2  ;;  %10393 = vmatprep.subr.bf16.mxu1 %v10392_v36  ;;  %v5602_v62 = vsel %vm437_vm0, %v11350_v44, %v11351_v56  ;;  %10017 = vmatprep.mubr.msk.f32.mxu1 %vm2747_vm12, %v13245_v7  ;;  %v7291_v7 = vld [vmem:[%s14247_s7 + $0x10] sm:$0xff] }
 0x47a   : > { %10395 = vmatpush3.bf16.msra.mxu1 %v10392_v36  ;;  %v11359_v37 = vpop.permute.xlu0 %11358  ;;  %v11364_v15 = vpop.permute.xlu1 %11363  ;;  %v10396_v10 = vpack.c.bf16 %v5602_v62, %v5600_v9  ;;  %v10398_v18 = vpack.c.bf16 %v5601_v5, %v5599_v33 }
 0x47b   : > { %v11361_v46 = vunpack.i.h.bf16 %v11359_v37  ;;  %v11360_v57 = vunpack.i.l.bf16 %v11359_v37  ;;  %v11366_v49 = vunpack.i.h.bf16 %v11364_v15  ;;  %v11365_v14 = vunpack.i.l.bf16 %v11364_v15 }
 0x47c   : > { %11548 = vrot.lane.b32.xlu0 %v13335_v41, %s14279_s23  ;;  %7295 = vperm.xlu1 %11021, %v7289_v23  }
 0x47d   : > { %10397 = vmatprep.subr.bf16.mxu1 %v10396_v10  ;;  %10018 = vmatmul.mubr.msk.f32.vlgmr.msra.gmra.mrb[20].mxu1 %vm2747_vm12, %v13252_v21  ;;  %v5604_v34 = vsel %vm437_vm0, %v11360_v57, %v11361_v46  ;;  %v5606_v38 = vsel %vm437_vm0, %v11365_v14, %v11366_v49  ;;  %v10408_v51 = vpack.c.bf16 %v11366_v49, %v11361_v46 }
 0x47e   : > { %10399 = vmatpush1.bf16.msra.mxu1 %v10398_v18  ;;  %v11369_v22 = vpop.permute.xlu0 %11368  ;;  %v5568_v41 = vpop.permute.xlu1 %5567  ;;  %v10400_v12 = vpack.c.bf16 %v5606_v38, %v5604_v34  ;;  %10020 = vmatprep.mubr.msk.f32.mxu1 %vm2747_vm12, %v13259_v32  ;;  %v10404_v32 = vpack.c.bf16 %v11351_v56, %v11346_v54 }
 0x47f   : > { %v11371_v21 = vunpack.i.h.bf16 %v11369_v22  ;;  %v11370_v43 = vunpack.i.l.bf16 %v11369_v22 }
 0x480   : > { %7300 = vperm.xlu0 %11020, %v7290_v52   ;;  %7305 = vperm.xlu1 %11021, %v7291_v7  }
 0x481   : > { %v5603_v6 = vsel %vm437_vm0, %v11370_v43, %v11360_v57  ;;  %v5605_v55 = vsel %vm437_vm0, %v11371_v21, %v11365_v14  ;;  %10401 = vmatprep.subr.bf16.mxu1 %v10400_v12  ;;  %10021 = vmatmul.mubr.msk.f32.gmra.mrb[22].mxu1 %vm2747_vm12, %v13267_v8 }
 0x482   : > { %v5570_v48 = vpop.permute.xlu0 %5569  ;;  %v5572_v47 = vpop.permute.xlu1 %5571  ;;  %v10402_v60 = vpack.c.bf16 %v5605_v55, %v5603_v6  ;;  %5691 = vmatprep.mubr.f32.mxu1 %v11863_v0 }
 0x484   : > { %7310 = vperm.xlu0 %11020, %v7292_v16   ;;  %10403 = vmatpush1.bf16.msra.mxu1 %v10402_v60 }
 0x485   : > { %10405 = vmatprep.subr.bf16.mxu1 %v10404_v32 }
 0x486   : > { %v5574_v4 = vpop.permute.xlu0 %5573  ;;  %v11374_v20 = vpop.permute.xlu1 %11373 }
 0x487   : > { %9603 = vmatmul.mubr.msk.f32.vlgmr.msra.gmra.mrb[12].mxu1 %vm2747_vm12, %v5568_v41  ;;  %v11376_v8 = vunpack.i.h.bf16 %v11374_v20  ;;  %v11375_v40 = vunpack.i.l.bf16 %v11374_v20 }
 0x488   : > { %10407 = vmatpush3.bf16.msra.mxu1 %v10404_v32  ;;  %5697 = vmatprep.mubr.f32.mxu1 %v11863_v0 }
 0x489   : > { %10409 = vmatprep.subr.bf16.mxu1 %v10408_v51  ;;  %v5846_v53 = vsel %vm3463_vm11, %v11375_v40, %v11376_v8 }
 0x48a   : > { %v11379_v61 = vpop.permute.xlu0 %11378  ;;  %v11384_v26 = vpop.permute.xlu1 %11383 }
 0x48b   : > { %v11381_v19 = vunpack.i.h.bf16 %v11379_v61  ;;  %v11380_v25 = vunpack.i.l.bf16 %v11379_v61  ;;  %9604 = vmatmul.mubr.msk.f32.gmra.mrb[14].mxu1 %vm2747_vm12, %v5570_v48  ;;  %v11386_v17 = vunpack.i.h.bf16 %v11384_v26  ;;  %v11385_v54 = vunpack.i.l.bf16 %v11384_v26 }
 0x48c   : > { %10411 = vmatpush3.bf16.msra.mxu1 %v10408_v51  ;;  %5703 = vmatprep.mubr.f32.mxu1 %v11863_v0 }
 0x48d   : > { %v5848_v39 = vsel %vm3463_vm11, %v11380_v25, %v11381_v19  ;;  %v5847_v56 = vsel %vm3463_vm11, %v11386_v17, %v11380_v25  ;;  %v5845_v44 = vsel %vm3463_vm11, %v11385_v54, %v11375_v40  ;;  %v10420_v49 = vpack.c.bf16 %v11381_v19, %v11376_v8 }
 0x48e   : > { %v11389_v24 = vpop.permute.xlu0 %11388  ;;  %v11394_v50 = vpop.permute.xlu1 %11393  ;;  %v10412_v42 = vpack.c.bf16 %v5848_v39, %v5846_v53  ;;  %v10414_v62 = vpack.c.bf16 %v5847_v56, %v5845_v44 }
 0x48f   : > { %9605 = vmatmul.mubr.msk.f32.gmra.mrb[16].mxu1 %vm2747_vm12, %v5572_v47  ;;  %v11391_v2 = vunpack.i.h.bf16 %v11389_v24  ;;  %v11390_v35 = vunpack.i.l.bf16 %v11389_v24  ;;  %v11396_v3 = vunpack.i.h.bf16 %v11394_v50  ;;  %v11395_v11 = vunpack.i.l.bf16 %v11394_v50 }
 0x490   : > { %10413 = vmatprep.subr.bf16.mxu1 %v10412_v42  ;;  %5709 = vmatprep.mubr.f32.mxu1 %v11863_v0 }
 0x491   : > { %v5850_v9 = vsel %vm3463_vm11, %v11390_v35, %v11391_v2  ;;  %v5852_v5 = vsel %vm3463_vm11, %v11395_v11, %v11396_v3 }
 0x492   : > { %v11399_v31 = vpop.permute.xlu0 %11398  ;;  %v13589_v36 = vpop.permute.xlu1 %5813  ;;  %v10416_v10 = vpack.c.bf16 %v5852_v5, %v5850_v9 }
 0x493   : > { %v11401_v13 = vunpack.i.h.bf16 %v11399_v31  ;;  %v11400_v63 = vunpack.i.l.bf16 %v11399_v31  ;;  %9606 = vmatmul.mubr.msk.f32.gmra.mrb[18].mxu1 %vm2747_vm12, %v5574_v4 }
 0x494   : > { %10031 = vmatprep.mubr.msk.f32.mxu1 %vm2747_vm12, %v5568_v41  ;;  %v10424_v41 = vpack.c.bf16 %v11396_v3, %v11391_v2 }
 0x495   : > { %v5849_v37 = vsel %vm3463_vm11, %v11400_v63, %v11390_v35  ;;  %v5851_v15 = vsel %vm3463_vm11, %v11401_v13, %v11395_v11 }
 0x496   : > { %v13597_v33 = vpop.permute.xlu0 %5815  ;;  %v13599_v23 = vpop.permute.xlu1 %5817  ;;  %v10418_v57 = vpack.c.bf16 %v5851_v15, %v5849_v37 }
 0x497   : > { %10032 = vmatmul.mubr.msk.f32.vlgmr.msra.gmra.mrb[20].mxu1 %vm2747_vm12, %v5570_v48 }
 0x498   : > { %10415 = vmatpush1.bf16.msra.mxu1 %v10414_v62  ;;  %10034 = vmatprep.mubr.msk.f32.mxu1 %vm2747_vm12, %v5572_v47 }
 0x499   : > { %10417 = vmatprep.subr.bf16.mxu1 %v10416_v10 }
 0x49a   : > { %v5820_v18 = vpop.permute.xlu0 %5819  ;;  %v11404_v46 = vpop.permute.xlu1 %11403 }
 0x49b   : > { %10035 = vmatmul.mubr.msk.f32.gmra.mrb[22].mxu1 %vm2747_vm12, %v5574_v4  ;;  %v11406_v14 = vunpack.i.h.bf16 %v11404_v46  ;;  %v11405_v52 = vunpack.i.l.bf16 %v11404_v46 }
 0x49c   : > { %10419 = vmatpush1.bf16.msra.mxu1 %v10418_v57  ;;  %5937 = vmatprep.mubr.f32.mxu1 %v11863_v0 }
 0x49d   : > { %10421 = vmatprep.subr.bf16.mxu1 %v10420_v49  ;;  %v6088_v12 = vsel %vm1105_vm4, %v11405_v52, %v11406_v14 }
 0x49e   : > { %v11409_v7 = vpop.permute.xlu0 %11408  ;;  %v11414_v34 = vpop.permute.xlu1 %11413 }
 0x49f   : > { %v11411_v38 = vunpack.i.h.bf16 %v11409_v7  ;;  %v11410_v22 = vunpack.i.l.bf16 %v11409_v7  ;;  %9611 = vmatmul.mubr.msk.f32.vlgmr.msra.gmra.mrb[12].mxu1 %vm2747_vm12, %v13589_v36  ;;  %v11416_v47 = vunpack.i.h.bf16 %v11414_v34  ;;  %v11415_v60 = vunpack.i.l.bf16 %v11414_v34 }
 0x4a0   : > { %10423 = vmatpush3.bf16.msra.mxu1 %v10420_v49  ;;  %5943 = vmatprep.mubr.f32.mxu1 %v11863_v0 }
 0x4a1   : > { %10425 = vmatprep.subr.bf16.mxu1 %v10424_v41  ;;  %v6090_v21 = vsel %vm1105_vm4, %v11410_v22, %v11411_v38  ;;  %v6089_v61 = vsel %vm1105_vm4, %v11416_v47, %v11410_v22  ;;  %v6087_v26 = vsel %vm1105_vm4, %v11415_v60, %v11405_v52  ;;  %v10436_v31 = vpack.c.bf16 %v11411_v38, %v11406_v14 }
 0x4a2   : > { %v11419_v43 = vpop.permute.xlu0 %11418  ;;  %v11424_v6 = vpop.permute.xlu1 %11423  ;;  %v10428_v55 = vpack.c.bf16 %v6090_v21, %v6088_v12  ;;  %v10430_v42 = vpack.c.bf16 %v6089_v61, %v6087_v26 }
 0x4a3   : > { %9612 = vmatmul.mubr.msk.f32.gmra.mrb[14].mxu1 %vm2747_vm12, %v13597_v33  ;;  %v11421_v32 = vunpack.i.h.bf16 %v11419_v43  ;;  %v11420_v4 = vunpack.i.l.bf16 %v11419_v43  ;;  %v11426_v20 = vunpack.i.h.bf16 %v11424_v6  ;;  %v11425_v51 = vunpack.i.l.bf16 %v11424_v6 }
 0x4a4   : > { %10427 = vmatpush3.bf16.msra.mxu1 %v10424_v41  ;;  %5949 = vmatprep.mubr.f32.mxu1 %v11863_v0 }
 0x4a5   : > { %10429 = vmatprep.subr.bf16.mxu1 %v10428_v55  ;;  %v6092_v53 = vsel %vm1105_vm4, %v11420_v4, %v11421_v32  ;;  %v6094_v39 = vsel %vm1105_vm4, %v11425_v51, %v11426_v20  ;;  %v10440_v5 = vpack.c.bf16 %v11426_v20, %v11421_v32 }
 0x4a6   : > { %v11429_v16 = vpop.permute.xlu0 %11428  ;;  %v13615_v48 = vpop.permute.xlu1 %11433  ;;  %v10432_v2 = vpack.c.bf16 %v6094_v39, %v6092_v53 }
 0x4a7   : > { %9613 = vmatmul.mubr.msk.f32.gmra.mrb[16].mxu1 %vm2747_vm12, %v13599_v23  ;;  %v11431_v19 = vunpack.i.h.bf16 %v11429_v16  ;;  %v11430_v25 = vunpack.i.l.bf16 %v11429_v16  ;;  %v11436_v44 = vunpack.i.h.bf16 %v13615_v48  ;;  %v11435_v13 = vunpack.i.l.bf16 %v13615_v48 }
 0x4a8   : > { %5955 = vmatprep.mubr.f32.mxu1 %v11863_v0 }
 0x4a9   : > { %v6091_v17 = vsel %vm1105_vm4, %v11430_v25, %v11420_v4  ;;  %v6093_v54 = vsel %vm1105_vm4, %v11431_v19, %v11425_v51  ;;  %v6338_v62 = vsel %vm1349_vm5, %v11435_v13, %v11436_v44 }
 0x4aa   : > { %v13620_v8 = vpop.permute.xlu0 %11438  ;;  %v11444_v40 = vpop.permute.xlu1 %11443  ;;  %v10434_v35 = vpack.c.bf16 %v6093_v54, %v6091_v17 }
 0x4ab   : > { %9614 = vmatmul.mubr.msk.f32.gmra.mrb[18].mxu1 %vm2747_vm12, %v5820_v18  ;;  %v11440_v56 = vunpack.i.l.bf16 %v13620_v8  ;;  %v11445_v46 = vunpack.i.l.bf16 %v11444_v40 }
 0x4ac   : > { %10045 = vmatprep.mubr.msk.f32.mxu1 %vm2747_vm12, %v13589_v36  ;;  %v11441_v36 = vunpack.i.h.bf16 %v13620_v8 }
 0x4ad   : > { %v6337_v34 = vsel %vm1349_vm5, %v11445_v46, %v11435_v13 }
 0x4ae   : > { %v13629_v24 = vpop.permute.xlu0 %11448  ;;  %v13631_v50 = vpop.permute.xlu1 %11453  ;;  %v10452_v32 = vpack.c.bf16 %v11441_v36, %v11436_v44 }
 0x4af   : > { %10046 = vmatmul.mubr.msk.f32.vlgmr.msra.gmra.mrb[20].mxu1 %vm2747_vm12, %v13597_v33  ;;  %v6340_v33 = vsel %vm1349_vm5, %v11440_v56, %v11441_v36  ;;  %v11451_v57 = vunpack.i.h.bf16 %v13629_v24  ;;  %v11450_v49 = vunpack.i.l.bf16 %v13629_v24  ;;  %v11456_v14 = vunpack.i.h.bf16 %v13631_v50 }
 0x4b0   : > { %10431 = vmatpush1.bf16.msra.mxu1 %v10430_v42  ;;  %10048 = vmatprep.mubr.msk.f32.mxu1 %vm2747_vm12, %v13599_v23  ;;  %v10444_v37 = vpack.c.bf16 %v6340_v33, %v6338_v62  ;;  %v11455_v52 = vunpack.i.l.bf16 %v13631_v50 }
 0x4b1   : > { %10433 = vmatprep.subr.bf16.mxu1 %v10432_v2  ;;  %v6342_v21 = vsel %vm1349_vm5, %v11450_v49, %v11451_v57  ;;  %v10456_v51 = vpack.c.bf16 %v11456_v14, %v11451_v57 }
 0x4b2   : > { %v11459_v3 = vpop.permute.xlu0 %11458  ;;  %v13639_v11 = vpop.permute.xlu1 %6305  ;;  %v6344_v43 = vsel %vm1349_vm5, %v11455_v52, %v11456_v14 }
 0x4b3   : > { %10049 = vmatmul.mubr.msk.f32.gmra.mrb[22].mxu1 %vm2747_vm12, %v5820_v18  ;;  %v11446_v18 = vunpack.i.h.bf16 %v11444_v40  ;;  %v11461_v38 = vunpack.i.h.bf16 %v11459_v3  ;;  %v11460_v22 = vunpack.i.l.bf16 %v11459_v3  ;;  %v10448_v48 = vpack.c.bf16 %v6344_v43, %v6342_v21 }
 0x4b4   : > { %10435 = vmatpush1.bf16.msra.mxu1 %v10434_v35  ;;  %6183 = vmatprep.mubr.f32.mxu1 %v11863_v0 }
 0x4b5   : > { %10437 = vmatprep.subr.bf16.mxu1 %v10436_v31  ;;  %v6339_v7 = vsel %vm1349_vm5, %v11446_v18, %v11440_v56  ;;  %v6341_v55 = vsel %vm1349_vm5, %v11460_v22, %v11450_v49  ;;  %v6343_v16 = vsel %vm1349_vm5, %v11461_v38, %v11455_v52 }
 0x4b6   : > { %v13647_v63 = vpop.permute.xlu0 %6307  ;;  %v13649_v9 = vpop.permute.xlu1 %6309  ;;  %v10446_v6 = vpack.c.bf16 %v6339_v7, %v6337_v34  ;;  %v10450_v60 = vpack.c.bf16 %v6343_v16, %v6341_v55 }
 0x4b7   : > { %9619 = vmatmul.mubr.msk.f32.vlgmr.msra.gmra.mrb[12].mxu1 %vm2747_vm12, %v13446_v1 }
 0x4b8   : > { %10439 = vmatpush3.bf16.msra.mxu1 %v10436_v31  ;;  %6189 = vmatprep.mubr.f32.mxu1 %v11863_v0 }
 0x4b9   : > { %10441 = vmatprep.subr.bf16.mxu1 %v10440_v5 }
 0x4ba   : > { %v13655_v23 = vpop.permute.xlu0 %6311  ;;  %v13661_v15 = vpop.permute.xlu1 %11463 }
 0x4bb   : > { %9620 = vmatmul.mubr.msk.f32.gmra.mrb[14].mxu1 %vm2747_vm12, %v13455_v58 }
 0x4bc   : > { %10443 = vmatpush3.bf16.msra.mxu1 %v10440_v5  ;;  %6195 = vmatprep.mubr.f32.mxu1 %v11863_v0 }
 0x4bd   : > { %10445 = vmatprep.subr.bf16.mxu1 %v10444_v37 }
 0x4be   : > { %v13663_v10 = vpop.permute.xlu0 %11468  ;;  %v11474_v41 = vpop.permute.xlu1 %11473 }
 0x4bf   : > { %9621 = vmatmul.mubr.msk.f32.gmra.mrb[16].mxu1 %vm2747_vm12, %v13460_v59  ;;  %v11471_v4 = vunpack.i.h.bf16 %v13663_v10  ;;  %v11470_v20 = vunpack.i.l.bf16 %v13663_v10  ;;  %v11476_v53 = vunpack.i.h.bf16 %v11474_v41  ;;  %v11475_v39 = vunpack.i.l.bf16 %v11474_v41 }
 0x4c0   : > { %6201 = vmatprep.mubr.f32.mxu1 %v11863_v0 }
 0x4c1   : > { %v6585_v54 = vsel %vm4242_vm1, %v11476_v53, %v11470_v20 }
 0x4c2   : > { %v13674_v12 = vpop.permute.xlu0 %11478  ;;  %v13688_v47 = vpop.permute.xlu1 %11483 }
 0x4c3   : > { %9622 = vmatmul.mubr.msk.f32.gmra.mrb[18].mxu1 %vm2747_vm12, %v13469_v30  ;;  %v11481_v24 = vunpack.i.h.bf16 %v13674_v12  ;;  %v11480_v50 = vunpack.i.l.bf16 %v13674_v12  ;;  %v11486_v42 = vunpack.i.h.bf16 %v13688_v47  ;;  %v11485_v17 = vunpack.i.l.bf16 %v13688_v47 }
 0x4c4   : > { %10059 = vmatprep.mubr.msk.f32.mxu1 %vm2747_vm12, %v13446_v1 }
 0x4c5   : > { %v6588_v56 = vsel %vm4242_vm1, %v11480_v50, %v11481_v24  ;;  %v6590_v44 = vsel %vm4242_vm1, %v11485_v17, %v11486_v42  ;;  %v10472_v57 = vpack.c.bf16 %v11486_v42, %v11481_v24 }
 0x4c6   : > { %v11489_v1 = vpop.permute.xlu0 %11488  ;;  %v13697_v8 = vpop.permute.xlu1 %6551  ;;  %v10464_v62 = vpack.c.bf16 %v6590_v44, %v6588_v56 }
 0x4c7   : > { %10060 = vmatmul.mubr.msk.f32.vlgmr.msra.gmra.mrb[20].mxu1 %vm2747_vm12, %v13455_v58  ;;  %v11466_v58 = vunpack.i.h.bf16 %v13661_v15  ;;  %v11491_v35 = vunpack.i.h.bf16 %v11489_v1  ;;  %v11490_v3 = vunpack.i.l.bf16 %v11489_v1 }
 0x4c8   : > { %10447 = vmatpush1.bf16.msra.mxu1 %v10446_v6  ;;  %10062 = vmatprep.mubr.msk.f32.mxu1 %vm2747_vm12, %v13460_v59  ;;  %v11465_v59 = vunpack.i.l.bf16 %v13661_v15 }
 0x4c9   : > { %10449 = vmatprep.subr.bf16.mxu1 %v10448_v48  ;;  %v6587_v5 = vsel %vm4242_vm1, %v11490_v3, %v11480_v50  ;;  %v6589_v33 = vsel %vm4242_vm1, %v11491_v35, %v11485_v17  ;;  %v10468_v10 = vpack.c.bf16 %v11471_v4, %v11466_v58 }
 0x4ca   : > { %v13699_v40 = vpop.permute.xlu0 %6553  ;;  %v6584_v61 = vsel %vm4242_vm1, %v11465_v59, %v11466_v58  ;;  %v13709_v19 = vpop.permute.xlu1 %6555  ;;  %v6583_v2 = vsel %vm4242_vm1, %v11475_v39, %v11465_v59 }
 0x4cb   : > { %10063 = vmatmul.mubr.msk.f32.gmra.mrb[22].mxu1 %vm2747_vm12, %v13469_v30  ;;  %v6586_v30 = vsel %vm4242_vm1, %v11470_v20, %v11471_v4  ;;  %v10462_v13 = vpack.c.bf16 %v6585_v54, %v6583_v2 }
 0x4cc   : > { %10451 = vmatpush1.bf16.msra.mxu1 %v10450_v60  ;;  %6429 = vmatprep.mubr.f32.mxu1 %v11863_v0  ;;  %v10460_v26 = vpack.c.bf16 %v6586_v30, %v6584_v61 }
 0x4cd   : > { %10453 = vmatprep.subr.bf16.mxu1 %v10452_v32 }
 0x4ce   : > { %v13711_v25 = vpop.permute.xlu0 %6557  ;;  %v13722_v31 = vpop.permute.xlu1 %11493 }
 0x4cf   : > { %9627 = vmatmul.mubr.msk.f32.vlgmr.msra.gmra.mrb[12].mxu1 %vm2747_vm12, %v13639_v11 }
 0x4d0   : > { %10455 = vmatpush3.bf16.msra.mxu1 %v10452_v32  ;;  %6435 = vmatprep.mubr.f32.mxu1 %v11863_v0 }
 0x4d1   : > { %10457 = vmatprep.subr.bf16.mxu1 %v10456_v51 }
 0x4d2   : > { %v13724_v36 = vpop.permute.xlu0 %11498  ;;  %v11504_v37 = vpop.permute.xlu1 %11503 }
 0x4d3   : > { %9628 = vmatmul.mubr.msk.f32.gmra.mrb[14].mxu1 %vm2747_vm12, %v13647_v63  ;;  %v11501_v18 = vunpack.i.h.bf16 %v13724_v36  ;;  %v11500_v46 = vunpack.i.l.bf16 %v13724_v36  ;;  %v11506_v22 = vunpack.i.h.bf16 %v11504_v37  ;;  %v11505_v41 = vunpack.i.l.bf16 %v11504_v37 }
 0x4d4   : > { %10459 = vmatpush3.bf16.msra.mxu1 %v10456_v51  ;;  %6441 = vmatprep.mubr.f32.mxu1 %v11863_v0 }
 0x4d5   : > { %10461 = vmatprep.subr.bf16.mxu1 %v10460_v26  ;;  %v6831_v55 = vsel %vm1837_vm7, %v11506_v22, %v11500_v46  ;;  %v13839_v22 = vld [vmem:[%s14248_s8] sm:$0xf] }
 0x4d6   : > { %v13738_v15 = vpop.permute.xlu0 %11508  ;;  %v11514_v49 = vpop.permute.xlu1 %11513  ;;  %7429 = vrot.lane.b32.xlu1 %v13839_v22, %s11880_s29 }
 0x4d7   : > { %9629 = vmatmul.mubr.msk.f32.gmra.mrb[16].mxu1 %vm2747_vm12, %v13649_v9  ;;  %v11511_v12 = vunpack.i.h.bf16 %v13738_v15  ;;  %v11510_v21 = vunpack.i.l.bf16 %v13738_v15  ;;  %v11516_v43 = vunpack.i.h.bf16 %v11514_v49  ;;  %v11515_v6 = vunpack.i.l.bf16 %v11514_v49  ;;  %v7043_v49 = vld [vmem:[%s14246_s6 + $0x10] sm:$0xff] }
 0x4d8   : > { %6447 = vmatprep.mubr.f32.mxu1 %v11863_v0 }
 0x4d9   : > { %v6834_v32 = vsel %vm1837_vm7, %v11510_v21, %v11511_v12  ;;  %v6836_v4 = vsel %vm1837_vm7, %v11515_v6, %v11516_v43  ;;  %v10488_v50 = vpack.c.bf16 %v11516_v43, %v11511_v12 }
 0x4da   : > { %v11519_v14 = vpop.permute.xlu0 %11518  ;;  %v13755_v34 = vpop.permute.xlu1 %6797  ;;  %v10480_v51 = vpack.c.bf16 %v6836_v4, %v6834_v32 }
 0x4db   : > { %9630 = vmatmul.mubr.msk.f32.gmra.mrb[18].mxu1 %vm2747_vm12, %v13655_v23  ;;  %v11521_v48 = vunpack.i.h.bf16 %v11519_v14  ;;  %v11520_v47 = vunpack.i.l.bf16 %v11519_v14 }
 0x4dc   : > { %10073 = vmatprep.mubr.msk.f32.mxu1 %vm2747_vm12, %v13639_v11  ;;  %v10466_v11 = vpack.c.bf16 %v6589_v33, %v6587_v5 }
 0x4dd   : > { %v6833_v58 = vsel %vm1837_vm7, %v11520_v47, %v11510_v21  ;;  %v6835_v59 = vsel %vm1837_vm7, %v11521_v48, %v11515_v6 }
 0x4de   : > { %v13757_v38 = vpop.permute.xlu0 %6799  ;;  %v13766_v1 = vpop.permute.xlu1 %6801 }
 0x4df   : > { %10074 = vmatmul.mubr.msk.f32.vlgmr.msra.gmra.mrb[20].mxu1 %vm2747_vm12, %v13647_v63  ;;  %v11496_v63 = vunpack.i.h.bf16 %v13722_v31 }
 0x4e0   : > { %10463 = vmatpush1.bf16.msra.mxu1 %v10462_v13  ;;  %10076 = vmatprep.mubr.msk.f32.mxu1 %vm2747_vm12, %v13649_v9  ;;  %v11495_v9 = vunpack.i.l.bf16 %v13722_v31 }
 0x4e1   : > { %10465 = vmatprep.subr.bf16.mxu1 %v10464_v62  ;;  %v10484_v26 = vpack.c.bf16 %v11501_v18, %v11496_v63 }
 0x4e2   : > { %v6830_v52 = vsel %vm1837_vm7, %v11495_v9, %v11496_v63  ;;  %v6829_v16 = vsel %vm1837_vm7, %v11505_v41, %v11495_v9  ;;  %v13768_v60 = vpop.permute.xlu0 %6803  ;;  %v11524_v30 = vpop.permute.xlu1 %11523 }
 0x4e3   : > { %10077 = vmatmul.mubr.msk.f32.gmra.mrb[22].mxu1 %vm2747_vm12, %v13655_v23  ;;  %v6832_v23 = vsel %vm1837_vm7, %v11500_v46, %v11501_v18  ;;  %v10478_v20 = vpack.c.bf16 %v6831_v55, %v6829_v16  ;;  %v11525_v24 = vunpack.i.l.bf16 %v11524_v30 }
 0x4e4   : > { %10467 = vmatpush1.bf16.msra.mxu1 %v10466_v11  ;;  %6675 = vmatprep.mubr.f32.mxu1 %v11863_v0  ;;  %v10476_v7 = vpack.c.bf16 %v6832_v23, %v6830_v52  ;;  %v7044_v23 = vld [vmem:[%s14246_s6 + $0x28] sm:$0xff]  ;;  %v7045_v52 = vld [vmem:[%s14246_s6 + $0x40] sm:$0xff] }
 0x4e5   : > { %10469 = vmatprep.subr.bf16.mxu1 %v10468_v10 }
 0x4e6   : > { %v11529_v61 = vpop.permute.xlu0 %11528  ;;  %v11534_v42 = vpop.permute.xlu1 %11533 }
 0x4e7   : > { %9635 = vmatmul.mubr.msk.f32.vlgmr.msra.gmra.mrb[12].mxu1 %vm2747_vm12, %v13697_v8  ;;  %v11531_v53 = vunpack.i.h.bf16 %v11529_v61  ;;  %v11530_v39 = vunpack.i.l.bf16 %v11529_v61  ;;  %v11536_v35 = vunpack.i.h.bf16 %v11534_v42  ;;  %v11535_v3 = vunpack.i.l.bf16 %v11534_v42 }
 0x4e8   : > { %10471 = vmatpush3.bf16.msra.mxu1 %v10468_v10  ;;  %6681 = vmatprep.mubr.f32.mxu1 %v11863_v0 }
 0x4e9   : > { %10473 = vmatprep.subr.bf16.mxu1 %v10472_v57  ;;  %v7073_v5 = vsel %vm2081_vm8, %v11536_v35, %v11530_v39  ;;  %v7071_v33 = vsel %vm2081_vm8, %v11535_v3, %v11525_v24 }
 0x4ea   : > { %v11544_v2 = vpop.permute.xlu1 %11543  ;;  %v10494_v10 = vpack.c.bf16 %v7073_v5, %v7071_v33 }
 0x4eb   : > { %9636 = vmatmul.mubr.msk.f32.gmra.mrb[14].mxu1 %vm2747_vm12, %v13699_v40  ;;  %v11546_v56 = vunpack.i.h.bf16 %v11544_v2  ;;  %v11545_v44 = vunpack.i.l.bf16 %v11544_v2 }
 0x4ec   : > { %10475 = vmatpush3.bf16.msra.mxu1 %v10472_v57  ;;  %6687 = vmatprep.mubr.f32.mxu1 %v11863_v0 }
 0x4ed   : > { %10477 = vmatprep.subr.bf16.mxu1 %v10476_v7  ;;  %v7078_v11 = vsel %vm2081_vm8, %v11545_v44, %v11546_v56  ;;  %v7046_v7 = vld [vmem:[%s14246_s6 + $0x58] sm:$0xff] }
 0x4ef   : > { %9637 = vmatmul.mubr.msk.f32.gmra.mrb[16].mxu1 %vm2747_vm12, %v13709_v19 }
 0x4f0   : > { %6693 = vmatprep.mubr.f32.mxu1 %v11863_v0 }
 0x4f3   : > { %9638 = vmatmul.mubr.msk.f32.gmra.mrb[18].mxu1 %vm2747_vm12, %v13711_v25 }
 0x4f4   : > { %10087 = vmatprep.mubr.msk.f32.mxu1 %vm2747_vm12, %v13697_v8  ;;  %v10482_v8 = vpack.c.bf16 %v6835_v59, %v6833_v58 }
 0x4f7   : > { %10088 = vmatmul.mubr.msk.f32.vlgmr.msra.gmra.mrb[20].mxu1 %vm2747_vm12, %v13699_v40  ;;  %v11526_v40 = vunpack.i.h.bf16 %v11524_v30 }
 0x4f8   : > { %10479 = vmatpush1.bf16.msra.mxu1 %v10478_v20  ;;  %10090 = vmatprep.mubr.msk.f32.mxu1 %vm2747_vm12, %v13709_v19  ;;  %v7074_v19 = vsel %vm2081_vm8, %v11530_v39, %v11531_v53 }
 0x4f9   : > { %10481 = vmatprep.subr.bf16.mxu1 %v10480_v51  ;;  %v7072_v17 = vsel %vm2081_vm8, %v11525_v24, %v11526_v40  ;;  %v10500_v57 = vpack.c.bf16 %v11531_v53, %v11526_v40 }
 0x4fa   : > { %v10492_v54 = vpack.c.bf16 %v7074_v19, %v7072_v17 }
 0x4fb   : > { %10091 = vmatmul.mubr.msk.f32.gmra.mrb[22].mxu1 %vm2747_vm12, %v13711_v25  ;;  %v11539_v25 = vpop.permute.xlu0 %11538  ;;  %v13844_v12 = vpop.permute.xlu1 %7295 }
 0x4fc   : > { %10483 = vmatpush1.bf16.msra.mxu1 %v10482_v8  ;;  %6921 = vmatprep.mubr.f32.mxu1 %v11863_v0  ;;  %v11541_v31 = vunpack.i.h.bf16 %v11539_v25  ;;  %v11540_v36 = vunpack.i.l.bf16 %v11539_v25 }
 0x4fd   : > { %10485 = vmatprep.subr.bf16.mxu1 %v10484_v26 }
 0x4fe   : > { %v7076_v15 = vsel %vm2081_vm8, %v11540_v36, %v11541_v31  ;;  %v10504_v14 = vpack.c.bf16 %v11546_v56, %v11541_v31 }
 0x4ff   : > { %9643 = vmatmul.mubr.msk.f32.vlgmr.msra.gmra.mrb[12].mxu1 %vm2747_vm12, %v13755_v34  ;;  %v11549_v13 = vpop.permute.xlu0 %11548  ;;  %v10496_v63 = vpack.c.bf16 %v7078_v11, %v7076_v15  ;;  %v13848_v8 = vpop.permute.xlu1 %7305 }
 0x500   : > { %10487 = vmatpush3.bf16.msra.mxu1 %v10484_v26  ;;  %6927 = vmatprep.mubr.f32.mxu1 %v11863_v0  ;;  %v11551_v62 = vunpack.i.h.bf16 %v11549_v13  ;;  %v11550_v37 = vunpack.i.l.bf16 %v11549_v13 }
 0x501   : > { %10489 = vmatprep.subr.bf16.mxu1 %v10488_v50 }
 0x502   : > { %v7075_v18 = vsel %vm2081_vm8, %v11550_v37, %v11540_v36  ;;  %v7077_v46 = vsel %vm2081_vm8, %v11551_v62, %v11545_v44 }
 0x503   : > { %9644 = vmatmul.mubr.msk.f32.gmra.mrb[14].mxu1 %vm2747_vm12, %v13757_v38  ;;  %v10498_v9 = vpack.c.bf16 %v7077_v46, %v7075_v18  ;;  %v7301_v48 = vpop.permute.xlu0 %7300 }
 0x504   : > { %10491 = vmatpush3.bf16.msra.mxu1 %v10488_v50  ;;  %6933 = vmatprep.mubr.f32.mxu1 %v11863_v0 }
 0x505   : > { %10493 = vmatprep.subr.bf16.mxu1 %v10492_v54 }
 0x507   : > { %9645 = vmatmul.mubr.msk.f32.gmra.mrb[16].mxu1 %vm2747_vm12, %v13766_v1  ;;  %v7311_v31 = vpop.permute.xlu0 %7310 }
 0x508   : > { %6939 = vmatprep.mubr.f32.mxu1 %v11863_v0 }
 0x50b   : > { %9646 = vmatmul.mubr.msk.f32.gmra.mrb[18].mxu1 %vm2747_vm12, %v13768_v60 }
 0x50c   : > { %10101 = vmatprep.mubr.msk.f32.mxu1 %vm2747_vm12, %v13755_v34  ;;  %v7412_v34 = vld [vmem:[#allocation2] sm:$0xff] }
 0x50f   : > { %10102 = vmatmul.mubr.msk.f32.vlgmr.msra.gmra.mrb[20].mxu1 %vm2747_vm12, %v13757_v38  ;;  %v7416_v38 = vld [vmem:[#allocation2 + $0x28] sm:$0xff] }
 0x510   : > { %10495 = vmatpush1.bf16.msra.mxu1 %v10494_v10  ;;  %10104 = vmatprep.mubr.msk.f32.mxu1 %vm2747_vm12, %v13766_v1  ;;  %v11552_v41 = vpack.i.bf16 %v7416_v38, %v7412_v34 }
 0x511   : > { %10497 = vmatprep.subr.bf16.mxu1 %v10496_v63 }
 0x512   : > { %11553 = vrot.lane.b32.xlu0 %v11552_v41, %s11881_s11 }
 0x513   : > { %10105 = vmatmul.mubr.msk.f32.gmra.mrb[22].mxu1 %vm2747_vm12, %v13768_v60 }
 0x514   : > { %10499 = vmatpush1.bf16.msra.mxu1 %v10498_v9  ;;  %7167 = vmatprep.mubr.f32.mxu1 %v11863_v0 }
 0x515   : > { %10501 = vmatprep.subr.bf16.mxu1 %v10500_v57 }
 0x517   : > { %9651 = vmatmul.mubr.msk.f32.vlgmr.msra.gmra.mrb[12].mxu1 %vm2747_vm12, %v7043_v49 }
 0x518   : > { %10503 = vmatpush3.bf16.msra.mxu1 %v10500_v57  ;;  %7173 = vmatprep.mubr.f32.mxu1 %v11863_v0 }
 0x519   : > { %10505 = vmatprep.subr.bf16.mxu1 %v10504_v14 }
 0x51b   : > { %9652 = vmatmul.mubr.msk.f32.gmra.mrb[14].mxu1 %vm2747_vm12, %v7044_v23 }
 0x51c   : > { %10507 = vmatpush3.bf16.msra.mxu1 %v10504_v14  ;;  %7179 = vmatprep.mubr.f32.mxu1 %v11863_v0 }
 0x51f   : > { %9653 = vmatmul.mubr.msk.f32.gmra.mrb[16].mxu1 %vm2747_vm12, %v7045_v52 }
 0x520   : > { %7185 = vmatprep.mubr.f32.mxu1 %v11863_v0 }
 0x523   : > { %9654 = vmatmul.mubr.msk.f32.gmra.mrb[18].mxu1 %vm2747_vm12, %v7046_v7 }
 0x524   : > { %10115 = vmatprep.mubr.msk.f32.mxu1 %vm2747_vm12, %v7043_v49 }
 0x527   : > { %10116 = vmatmul.mubr.msk.f32.vlgmr.msra.gmra.mrb[20].mxu1 %vm2747_vm12, %v7044_v23 }
 0x528   : > { %10118 = vmatprep.mubr.msk.f32.mxu1 %vm2747_vm12, %v7045_v52 }
 0x52b   : > { %10119 = vmatmul.mubr.msk.f32.gmra.mrb[22].mxu1 %vm2747_vm12, %v7046_v7 }
 0x5ea   : > { %v7169_v21 = vpop.f32.mrb[12].mxu1 }
 0x5eb   : > { %v7313_v43 = vadd.f32 %v13844_v12, %v7169_v21  ;;  %v7171_v6 = vpop.f32.mrb[13].mxu1 }
 0x5ec   : > { %v7314_v55 = vadd.f32 %v13844_v12, %v7171_v6 }
 0x5ed   : > { %v7337_v16 = vmin.f32 %v7313_v43, 0.0  ;;  %v7325_v60 = vmax.f32 %v7313_v43, 0.0 }
 0x5ee   : > { %v7338_v47 = vmin.f32 %v7314_v55, 0.0  ;;  %v7175_v1 = vpop.f32.mrb[14].mxu1  ;;  %v7326_v58 = vmax.f32 %v7314_v55, 0.0 }
 0x5ef   : > { %v7349_v32 = vmul.f32 0.2, %v7337_v16  ;;  %v7316_v4 = vadd.f32 %v7301_v48, %v7175_v1  ;;  %v7177_v20 = vpop.f32.mrb[15].mxu1 }
 0x5f0   : > { %v7350_v59 = vmul.f32 0.2, %v7338_v47  ;;  %v7317_v51 = vadd.f32 %v7301_v48, %v7177_v20 }
 0x5f1   : > { %v7361_v30 = vadd.f32 %v7349_v32, %v7325_v60  ;;  %v7340_v61 = vmin.f32 %v7316_v4, 0.0  ;;  %v7328_v24 = vmax.f32 %v7316_v4, 0.0 }
 0x5f2   : > { %v7362_v26 = vadd.f32 %v7350_v59, %v7326_v58  ;;  %v7341_v53 = vmin.f32 %v7317_v51, 0.0  ;;  %v7181_v39 = vpop.f32.mrb[16].mxu1  ;;  %v7329_v17 = vmax.f32 %v7317_v51, 0.0 }
 0x5f3   : > { %v7373_v40 = vsel %vm2660_vm13, %v7361_v30, 0.0  ;;  %v7352_v50 = vmul.f32 0.2, %v7340_v61  ;;  %v7319_v42 = vadd.f32 %v13848_v8, %v7181_v39  ;;  %v7183_v19 = vpop.f32.mrb[17].mxu1 }
 0x5f4   : > { %7385 = vst [vmem:[#allocation2 + $0x8] sm:$0xff] %v7373_v40  ;;  %v13855_v25 = vsel %vm2661_vm14, %v7362_v26, 0.0  ;;  %v7353_v54 = vmul.f32 0.2, %v7341_v53  ;;  %v7320_v2 = vadd.f32 %v13848_v8, %v7183_v19 }
 0x5f5   : > { %7402 = vst.msk [vmem:[#allocation2 + $0x8] sm:$0xff] %vm7401_vm2, %v11863_v0  ;;  %v7364_v35 = vadd.f32 %v7352_v50, %v7328_v24  ;;  %v7343_v3 = vmin.f32 %v7319_v42, 0.0  ;;  %v7331_v5 = vmax.f32 %v7319_v42, 0.0 }
 0x5f6   : > { %v7365_v36 = vadd.f32 %v7353_v54, %v7329_v17  ;;  %v7344_v56 = vmin.f32 %v7320_v2, 0.0  ;;  %v7187_v44 = vpop.f32.mrb[18].mxu1  ;;  %v7332_v11 = vmax.f32 %v7320_v2, 0.0 }
 0x5f7   : > { %v7376_v13 = vsel %vm2660_vm13, %v7364_v35, 0.0  ;;  %v7355_v33 = vmul.f32 0.2, %v7343_v3  ;;  %v7322_v62 = vadd.f32 %v7311_v31, %v7187_v44  ;;  %v7189_v37 = vpop.f32.mrb[19].mxu1 }
 0x5f8   : > { %7389 = vst [vmem:[#allocation2 + $0x30] sm:$0xff] %v7376_v13  ;;  %v13864_v15 = vsel %vm2661_vm14, %v7365_v36, 0.0  ;;  %v7356_v10 = vmul.f32 0.2, %v7344_v56  ;;  %v7323_v18 = vadd.f32 %v7311_v31, %v7189_v37  ;;  %v11834_v38 = vpack.c.bf16 %v7365_v36, %v7362_v26  ;;  %v7424_v56 = vld [vmem:[#allocation2 + $0x78] sm:$0xff] }
 0x5f9   : > { %7403 = vst.msk [vmem:[#allocation2 + $0x30] sm:$0xff] %vm7401_vm2, %v11863_v0  ;;  %v7367_v46 = vadd.f32 %v7355_v33, %v7331_v5  ;;  %v7346_v63 = vmin.f32 %v7322_v62, 0.0  ;;  %v7334_v23 = vmax.f32 %v7322_v62, 0.0 }
 0x5fa   : > { %v7368_v9 = vadd.f32 %v7356_v10, %v7332_v11  ;;  %v7347_v57 = vmin.f32 %v7323_v18, 0.0  ;;  %v10117_v49 = vpop.f32.mrb[20].mxu1  ;;  %11835 = vmatprep.subr.msk.bf16.mxu0 %vm12464_vm9, %v11834_v38  ;;  %v7335_v21 = vmax.f32 %v7323_v18, 0.0 }
 0x5fb   : > { %v7379_v14 = vsel %vm2660_vm13, %v7367_v46, 0.0  ;;  %v7358_v52 = vmul.f32 0.2, %v7346_v63  ;;  %v7318_v7 = vadd.f32 %v10117_v49, %v7301_v48  ;;  %v7258_v34 = vpop.f32.mrb[21].mxu1  ;;  %v7430_v63 = vpop.permute.xlu1 %7429  ;;  %v11886_v49 = vmov 0.0|0.0  }
 0x5fc   : > { %7392 = vst [vmem:[#allocation2 + $0x58] sm:$0xff] %v7379_v14  ;;  %v13874_v41 = vsel %vm2661_vm14, %v7368_v9, 0.0  ;;  %v7359_v43 = vmul.f32 0.2, %v7347_v57  ;;  %v7315_v6 = vadd.f32 %v13844_v12, %v7258_v34  ;;  %v13877_v55 = vld [vmem:[#allocation2 + $0x8] sm:$0xff] }
 0x5fd   : > { %7404 = vst.msk [vmem:[#allocation2 + $0x58] sm:$0xff] %vm7401_vm2, %v11863_v0  ;;  %v7370_v16 = vadd.f32 %v7358_v52, %v7334_v23  ;;  %v7342_v48 = vmin.f32 %v7318_v7, 0.0  ;;  %v11557_v47 = vpack.i.bf16 %v13855_v25, %v13877_v55  ;;  %v7330_v20 = vmax.f32 %v7318_v7, 0.0 }
 0x5fe   : > { %v7371_v1 = vadd.f32 %v7359_v43, %v7335_v21  ;;  %v7339_v60 = vmin.f32 %v7315_v6, 0.0  ;;  %v10120_v32 = vpop.f32.mrb[22].mxu1  ;;  %v7327_v30 = vmax.f32 %v7315_v6, 0.0 }
 0x5ff   : > { %v7382_v4 = vsel %vm2660_vm13, %v7370_v16, 0.0  ;;  %v7354_v58 = vmul.f32 0.2, %v7342_v48  ;;  %v7324_v59 = vadd.f32 %v10120_v32, %v7311_v31  ;;  %11558 = vrot.lane.b32.xlu0 %v11557_v47, %s11881_s11  ;;  %v7268_v12 = vpop.f32.mrb[23].mxu1  ;;  %v13984_v16 = vld [vmem:[%s14248_s8 + $0x4] sm:$0xf] }
 0x600   : > { %7395 = vst [vmem:[#allocation2 + $0x80] sm:$0xff] %v7382_v4  ;;  %v13888_v51 = vsel %vm2661_vm14, %v7371_v1, 0.0  ;;  %v7351_v61 = vmul.f32 0.2, %v7339_v60  ;;  %v7321_v26 = vadd.f32 %v13848_v8, %v7268_v12  ;;  %v7417_v53 = vld [vmem:[#allocation2 + $0x30] sm:$0xff]  ;;  %v11837_v5 = vpack.c.bf16 %v7371_v1, %v7368_v9  ;;  %v11554_v1 = vpop.permute.xlu0 %11553 }
 0x601   : > { %7405 = vst.msk [vmem:[#allocation2 + $0x80] sm:$0xff] %vm7401_vm2, %v11863_v0  ;;  %v7366_v39 = vadd.f32 %v7354_v58, %v7330_v20  ;;  %v7348_v40 = vmin.f32 %v7324_v59, 0.0  ;;  %v11562_v24 = vpack.i.bf16 %v13864_v15, %v7417_v53  ;;  %v10510_v19 = vpack.c.bf16 %v7417_v53, %v13877_v55  ;;  %v7420_v8 = vld [vmem:[#allocation2 + $0x50] sm:$0xff]  ;;  %v8633_v48 = vld [vmem:[%s14248_s8 + $0x4] sm:$0xf] }
 0x602   : > { %v7363_v50 = vadd.f32 %v7351_v61, %v7327_v30  ;;  %v7345_v42 = vmin.f32 %v7321_v26, 0.0  ;;  %v7336_v54 = vmax.f32 %v7324_v59, 0.0  ;;  %v7333_v3 = vmax.f32 %v7321_v26, 0.0  ;;  %v8851_v47 = vld [vmem:[%s14248_s8 + $0x4] sm:$0xf] }
 0x603   : > { %v7378_v17 = vsel %vm2662_vm15, %v7366_v39, 0.0  ;;  %v7360_v2 = vmul.f32 0.2, %v7348_v40  ;;  %11563 = vrot.lane.b32.xlu1 %v11562_v24, %s11881_s11  ;;  %10511 = vmatpush1.bf16.msra.mxu0 %v10510_v19  ;;  %v11572_v37 = vpack.i.bf16 %v7424_v56, %v7420_v8  ;;  %v13932_v52 = vpack.i.bf16 %v7417_v53, %v13877_v55  ;;  %v9285_v60 = vld [vmem:[%s14249_s9] sm:$0xf] }
 0x604   : > { %7391 = vst.msk [vmem:[#allocation2 + $0x40] sm:$0xff] %vm7387_vm3, %v7378_v17  ;;  %v7375_v35 = vsel %vm2662_vm15, %v7363_v50, 0.0  ;;  %v7357_v31 = vmul.f32 0.2, %v7345_v42  ;;  %v7421_v36 = vld [vmem:[#allocation2 + $0x58] sm:$0xff]  ;;  %11838 = vmatprep.subr.msk.bf16.mxu0 %vm12464_vm9, %v11837_v5  ;;  %vm11887_vm9 = vmmov 0   ;;  %v11556_v4 = vunpack.i.h.bf16 %v11554_v1 }
 0x605   : > { %7408 = vst.msk [vmem:[#allocation2 + $0x40] sm:$0xff] %vm7406_vm6, %v11863_v0  ;;  %v7372_v44 = vadd.f32 %v7360_v2, %v7336_v54  ;;  %v11567_v13 = vpack.i.bf16 %v13874_v41, %v7421_v36  ;;  %v11555_v20 = vunpack.i.l.bf16 %v11554_v1 }
 0x606   : > { %7388 = vst.msk [vmem:[#allocation2 + $0x18] sm:$0xff] %vm7387_vm3, %v7375_v35  ;;  %v7369_v33 = vadd.f32 %v7357_v31, %v7333_v3 }
 0x607   : > { %7407 = vst.msk [vmem:[#allocation2 + $0x18] sm:$0xff] %vm7406_vm6, %v11863_v0  ;;  %v7384_v62 = vsel %vm2662_vm15, %v7372_v44, 0.0  ;;  %11568 = vrot.lane.b32.xlu1 %v11567_v13, %s11881_s11 }
 0x608   : > { %7397 = vst.msk [vmem:[#allocation2 + $0x90] sm:$0xff] %vm7387_vm3, %v7384_v62  ;;  %v7381_v11 = vsel %vm2662_vm15, %v7369_v33, 0.0  ;;  %v7425_v10 = vld [vmem:[#allocation2 + $0x80] sm:$0xff] }
 0x609   : > { %7410 = vst.msk [vmem:[#allocation2 + $0x90] sm:$0xff] %vm7406_vm6, %v11863_v0  ;;  %v11577_v45 = vpack.i.bf16 %v13888_v51, %v7425_v10  ;;  %v10514_v18 = vpack.c.bf16 %v7425_v10, %v7421_v36  ;;  %v11617_v6 = vpack.i.bf16 %v7425_v10, %v7421_v36 }
 0x60a   : > { %7394 = vst.msk [vmem:[#allocation2 + $0x68] sm:$0xff] %vm7387_vm3, %v7381_v11 }
 0x60b   : > { %7409 = vst.msk [vmem:[#allocation2 + $0x68] sm:$0xff] %vm7406_vm6, %v11863_v0  ;;  %11573 = vrot.lane.b32.xlu1 %v11572_v37, %s11881_s11  ;;  %11578 = vrot.lane.b32.xlu0 %v11577_v45, %s11881_s11 }
 0x60c   : > { %v7795_v46 = vld [vmem:[#allocation2 + $0x40] sm:$0xff]  ;;  %10515 = vmatpush1.bf16.msra.mxu0 %v10514_v18 }
 0x60d   : > { %v13924_v9 = vpack.i.bf16 %v7795_v46, %v13864_v15  ;;  %10516 = vmatprep.subr.bf16.mxu0 %v11886_v49 }
 0x60e   : > { %v7415_v57 = vld [vmem:[#allocation2 + $0x18] sm:$0xff] }
 0x60f   : > { %v11587_v14 = vpack.i.bf16 %v7795_v46, %v7415_v57  ;;  %v10517_v23 = vpack.c.bf16 %v7795_v46, %v7415_v57  ;;  %11583 = vrot.lane.b32.xlu1 %v13924_v9, %s11864_s21  ;;  %9659 = vmatmul.mubr.msk.f32.vlgmr.msra.gmra.mrb[16].mxu0 %vm2747_vm12, %v7430_v63  ;;  %v11597_v21 = vpack.i.bf16 %v7415_v57, %v13855_v25  ;;  %v7789_v25 = vld [vmem:[%s14248_s8] sm:$0xf] }
 0x610   : > { %v7427_v7 = vld [vmem:[#allocation2 + $0x90] sm:$0xff]  ;;  %10129 = vmatprep.mubr.msk.f32.mxu0 %vm11887_vm9, %v11863_v0 }
 0x611   : > { %11588 = vrot.lane.b32.xlu0 %v11587_v14, %s11881_s11  ;;  %10518 = vmatpush3.bf16.msra.mxu0 %v10517_v23  ;;  %v11602_v55 = vpack.i.bf16 %v7427_v7, %v13888_v51 }
 0x612   : > { %v7423_v15 = vld [vmem:[#allocation2 + $0x68] sm:$0xff]  ;;  %10519 = vmatprep.subr.bf16.mxu0 %v11886_v49 }
 0x613   : > { %v11607_v34 = vpack.i.bf16 %v7427_v7, %v7423_v15  ;;  %v10520_v38 = vpack.c.bf16 %v7427_v7, %v7423_v15  ;;  %v11612_v43 = vpack.i.bf16 %v7423_v15, %v13874_v41  ;;  %v8007_v41 = vld [vmem:[%s14248_s8] sm:$0xf] }
 0x615   : > { %11593 = vrot.lane.b32.xlu0 %v13932_v52, %s11864_s21  ;;  %11608 = vrot.lane.b32.xlu1 %v11607_v34, %s11881_s11 }
 0x616   : > { %10521 = vmatpush3.bf16.msra.mxu0 %v10520_v38 }
 0x619   : > { %11598 = vrot.lane.b32.xlu0 %v11597_v21, %s11864_s21  ;;  %11613 = vrot.lane.b32.xlu1 %v11612_v43, %s11864_s21 }
 0x61a   : > { %10130 = vmatmul.mubr.msk.f32.vlgmr.msra.gmra.mrb[18].mxu0 %vm2747_vm12, %v7430_v63 }
 0x61b   : > { %7712 = vmatprep.mubr.f32.mxu0 %v11863_v0 }
 0x61d   : > { %11603 = vrot.lane.b32.xlu0 %v11602_v55, %s11864_s21  ;;  %11618 = vrot.lane.b32.xlu1 %v11617_v6, %s11864_s21 }
 0x621   : > { %7803 = vrot.lane.b32.xlu0 %v7789_v25, %s11882_s24  ;;  %11623 = vrot.lane.b32.xlu1 %v11597_v21, %s11883_s20 }
 0x625   : > { %11628 = vrot.lane.b32.xlu0 %v13924_v9, %s11883_s20  ;;  %11633 = vrot.lane.b32.xlu1 %v13932_v52, %s11883_s20 }
 0x629   : > { %11643 = vrot.lane.b32.xlu0 %v11612_v43, %s11883_s20  ;;  %11638 = vrot.lane.b32.xlu1 %v11602_v55, %s11883_s20 }
 0x62d   : > { %11648 = vrot.lane.b32.xlu0 %v11617_v6, %s11883_s20  ;;  %8021 = vrot.lane.b32.xlu1 %v8007_v41, %s11884_s30 }
 0x631   : > { %11653 = vrot.lane.b32.xlu0 %v11597_v21, %s11868_s17  ;;  %11658 = vrot.lane.b32.xlu1 %v13924_v9, %s11868_s17 }
 0x635   : > { %11663 = vrot.lane.b32.xlu0 %v13932_v52, %s11868_s17  ;;  %11673 = vrot.lane.b32.xlu1 %v11612_v43, %s11868_s17 }
 0x639   : > { %11668 = vrot.lane.b32.xlu0 %v11602_v55, %s11868_s17  ;;  %11678 = vrot.lane.b32.xlu1 %v11617_v6, %s11868_s17 }
 0x63d   : > { %11683 = vrot.lane.b32.xlu0 %v11597_v21, %s11870_s19  ;;  %11688 = vrot.lane.b32.xlu1 %v13924_v9, %s11870_s19 }
 0x641   : > { %11693 = vrot.lane.b32.xlu0 %v13932_v52, %s11870_s19  ;;  %11703 = vrot.lane.b32.xlu1 %v11612_v43, %s11870_s19 }
 0x645   : > { %11698 = vrot.lane.b32.xlu0 %v11602_v55, %s11870_s19  ;;  %11708 = vrot.lane.b32.xlu1 %v11617_v6, %s11870_s19 }
 0x649   : > { %8441 = vrot.lane.b32.xlu0 %v13984_v16, %s11880_s29  ;;  %11713 = vrot.lane.b32.xlu1 %v11597_v21, %s11885_s27  ;;  %s14280_s29 = smov 92  }
 0x64d   : > { %11718 = vrot.lane.b32.xlu0 %v13924_v9, %s11885_s27  ;;  %11723 = vrot.lane.b32.xlu1 %v13932_v52, %s11885_s27 }
 0x651   : > { %11733 = vrot.lane.b32.xlu0 %v11612_v43, %s11885_s27  ;;  %11728 = vrot.lane.b32.xlu1 %v11602_v55, %s11885_s27 }
 0x655   : > { %11738 = vrot.lane.b32.xlu0 %v11617_v6, %s11885_s27  ;;  %8647 = vrot.lane.b32.xlu1 %v8633_v48, %s11882_s24 }
 0x659   : > { %11743 = vrot.lane.b32.xlu0 %v11597_v21, %s14280_s29  ;;  %11748 = vrot.lane.b32.xlu1 %v13924_v9, %s14280_s29 }
 0x65d   : > { %11753 = vrot.lane.b32.xlu0 %v13932_v52, %s14280_s29  ;;  %11763 = vrot.lane.b32.xlu1 %v11612_v43, %s14280_s29 }
 0x661   : > { %11758 = vrot.lane.b32.xlu0 %v11602_v55, %s14280_s29  ;;  %11768 = vrot.lane.b32.xlu1 %v11617_v6, %s14280_s29 }
 0x665   : > { %8865 = vrot.lane.b32.xlu0 %v8851_v47, %s11884_s30  ;;  %11773 = vrot.lane.b32.xlu1 %v11597_v21, %s14279_s23 }
 0x669   : > { %11778 = vrot.lane.b32.xlu0 %v13924_v9, %s14279_s23  ;;  %11783 = vrot.lane.b32.xlu1 %v13932_v52, %s14279_s23 }
 0x66d   : > { %11793 = vrot.lane.b32.xlu0 %v11612_v43, %s14279_s23  ;;  %11788 = vrot.lane.b32.xlu1 %v11602_v55, %s14279_s23 }
 0x671   : > { %11798 = vrot.lane.b32.xlu0 %v11617_v6, %s14279_s23  ;;  %9288 = vperm.xlu1 %11021, %v9285_v60   ;;  %v11559_v32 = vpop.permute.xlu0 %11558 }
 0x672   : > { %v11561_v58 = vunpack.i.h.bf16 %v11559_v32  ;;  %v11560_v59 = vunpack.i.l.bf16 %v11559_v32 }
 0x674   : > { %v7622_v61 = vsel %vm2978_vm10, %v11555_v20, %v11560_v59  ;;  %v7623_v53 = vsel %vm2978_vm10, %v11560_v59, %v11561_v58 }
 0x675   : > { %v11564_v12 = vpop.permute.xlu1 %11563 }
 0x676   : > { %v11566_v51 = vunpack.i.h.bf16 %v11564_v12  ;;  %v11565_v30 = vunpack.i.l.bf16 %v11564_v12 }
 0x678   : > { %v7625_v26 = vsel %vm2978_vm10, %v11556_v4, %v11565_v30  ;;  %v7626_v39 = vsel %vm2978_vm10, %v11565_v30, %v11566_v51 }
 0x679   : > { %v10524_v40 = vpack.c.bf16 %v7625_v26, %v7622_v61  ;;  %v11569_v24 = vpop.permute.xlu1 %11568  ;;  %v10522_v50 = vpack.c.bf16 %v7626_v39, %v7623_v53 }
 0x67a   : > { %v11571_v42 = vunpack.i.h.bf16 %v11569_v24  ;;  %v11570_v19 = vunpack.i.l.bf16 %v11569_v24 }
 0x67b   : > { %10523 = vmatprep.subr.bf16.mxu0 %v10522_v50 }
 0x67c   : > { %10525 = vmatpush1.bf16.msra.mxu0 %v10524_v40  ;;  %v7629_v56 = vsel %vm2978_vm10, %v11570_v19, %v11571_v42 }
 0x67d   : > { %v11574_v17 = vpop.permute.xlu1 %11573  ;;  %v11579_v54 = vpop.permute.xlu0 %11578 }
 0x67e   : > { %v11576_v2 = vunpack.i.h.bf16 %v11574_v17  ;;  %v11575_v8 = vunpack.i.l.bf16 %v11574_v17  ;;  %v11581_v35 = vunpack.i.h.bf16 %v11579_v54  ;;  %v11580_v3 = vunpack.i.l.bf16 %v11579_v54 }
 0x680   : > { %v7628_v31 = vsel %vm2978_vm10, %v11575_v8, %v11570_v19  ;;  %v7631_v36 = vsel %vm2978_vm10, %v11576_v2, %v11580_v3  ;;  %v7632_v44 = vsel %vm2978_vm10, %v11580_v3, %v11581_v35 }
 0x681   : > { %v10528_v13 = vpack.c.bf16 %v7631_v36, %v7628_v31  ;;  %v14031_v5 = vpop.permute.xlu1 %11583  ;;  %v10526_v33 = vpack.c.bf16 %v7632_v44, %v7629_v56 }
 0x682   : > { %v11586_v14 = vunpack.i.h.bf16 %v14031_v5  ;;  %v11585_v23 = vunpack.i.l.bf16 %v14031_v5 }
 0x683   : > { %v11589_v62 = vpop.permute.xlu0 %11588  ;;  %10527 = vmatprep.subr.bf16.mxu0 %v10526_v33 }
 0x684   : > { %v11591_v37 = vunpack.i.h.bf16 %v11589_v62  ;;  %v11590_v11 = vunpack.i.l.bf16 %v11589_v62  ;;  %10529 = vmatpush1.bf16.msra.mxu0 %v10528_v13  ;;  %v7844_v41 = vsel %vm437_vm0, %v11585_v23, %v11586_v14 }
 0x685   : > { %10530 = vmatprep.subr.bf16.mxu0 %v11886_v49 }
 0x686   : > { %v7627_v10 = vsel %vm2978_vm10, %v11566_v51, %v11591_v37  ;;  %v7624_v45 = vsel %vm2978_vm10, %v11561_v58, %v11590_v11 }
 0x687   : > { %v10531_v18 = vpack.c.bf16 %v7627_v10, %v7624_v45  ;;  %v11594_v46 = vpop.permute.xlu0 %11593  ;;  %v11609_v63 = vpop.permute.xlu1 %11608  ;;  %9661 = vmatmul.mubr.msk.f32.vlgmr.msra.gmra.mrb[16].mxu0 %vm2747_vm12, %v13839_v22 }
 0x688   : > { %v11611_v9 = vunpack.i.h.bf16 %v11609_v63  ;;  %v11610_v57 = vunpack.i.l.bf16 %v11609_v63  ;;  %v11596_v52 = vunpack.i.h.bf16 %v11594_v46  ;;  %10140 = vmatprep.mubr.msk.f32.mxu0 %vm11887_vm9, %v11863_v0  ;;  %v11595_v43 = vunpack.i.l.bf16 %v11594_v46 }
 0x689   : > { %10532 = vmatpush3.bf16.msra.mxu0 %v10531_v18 }
 0x68a   : > { %v7633_v7 = vsel %vm2978_vm10, %v11581_v35, %v11611_v9  ;;  %v7630_v15 = vsel %vm2978_vm10, %v11571_v42, %v11610_v57  ;;  %10533 = vmatprep.subr.bf16.mxu0 %v11886_v49  ;;  %v7843_v25 = vsel %vm437_vm0, %v11596_v52, %v11585_v23 }
 0x68b   : > { %v10534_v34 = vpack.c.bf16 %v7633_v7, %v7630_v15  ;;  %v11599_v38 = vpop.permute.xlu0 %11598  ;;  %v11614_v21 = vpop.permute.xlu1 %11613 }
 0x68c   : > { %v11601_v6 = vunpack.i.h.bf16 %v11599_v38  ;;  %v11600_v55 = vunpack.i.l.bf16 %v11599_v38  ;;  %v11616_v47 = vunpack.i.h.bf16 %v11614_v21  ;;  %v11615_v1 = vunpack.i.l.bf16 %v11614_v21 }
 0x68d   : > { %10535 = vmatpush3.bf16.msra.mxu0 %v10534_v34 }
 0x68e   : > { %v7841_v48 = vsel %vm437_vm0, %v11595_v43, %v11600_v55  ;;  %v7842_v60 = vsel %vm437_vm0, %v11600_v55, %v11601_v6  ;;  %v7846_v53 = vsel %vm437_vm0, %v11615_v1, %v11616_v47  ;;  %v10545_v2 = vpack.c.bf16 %v11586_v14, %v11601_v6 }
 0x68f   : > { %v10538_v32 = vpack.c.bf16 %v7843_v25, %v7841_v48  ;;  %v11604_v4 = vpop.permute.xlu0 %11603  ;;  %v11619_v20 = vpop.permute.xlu1 %11618  ;;  %v10536_v58 = vpack.c.bf16 %v7844_v41, %v7842_v60 }
 0x690   : > { %v11606_v59 = vunpack.i.h.bf16 %v11604_v4  ;;  %v11605_v12 = vunpack.i.l.bf16 %v11604_v4  ;;  %v11621_v51 = vunpack.i.h.bf16 %v11619_v20  ;;  %v11620_v30 = vunpack.i.l.bf16 %v11619_v20  ;;  %10141 = vmatmul.mubr.msk.f32.vlgmr.msra.gmra.mrb[20].mxu0 %vm2747_vm12, %v13839_v22 }
 0x691   : > { %10537 = vmatprep.subr.bf16.mxu0 %v10536_v58  ;;  %7927 = vmatprep.mubr.f32.mxu0 %v11863_v0 }
 0x692   : > { %v7847_v61 = vsel %vm437_vm0, %v11621_v51, %v11605_v12  ;;  %v7845_v26 = vsel %vm437_vm0, %v11620_v30, %v11615_v1  ;;  %10539 = vmatpush1.bf16.msra.mxu0 %v10538_v32  ;;  %v7848_v39 = vsel %vm437_vm0, %v11605_v12, %v11606_v59  ;;  %v10548_v56 = vpack.c.bf16 %v11606_v59, %v11616_v47 }
 0x693   : > { %v10542_v40 = vpack.c.bf16 %v7847_v61, %v7845_v26  ;;  %v7804_v24 = vpop.permute.xlu0 %7803  ;;  %v11624_v50 = vpop.permute.xlu1 %11623  ;;  %v10540_v42 = vpack.c.bf16 %v7848_v39, %v7846_v53  ;;  %vm9305_vm0 = vcmask 257024  }
 0x694   : > { %v11626_v19 = vunpack.i.h.bf16 %v11624_v50  ;;  %v11625_v22 = vunpack.i.l.bf16 %v11624_v50 }
 0x695   : > { %10541 = vmatprep.subr.bf16.mxu0 %v10540_v42 }
 0x696   : > { %10543 = vmatpush1.bf16.msra.mxu0 %v10542_v40  ;;  %v8060_v5 = vsel %vm3463_vm11, %v11625_v22, %v11626_v19 }
 0x697   : > { %v11629_v17 = vpop.permute.xlu0 %11628  ;;  %v11634_v54 = vpop.permute.xlu1 %11633  ;;  %10544 = vmatprep.subr.bf16.mxu0 %v11886_v49 }
 0x698   : > { %v11631_v8 = vunpack.i.h.bf16 %v11629_v17  ;;  %v11630_v35 = vunpack.i.l.bf16 %v11629_v17  ;;  %v11636_v3 = vunpack.i.h.bf16 %v11634_v54  ;;  %v11635_v31 = vunpack.i.l.bf16 %v11634_v54 }
 0x699   : > { %9663 = vmatmul.mubr.msk.f32.vlgmr.msra.gmra.mrb[16].mxu0 %vm2747_vm12, %v7804_v24 }
 0x69a   : > { %10546 = vmatpush3.bf16.msra.mxu0 %v10545_v2  ;;  %v8062_v36 = vsel %vm3463_vm11, %v11630_v35, %v11631_v8  ;;  %10151 = vmatprep.mubr.msk.f32.mxu0 %vm11887_vm9, %v11863_v0  ;;  %v8061_v10 = vsel %vm3463_vm11, %v11636_v3, %v11630_v35  ;;  %v8059_v45 = vsel %vm3463_vm11, %v11635_v31, %v11625_v22 }
 0x69b   : > { %v11644_v44 = vpop.permute.xlu0 %11643  ;;  %v11639_v13 = vpop.permute.xlu1 %11638  ;;  %10547 = vmatprep.subr.bf16.mxu0 %v11886_v49  ;;  %v10550_v18 = vpack.c.bf16 %v8062_v36, %v8060_v5  ;;  %v10552_v14 = vpack.c.bf16 %v8061_v10, %v8059_v45  ;;  %v10559_v1 = vpack.c.bf16 %v11631_v8, %v11626_v19 }
 0x69c   : > { %v11646_v33 = vunpack.i.h.bf16 %v11644_v44  ;;  %v11645_v62 = vunpack.i.l.bf16 %v11644_v44  ;;  %v11641_v37 = vunpack.i.h.bf16 %v11639_v13  ;;  %v11640_v11 = vunpack.i.l.bf16 %v11639_v13 }
 0x69e   : > { %10549 = vmatpush3.bf16.msra.mxu0 %v10548_v56  ;;  %v8064_v46 = vsel %vm3463_vm11, %v11645_v62, %v11646_v33  ;;  %v8066_v63 = vsel %vm3463_vm11, %v11640_v11, %v11641_v37  ;;  %v10562_v58 = vpack.c.bf16 %v11641_v37, %v11646_v33 }
 0x69f   : > { %v11649_v9 = vpop.permute.xlu0 %11648  ;;  %v8022_v57 = vpop.permute.xlu1 %8021  ;;  %10551 = vmatprep.subr.bf16.mxu0 %v10550_v18  ;;  %v10554_v7 = vpack.c.bf16 %v8066_v63, %v8064_v46 }
 0x6a0   : > { %v11651_v23 = vunpack.i.h.bf16 %v11649_v9  ;;  %v11650_v52 = vunpack.i.l.bf16 %v11649_v9 }
 0x6a1   : > { %10152 = vmatmul.mubr.msk.f32.vlgmr.msra.gmra.mrb[22].mxu0 %vm2747_vm12, %v7804_v24 }
 0x6a2   : > { %v8063_v15 = vsel %vm3463_vm11, %v11650_v52, %v11645_v62  ;;  %v8065_v34 = vsel %vm3463_vm11, %v11651_v23, %v11640_v11  ;;  %10553 = vmatpush1.bf16.msra.mxu0 %v10552_v14  ;;  %8145 = vmatprep.mubr.f32.mxu0 %v11863_v0 }
 0x6a3   : > { %v10556_v38 = vpack.c.bf16 %v8065_v34, %v8063_v15  ;;  %v11654_v21 = vpop.permute.xlu0 %11653  ;;  %v11659_v43 = vpop.permute.xlu1 %11658  ;;  %10555 = vmatprep.subr.bf16.mxu0 %v10554_v7 }
 0x6a4   : > { %v11656_v6 = vunpack.i.h.bf16 %v11654_v21  ;;  %v11655_v55 = vunpack.i.l.bf16 %v11654_v21  ;;  %v11661_v25 = vunpack.i.h.bf16 %v11659_v43  ;;  %v11660_v41 = vunpack.i.l.bf16 %v11659_v43 }
 0x6a6   : > { %10557 = vmatpush1.bf16.msra.mxu0 %v10556_v38  ;;  %v8275_v60 = vsel %vm1105_vm4, %v11655_v55, %v11656_v6  ;;  %v8277_v32 = vsel %vm1105_vm4, %v11660_v41, %v11661_v25  ;;  %v10573_v37 = vpack.c.bf16 %v11661_v25, %v11656_v6 }
 0x6a7   : > { %v11664_v48 = vpop.permute.xlu0 %11663  ;;  %v11674_v47 = vpop.permute.xlu1 %11673  ;;  %10558 = vmatprep.subr.bf16.mxu0 %v11886_v49  ;;  %v10564_v51 = vpack.c.bf16 %v8277_v32, %v8275_v60 }
 0x6a8   : > { %v11666_v4 = vunpack.i.h.bf16 %v11664_v48  ;;  %v11665_v20 = vunpack.i.l.bf16 %v11664_v48  ;;  %v11676_v30 = vunpack.i.h.bf16 %v11674_v47  ;;  %v11675_v61 = vunpack.i.l.bf16 %v11674_v47 }
 0x6a9   : > { %9665 = vmatmul.mubr.msk.f32.vlgmr.msra.gmra.mrb[16].mxu0 %vm2747_vm12, %v8022_v57 }
 0x6aa   : > { %10560 = vmatpush3.bf16.msra.mxu0 %v10559_v1  ;;  %10162 = vmatprep.mubr.msk.f32.mxu0 %vm11887_vm9, %v11863_v0  ;;  %v8274_v39 = vsel %vm1105_vm4, %v11665_v20, %v11655_v55  ;;  %v8276_v40 = vsel %vm1105_vm4, %v11666_v4, %v11660_v41  ;;  %v8279_v54 = vsel %vm1105_vm4, %v11675_v61, %v11676_v30 }
 0x6ab   : > { %v11669_v59 = vpop.permute.xlu0 %11668  ;;  %v11679_v12 = vpop.permute.xlu1 %11678  ;;  %10561 = vmatprep.subr.bf16.mxu0 %v11886_v49  ;;  %v10566_v17 = vpack.c.bf16 %v8276_v40, %v8274_v39 }
 0x6ac   : > { %v11671_v26 = vunpack.i.h.bf16 %v11669_v59  ;;  %v11670_v53 = vunpack.i.l.bf16 %v11669_v59  ;;  %v11681_v24 = vunpack.i.h.bf16 %v11679_v12  ;;  %v11680_v50 = vunpack.i.l.bf16 %v11679_v12 }
 0x6ae   : > { %10563 = vmatpush3.bf16.msra.mxu0 %v10562_v58  ;;  %v8281_v42 = vsel %vm1105_vm4, %v11670_v53, %v11671_v26  ;;  %v8280_v2 = vsel %vm1105_vm4, %v11681_v24, %v11670_v53  ;;  %v8278_v8 = vsel %vm1105_vm4, %v11680_v50, %v11675_v61  ;;  %v10576_v14 = vpack.c.bf16 %v11671_v26, %v11676_v30 }
 0x6af   : > { %v14081_v19 = vpop.permute.xlu0 %11683  ;;  %v14083_v22 = vpop.permute.xlu1 %11688  ;;  %10565 = vmatprep.subr.bf16.mxu0 %v10564_v51  ;;  %v10568_v35 = vpack.c.bf16 %v8281_v42, %v8279_v54  ;;  %v10570_v36 = vpack.c.bf16 %v8280_v2, %v8278_v8 }
 0x6b0   : > { %v11686_v56 = vunpack.i.h.bf16 %v14081_v19  ;;  %v11685_v44 = vunpack.i.l.bf16 %v14081_v19  ;;  %v11691_v13 = vunpack.i.h.bf16 %v14083_v22  ;;  %v11690_v5 = vunpack.i.l.bf16 %v14083_v22 }
 0x6b1   : > { %10163 = vmatmul.mubr.msk.f32.vlgmr.msra.gmra.mrb[24].mxu0 %vm2747_vm12, %v8022_v57 }
 0x6b2   : > { %10567 = vmatpush1.bf16.msra.mxu0 %v10566_v17  ;;  %8361 = vmatprep.mubr.f32.mxu0 %v11863_v0  ;;  %v8468_v45 = vsel %vm1349_vm5, %v11685_v44, %v11686_v56  ;;  %v8470_v18 = vsel %vm1349_vm5, %v11690_v5, %v11691_v13 }
 0x6b3   : > { %v11694_v3 = vpop.permute.xlu0 %11693  ;;  %v14090_v31 = vpop.permute.xlu1 %11703  ;;  %10569 = vmatprep.subr.bf16.mxu0 %v10568_v35  ;;  %v10578_v7 = vpack.c.bf16 %v8470_v18, %v8468_v45 }
 0x6b4   : > { %v11696_v11 = vunpack.i.h.bf16 %v11694_v3  ;;  %v11695_v10 = vunpack.i.l.bf16 %v11694_v3  ;;  %v11706_v23 = vunpack.i.h.bf16 %v14090_v31  ;;  %v11705_v52 = vunpack.i.l.bf16 %v14090_v31 }
 0x6b6   : > { %10571 = vmatpush1.bf16.msra.mxu0 %v10570_v36  ;;  %v8467_v15 = vsel %vm1349_vm5, %v11695_v10, %v11685_v44  ;;  %v8469_v34 = vsel %vm1349_vm5, %v11696_v11, %v11690_v5  ;;  %v8472_v41 = vsel %vm1349_vm5, %v11705_v52, %v11706_v23 }
 0x6b7   : > { %v14096_v33 = vpop.permute.xlu0 %11698  ;;  %v11709_v62 = vpop.permute.xlu1 %11708  ;;  %10572 = vmatprep.subr.bf16.mxu0 %v11886_v49  ;;  %v10580_v25 = vpack.c.bf16 %v8469_v34, %v8467_v15 }
 0x6b8   : > { %v11701_v46 = vunpack.i.h.bf16 %v14096_v33  ;;  %v11700_v63 = vunpack.i.l.bf16 %v14096_v33  ;;  %v11711_v38 = vunpack.i.h.bf16 %v11709_v62  ;;  %v11710_v21 = vunpack.i.l.bf16 %v11709_v62 }
 0x6b9   : > { %9667 = vmatmul.mubr.msk.f32.vlgmr.msra.gmra.mrb[16].mxu0 %vm2747_vm12, %v13984_v16 }
 0x6ba   : > { %10574 = vmatpush3.bf16.msra.mxu0 %v10573_v37  ;;  %10173 = vmatprep.mubr.msk.f32.mxu0 %vm11887_vm9, %v11863_v0  ;;  %v8474_v43 = vsel %vm1349_vm5, %v11700_v63, %v11701_v46  ;;  %v8473_v48 = vsel %vm1349_vm5, %v11711_v38, %v11700_v63  ;;  %v8471_v47 = vsel %vm1349_vm5, %v11710_v21, %v11705_v52 }
 0x6bb   : > { %v14107_v9 = vpop.permute.xlu0 %8441  ;;  %v14109_v57 = vpop.permute.xlu1 %11713  ;;  %10575 = vmatprep.subr.bf16.mxu0 %v11886_v49  ;;  %v10582_v1 = vpack.c.bf16 %v8474_v43, %v8472_v41  ;;  %v10584_v4 = vpack.c.bf16 %v8473_v48, %v8471_v47  ;;  %v10590_v22 = vpack.c.bf16 %v11701_v46, %v11706_v23 }
 0x6bc   : > { %v11716_v51 = vunpack.i.h.bf16 %v14109_v57  ;;  %v11715_v30 = vunpack.i.l.bf16 %v14109_v57 }
 0x6be   : > { %10577 = vmatpush3.bf16.msra.mxu0 %v10576_v14  ;;  %v8686_v54 = vsel %vm4242_vm1, %v11715_v30, %v11716_v51 }
 0x6bf   : > { %v14117_v6 = vpop.permute.xlu0 %11718  ;;  %v11724_v55 = vpop.permute.xlu1 %11723  ;;  %10579 = vmatprep.subr.bf16.mxu0 %v10578_v7 }
 0x6c0   : > { %v11721_v20 = vunpack.i.h.bf16 %v14117_v6  ;;  %v11720_v58 = vunpack.i.l.bf16 %v14117_v6  ;;  %v11726_v61 = vunpack.i.h.bf16 %v11724_v55  ;;  %v11725_v26 = vunpack.i.l.bf16 %v11724_v55 }
 0x6c1   : > { %10174 = vmatmul.mubr.msk.f32.vlgmr.msra.gmra.mrb[26].mxu0 %vm2747_vm12, %v13984_v16  ;;  %v10587_v16 = vpack.c.bf16 %v11691_v13, %v11686_v56 }
 0x6c2   : > { %10581 = vmatpush1.bf16.msra.mxu0 %v10580_v25  ;;  %8553 = vmatprep.mubr.f32.mxu0 %v11863_v0  ;;  %v8688_v53 = vsel %vm4242_vm1, %v11720_v58, %v11721_v20  ;;  %v8687_v17 = vsel %vm4242_vm1, %v11726_v61, %v11720_v58  ;;  %v8685_v2 = vsel %vm4242_vm1, %v11725_v26, %v11715_v30 }
 0x6c3   : > { %v14125_v60 = vpop.permute.xlu0 %11733  ;;  %v14127_v32 = vpop.permute.xlu1 %11728  ;;  %10583 = vmatprep.subr.bf16.mxu0 %v10582_v1  ;;  %v10592_v3 = vpack.c.bf16 %v8688_v53, %v8686_v54  ;;  %v10594_v13 = vpack.c.bf16 %v8687_v17, %v8685_v2 }
 0x6c4   : > { %v11736_v39 = vunpack.i.h.bf16 %v14125_v60  ;;  %v11735_v40 = vunpack.i.l.bf16 %v14125_v60  ;;  %v11731_v24 = vunpack.i.h.bf16 %v14127_v32  ;;  %v11730_v50 = vunpack.i.l.bf16 %v14127_v32 }
 0x6c6   : > { %10585 = vmatpush1.bf16.msra.mxu0 %v10584_v4  ;;  %v8690_v31 = vsel %vm4242_vm1, %v11735_v40, %v11736_v39  ;;  %v8692_v36 = vsel %vm4242_vm1, %v11730_v50, %v11731_v24  ;;  %v10604_v21 = vpack.c.bf16 %v11731_v24, %v11736_v39 }
 0x6c7   : > { %v11739_v59 = vpop.permute.xlu0 %11738  ;;  %v14131_v12 = vpop.permute.xlu1 %8647  ;;  %10586 = vmatprep.subr.bf16.mxu0 %v11886_v49  ;;  %v10596_v62 = vpack.c.bf16 %v8692_v36, %v8690_v31 }
 0x6c8   : > { %v11741_v8 = vunpack.i.h.bf16 %v11739_v59  ;;  %v11740_v35 = vunpack.i.l.bf16 %v11739_v59 }
 0x6c9   : > { %9669 = vmatmul.mubr.msk.f32.vlgmr.msra.gmra.mrb[16].mxu0 %vm2747_vm12, %v14107_v9 }
 0x6ca   : > { %10588 = vmatpush3.bf16.msra.mxu0 %v10587_v16  ;;  %10184 = vmatprep.mubr.msk.f32.mxu0 %vm11887_vm9, %v11863_v0  ;;  %v8689_v5 = vsel %vm4242_vm1, %v11740_v35, %v11735_v40  ;;  %v8691_v33 = vsel %vm4242_vm1, %v11741_v8, %v11730_v50 }
 0x6cb   : > { %v14145_v42 = vpop.permute.xlu0 %11743  ;;  %v14147_v19 = vpop.permute.xlu1 %11748  ;;  %10589 = vmatprep.subr.bf16.mxu0 %v11886_v49  ;;  %v10598_v11 = vpack.c.bf16 %v8691_v33, %v8689_v5 }
 0x6cc   : > { %v11746_v10 = vunpack.i.h.bf16 %v14145_v42  ;;  %v11745_v45 = vunpack.i.l.bf16 %v14145_v42  ;;  %v11751_v18 = vunpack.i.h.bf16 %v14147_v19  ;;  %v11750_v46 = vunpack.i.l.bf16 %v14147_v19 }
 0x6ce   : > { %10591 = vmatpush3.bf16.msra.mxu0 %v10590_v22  ;;  %v8904_v52 = vsel %vm1837_vm7, %v11745_v45, %v11746_v10  ;;  %v8906_v7 = vsel %vm1837_vm7, %v11750_v46, %v11751_v18  ;;  %v10615_v39 = vpack.c.bf16 %v11751_v18, %v11746_v10 }
 0x6cf   : > { %v11754_v56 = vpop.permute.xlu0 %11753  ;;  %v14155_v44 = vpop.permute.xlu1 %11763  ;;  %10593 = vmatprep.subr.bf16.mxu0 %v10592_v3  ;;  %v10606_v55 = vpack.c.bf16 %v8906_v7, %v8904_v52 }
 0x6d0   : > { %v11756_v14 = vunpack.i.h.bf16 %v11754_v56  ;;  %v11755_v23 = vunpack.i.l.bf16 %v11754_v56  ;;  %v11766_v43 = vunpack.i.h.bf16 %v14155_v44  ;;  %v11765_v6 = vunpack.i.l.bf16 %v14155_v44 }
 0x6d1   : > { %10185 = vmatmul.mubr.msk.f32.vlgmr.msra.gmra.mrb[28].mxu0 %vm2747_vm12, %v14107_v9  ;;  %v10601_v9 = vpack.c.bf16 %v11721_v20, %v11716_v51 }
 0x6d2   : > { %10595 = vmatpush1.bf16.msra.mxu0 %v10594_v13  ;;  %8771 = vmatprep.mubr.f32.mxu0 %v11863_v0  ;;  %v8903_v25 = vsel %vm1837_vm7, %v11755_v23, %v11745_v45  ;;  %v8905_v41 = vsel %vm1837_vm7, %v11756_v14, %v11750_v46  ;;  %v8908_v4 = vsel %vm1837_vm7, %v11765_v6, %v11766_v43  ;;  %v9069_v46 = vld [vmem:[%s14248_s8 + $0x8] sm:$0xf] }
 0x6d3   : > { %v14162_v37 = vpop.permute.xlu0 %11758  ;;  %10597 = vmatprep.subr.bf16.mxu0 %v10596_v62  ;;  %v11769_v63 = vpop.permute.xlu1 %11768  ;;  %v10608_v32 = vpack.c.bf16 %v8905_v41, %v8903_v25 }
 0x6d4   : > { %v11761_v15 = vunpack.i.h.bf16 %v14162_v37  ;;  %v11760_v34 = vunpack.i.l.bf16 %v14162_v37  ;;  %v11771_v48 = vunpack.i.h.bf16 %v11769_v63  ;;  %v11770_v47 = vunpack.i.l.bf16 %v11769_v63 }
 0x6d6   : > { %10599 = vmatpush1.bf16.msra.mxu0 %v10598_v11  ;;  %v8910_v60 = vsel %vm1837_vm7, %v11760_v34, %v11761_v15  ;;  %v8909_v20 = vsel %vm1837_vm7, %v11771_v48, %v11760_v34  ;;  %v8907_v58 = vsel %vm1837_vm7, %v11770_v47, %v11765_v6  ;;  %v10618_v8 = vpack.c.bf16 %v11761_v15, %v11766_v43 }
 0x6d7   : > { %10600 = vmatprep.subr.bf16.mxu0 %v11886_v49  ;;  %v14169_v57 = vpop.permute.xlu0 %8865  ;;  %v14179_v38 = vpop.permute.xlu1 %11773  ;;  %v10610_v16 = vpack.c.bf16 %v8910_v60, %v8908_v4  ;;  %v10612_v51 = vpack.c.bf16 %v8909_v20, %v8907_v58 }
 0x6d8   : > { %v11776_v40 = vunpack.i.h.bf16 %v14179_v38  ;;  %v11775_v24 = vunpack.i.l.bf16 %v14179_v38 }
 0x6d9   : > { %9671 = vmatmul.mubr.msk.f32.vlgmr.msra.gmra.mrb[16].mxu0 %vm2747_vm12, %v14131_v12 }
 0x6da   : > { %10602 = vmatpush3.bf16.msra.mxu0 %v10601_v9  ;;  %10195 = vmatprep.mubr.msk.f32.mxu0 %vm11887_vm9, %v11863_v0  ;;  %v9119_v3 = vsel %vm2081_vm8, %v11775_v24, %v11776_v40 }
 0x6db   : > { %10603 = vmatprep.subr.bf16.mxu0 %v11886_v49  ;;  %v11779_v1 = vpop.permute.xlu0 %11778  ;;  %v11784_v59 = vpop.permute.xlu1 %11783 }
 0x6dc   : > { %v11781_v61 = vunpack.i.h.bf16 %v11779_v1  ;;  %v11780_v26 = vunpack.i.l.bf16 %v11779_v1  ;;  %v11786_v50 = vunpack.i.h.bf16 %v11784_v59 }
 0x6de   : > { %10605 = vmatpush3.bf16.msra.mxu0 %v10604_v21  ;;  %v9121_v42 = vsel %vm2081_vm8, %v11780_v26, %v11781_v61  ;;  %v9120_v35 = vsel %vm2081_vm8, %v11786_v50, %v11780_v26  ;;  %v10629_v63 = vpack.c.bf16 %v11781_v61, %v11776_v40 }
 0x6df   : > { %10607 = vmatprep.subr.bf16.mxu0 %v10606_v55  ;;  %v11794_v30 = vpop.permute.xlu0 %11793  ;;  %v11789_v53 = vpop.permute.xlu1 %11788  ;;  %v10620_v44 = vpack.c.bf16 %v9121_v42, %v9119_v3 }
 0x6e0   : > { %v11796_v19 = vunpack.i.h.bf16 %v11794_v30  ;;  %v11795_v22 = vunpack.i.l.bf16 %v11794_v30  ;;  %v11791_v17 = vunpack.i.h.bf16 %v11789_v53  ;;  %v11790_v54 = vunpack.i.l.bf16 %v11789_v53 }
 0x6e1   : > { %10196 = vmatmul.mubr.msk.f32.vlgmr.msra.gmra.mrb[30].mxu0 %vm2747_vm12, %v14131_v12  ;;  %v11785_v12 = vunpack.i.l.bf16 %v11784_v59 }
 0x6e2   : > { %10609 = vmatpush1.bf16.msra.mxu0 %v10608_v32  ;;  %8989 = vmatprep.mubr.f32.mxu0 %v11863_v0  ;;  %v9123_v5 = vsel %vm2081_vm8, %v11795_v22, %v11796_v19  ;;  %v9125_v33 = vsel %vm2081_vm8, %v11790_v54, %v11791_v17  ;;  %v10632_v9 = vpack.c.bf16 %v11791_v17, %v11796_v19 }
 0x6e3   : > { %10611 = vmatprep.subr.bf16.mxu0 %v10610_v16  ;;  %v11799_v2 = vpop.permute.xlu0 %11798  ;;  %v9118_v31 = vsel %vm2081_vm8, %v11785_v12, %v11775_v24  ;;  %v10624_v45 = vpack.c.bf16 %v9125_v33, %v9123_v5 }
 0x6e4   : > { %v11801_v36 = vunpack.i.h.bf16 %v11799_v2  ;;  %v11800_v56 = vunpack.i.l.bf16 %v11799_v2  ;;  %v10622_v37 = vpack.c.bf16 %v9120_v35, %v9118_v31 }
 0x6e6   : > { %10613 = vmatpush1.bf16.msra.mxu0 %v10612_v51  ;;  %v9122_v11 = vsel %vm2081_vm8, %v11800_v56, %v11795_v22  ;;  %v9124_v10 = vsel %vm2081_vm8, %v11801_v36, %v11790_v54 }
 0x6e7   : > { %10614 = vmatprep.subr.bf16.mxu0 %v11886_v49  ;;  %v10626_v18 = vpack.c.bf16 %v9124_v10, %v9122_v11 }
 0x6e9   : > { %9673 = vmatmul.mubr.msk.f32.vlgmr.msra.gmra.mrb[16].mxu0 %vm2747_vm12, %v14169_v57 }
 0x6ea   : > { %10616 = vmatpush3.bf16.msra.mxu0 %v10615_v39  ;;  %10206 = vmatprep.mubr.msk.f32.mxu0 %vm11887_vm9, %v11863_v0 }
 0x6eb   : > { %10617 = vmatprep.subr.bf16.mxu0 %v11886_v49 }
 0x6ed   : > { %v7570_v13 = vpop.f32.mrb[18].mxu0 }
 0x6ee   : > { %10619 = vmatpush3.bf16.msra.mxu0 %v10618_v8  ;;  %v10131_v62 = vpop.f32.mrb[19].mxu0 }
 0x6ef   : > { %10621 = vmatprep.subr.bf16.mxu0 %v10620_v44 }
 0x6f0   : > { %v9289_v4 = vpop.permute.xlu1 %9288 }
 0x6f1   : > { %10207 = vmatmul.mubr.msk.f32.vlgmr.msra.gmra.mrb[32].mxu0 %vm2747_vm12, %v14169_v57 }
 0x6f2   : > { %10623 = vmatpush1.bf16.msra.mxu0 %v10622_v37  ;;  %9205 = vmatprep.mubr.f32.mxu0 %v11863_v0 }
 0x6f3   : > { %10625 = vmatprep.subr.bf16.mxu0 %v10624_v45 }
 0x6f6   : > { %10627 = vmatpush1.bf16.msra.mxu0 %v10626_v18 }
 0x6f7   : > { %10628 = vmatprep.subr.bf16.mxu0 %v11886_v49 }
 0x6f9   : > { %9675 = vmatmul.mubr.msk.f32.vlgmr.msra.gmra.mrb[16].mxu0 %vm2747_vm12, %v9069_v46 }
 0x6fa   : > { %10630 = vmatpush3.bf16.msra.mxu0 %v10629_v63  ;;  %10217 = vmatprep.mubr.msk.f32.mxu0 %vm11887_vm9, %v11863_v0 }
 0x6fb   : > { %10631 = vmatprep.subr.bf16.mxu0 %v11886_v49 }
 0x6fe   : > { %10633 = vmatpush3.bf16.msra.mxu0 %v10632_v9 }
 0x701   : > { %10218 = vmatmul.mubr.msk.f32.vlgmr.msra.gmra.mrb[34].mxu0 %vm2747_vm12, %v9069_v46 }
 0x763   : > { %v7785_v57 = vpop.f32.mrb[20].mxu0 }
 0x764   : > { %v7786_v14 = vadd.f32 %v7785_v57, %v7570_v13  ;;  %v10142_v23 = vpop.f32.mrb[21].mxu0 }
 0x774   : > { %v8000_v52 = vpop.f32.mrb[22].mxu0 }
 0x775   : > { %v8006_v7 = vadd.f32 %v8000_v52, %v7786_v14  ;;  %v10153_v15 = vpop.f32.mrb[23].mxu0 }
 0x784   : > { %v8218_v34 = vpop.f32.mrb[24].mxu0 }
 0x785   : > { %v8224_v38 = vadd.f32 %v8218_v34, %v8006_v7  ;;  %v10164_v21 = vpop.f32.mrb[25].mxu0 }
 0x794   : > { %v8434_v43 = vpop.f32.mrb[26].mxu0 }
 0x795   : > { %v8440_v6 = vadd.f32 %v8434_v43, %v8224_v38  ;;  %v10175_v55 = vpop.f32.mrb[27].mxu0 }
 0x7a4   : > { %v8626_v0 = vpop.f32.mrb[28].mxu0 }
 0x7a5   : > { %v8632_v25 = vadd.f32 %v8626_v0, %v8440_v6  ;;  %v10186_v49 = vpop.f32.mrb[29].mxu0 }
 0x7b4   : > { %v8844_v41 = vpop.f32.mrb[30].mxu0 }
 0x7b5   : > { %v8850_v48 = vadd.f32 %v8844_v41, %v8632_v25  ;;  %v10197_v47 = vpop.f32.mrb[31].mxu0 }
 0x7c4   : > { %v9062_v1 = vpop.f32.mrb[32].mxu0 }
 0x7c5   : > { %v9068_v60 = vadd.f32 %v9062_v1, %v8850_v48  ;;  %v10208_v32 = vpop.f32.mrb[33].mxu0 }
 0x7cc   : > { %v9207_v20 = vpop.f32.mrb[16].mxu0 }
 0x7cd   : > { %v9291_v58 = vadd.f32 %v9289_v4, %v9207_v20  ;;  %v9209_v59 = vpop.f32.mrb[17].mxu0 }
 0x7ce   : > { %v9292_v16 = vadd.f32 %v9289_v4, %v9209_v59 }
 0x7cf   : > { %v9294_v51 = vmax.f32 %v9291_v58, 0.0 }
 0x7d0   : > { %v9295_v30 = vmax.f32 %v9292_v16, 0.0 }
 0x7d1   : > { %v9297_v61 = vsel %vm2660_vm13, %v9294_v51, 0.0 }
 0x7d2   : > { %v9298_v26 = vsel %vm2661_vm14, %v9295_v30, 0.0 }
 0x7d3   : > { %v9302_v53 = vcombine.low %v9297_v61, %v9298_v26 }
 0x7d4   : > { %v9278_v39 = vpop.f32.mrb[34].mxu0 }
 0x7d5   : > { %9304 = vst [vmem:[%s395_s18] sm:$0xff] %v9302_v53  ;;  %v9284_v40 = vadd.f32 %v9278_v39, %v9068_v60  ;;  %v10219_v24 = vpop.f32.mrb[35].mxu0 }
 0x7d7   : > { %v9293_v50 = vadd.f32 %v9289_v4, %v9284_v40 }
 0x7d9   : > { %v9296_v12 = vmax.f32 %v9293_v50, 0.0 }
 0x7db   : > { %v9299_v42 = vsel %vm2662_vm15, %v9296_v12, 0.0 }
 0x7dc   : > { %9306 = vst.msk [vmem:[%s395_s18 + $0x8] sm:$0xf] %vm9305_vm0, %v9299_v42 }
 0x7dd PF: > { %s20_s15 = sadd.s32 1, %s11861_s15   ;;  %s14281_s13 = smov %s11857_s14 }
 0x7de   : > { %p17_p5 = scmp.ge.s32.totalorder %s20_s15, 4   ;;  %s14282_s14 = smov %s14284_s16 }
 0x7e0   :  { %19 = sbr.rel (!%p17_p5) target bundleno = 2 (0x2), region = 102 }

</bundles_post_ra>
